<compile_context>
chip_gen: v6e
topology: v6e:2x2x1
jax: 0.10.0
libtpu: 0.0.40
codegen_flags: <defaults>
</compile_context>

<pallas_src>
import math

import jax
import jax.numpy as jnp
from jax import lax
from jax.experimental import pallas as pl
from jax.experimental.pallas import tpu as pltpu


# ----------------------------------------------------------------------------
# Config mirroring the PyTorch module's `cfg`
# ----------------------------------------------------------------------------
CFG = dict(
    n_embd=32,
    n_head=4,
    n_decoder_layer=2,
    ffn_ratio=4,
    dropout=0.0,      # eval mode -> dropout is a no-op
    qkv_bias=True,
    norm_eps=1e-5,
)

_NEG = -1e30


def _gelu_tanh(x):
    # TODO(synk): PyTorch nn.GELU() defaults to the exact erf formulation; the
    # tanh approximation is used here (and in the in-file reference) since tanh
    # maps directly onto the TPU EUP.
    c = math.sqrt(2.0 / math.pi)
    return 0.5 * x * (1.0 + jnp.tanh(c * (x + 0.044715 * (x * x * x))))


# Column layout (in units of E) of the packed per-layer weight slab (E, 14E)
# and bias slab (1, 15E).  Q columns are pre-scaled by 1/sqrt(Dh).
_OFF_QKV1 = 0     # width 3  (self-attn fused q|k|v)
_OFF_O1 = 3       # width 1  (self-attn out_proj)
_OFF_P1 = 4       # width 1  (self-attn extra projection)
_OFF_Q2 = 5       # width 1  (cross-attn q)
_OFF_KV2 = 6      # width 2  (cross-attn fused k|v)
_OFF_O2 = 8       # width 1  (cross-attn out_proj)
_OFF_P2 = 9       # width 1  (cross-attn extra projection)
_OFF_F1 = 10      # width 4  (FFN first linear)
_OFF_BF2 = 14     # width 1  (bias slab only: FFN second-linear bias)


# ----------------------------------------------------------------------------
# Pallas kernel: the entire decoder stack in ONE invocation (no grid).
# ----------------------------------------------------------------------------
def _build_decoder_kernel(B, Lq, Lk, E, H, NL, eps):
    Dh = E // H
    f32 = jnp.float32

    def layer_norm(x, g, b):                     # x: (N, E); g, b: (1, E)
        mu = jnp.mean(x, axis=-1, keepdims=True)
        xc = x - mu
        var = jnp.mean(xc * xc, axis=-1, keepdims=True)
        return xc * lax.rsqrt(var + eps) * g + b

    def head_mask_for(Lsrc):
        # (H*B*Lsrc, E): row block j = h*B + b belongs to head h, which owns
        # lane band [h*Dh, (h+1)*Dh).  Doubles as the softmax-denominator
        # summation matrix (den = e @ head_mask).
        R = H * B * Lsrc
        r = lax.broadcasted_iota(jnp.int32, (R, E), 0)
        c = lax.broadcasted_iota(jnp.int32, (R, E), 1)
        m = jnp.zeros((R, E), dtype=jnp.bool_)
        for h in range(H):
            m = m | ((r >= h * B * Lsrc) & (r < (h + 1) * B * Lsrc)
                     & (c >= h * Dh) & (c < (h + 1) * Dh))
        return m.astype(f32)

    def add_mask_for(Lsrc, causal):
        # (B*Lq, H*B*Lsrc): 0 where key column (h, b, t) is visible to query
        # row (b', q) (same batch; and t <= q when causal), else -1e30.
        Rr, Cc = B * Lq, H * B * Lsrc
        r = lax.broadcasted_iota(jnp.int32, (Rr, Cc), 0)
        c = lax.broadcasted_iota(jnp.int32, (Rr, Cc), 1)
        valid = jnp.zeros((Rr, Cc), dtype=jnp.bool_)
        for h in range(H):
            for b in range(B):
                c0 = (h * B + b) * Lsrc
                ok = ((c >= c0) & (c < c0 + Lsrc)
                      & (r >= b * Lq) & (r < (b + 1) * Lq))
                if causal:
                    ok = ok & ((c - c0) <= (r - b * Lq))
                valid = valid | ok
        return jnp.where(valid, 0.0, _NEG).astype(f32)

    def attention(q, k_flat, v_flat, head_mask, add_mask):
        # Block-diagonal-over-(head, batch) attention.  K/V (B*Lsrc, E) are
        # replicated H times along sublanes and masked so each row block only
        # keeps its own head's lane band.  Then:
        #   scores  : one (B*Lq, E) x (H*B*Lsrc, E)^T matmul,
        #   context : one (B*Lq, H*B*Lsrc) x (H*B*Lsrc, E) matmul (heads merged),
        #   denom   : one matmul against head_mask (per-head sums, lane-broadcast).
        # Cross-batch / future entries get -1e30 -> exp underflows to exactly 0.
        k_stack = jnp.concatenate([k_flat] * H, axis=0) * head_mask
        v_stack = jnp.concatenate([v_flat] * H, axis=0) * head_mask
        s = lax.dot_general(q, k_stack, (((1,), (1,)), ((), ())),
                            preferred_element_type=f32)     # (B*Lq, H*B*Lsrc)
        s = s + add_mask
        m = jnp.max(s, axis=-1, keepdims=True)   # global row max (every head
        e = jnp.exp(s - m)                       #  block has >=1 valid key)
        ctx = jnp.dot(e, v_stack, preferred_element_type=f32)   # (B*Lq, E)
        den = jnp.dot(e, head_mask, preferred_element_type=f32)  # (B*Lq, E)
        return ctx / den                         # exact division (no approx rcp)

    def kernel(enc_ref, x_ref, w_ref, wf2_ref, b_ref, ln_ref, lnfin_ref, out_ref):
        enc = enc_ref[...]                       # (B*Lk, E)
        h = x_ref[...]                           # (B*Lq, E)

        # Constant masks, built once before the layer loop.
        head_mask_s = head_mask_for(Lq)
        head_mask_c = head_mask_for(Lk)
        add_mask_s = add_mask_for(Lq, causal=True)
        add_mask_c = add_mask_for(Lk, causal=False)

        def W(l, off, width):                    # weight slab column slice
            return w_ref[l, :, off * E:(off + width) * E]

        def Bv(l, off, width):                   # bias slab column slice
            return b_ref[l, :, off * E:(off + width) * E]

        for l in range(NL):                      # small static layer count -> unrolled
            # ---- masked self-attention + extra projection + residual --------
            xn = layer_norm(h, ln_ref[l, 0:1, :], ln_ref[l, 1:2, :])
            qkv = jnp.dot(xn, W(l, _OFF_QKV1, 3),
                          preferred_element_type=jnp.float32) + Bv(l, _OFF_QKV1, 3)
            a = attention(qkv[:, 0:E], qkv[:, E:2 * E], qkv[:, 2 * E:3 * E],
                          head_mask_s, add_mask_s)
            a = jnp.dot(a, W(l, _OFF_O1, 1),
                        preferred_element_type=jnp.float32) + Bv(l, _OFF_O1, 1)
            a = jnp.dot(a, W(l, _OFF_P1, 1),
                        preferred_element_type=jnp.float32) + Bv(l, _OFF_P1, 1)
            h = h + a

            # ---- cross-attention (K/V from raw encoder states) + residual ---
            xn = layer_norm(h, ln_ref[l, 2:3, :], ln_ref[l, 3:4, :])
            q = jnp.dot(xn, W(l, _OFF_Q2, 1),
                        preferred_element_type=jnp.float32) + Bv(l, _OFF_Q2, 1)
            kv = jnp.dot(enc, W(l, _OFF_KV2, 2),
                         preferred_element_type=jnp.float32) + Bv(l, _OFF_KV2, 2)
            a = attention(q, kv[:, 0:E], kv[:, E:2 * E], head_mask_c, add_mask_c)
            a = jnp.dot(a, W(l, _OFF_O2, 1),
                        preferred_element_type=jnp.float32) + Bv(l, _OFF_O2, 1)
            a = jnp.dot(a, W(l, _OFF_P2, 1),
                        preferred_element_type=jnp.float32) + Bv(l, _OFF_P2, 1)
            h = h + a

            # ---- feed-forward + residual ------------------------------------
            xn = layer_norm(h, ln_ref[l, 4:5, :], ln_ref[l, 5:6, :])
            ff = jnp.dot(xn, W(l, _OFF_F1, 4),
                         preferred_element_type=jnp.float32) + Bv(l, _OFF_F1, 4)
            ff = _gelu_tanh(ff)
            ff = jnp.dot(ff, wf2_ref[l],
                         preferred_element_type=jnp.float32) + Bv(l, _OFF_BF2, 1)
            h = h + ff

        h = layer_norm(h, lnfin_ref[0:1, :], lnfin_ref[1:2, :])   # final LayerNorm
        # NOTE: output last dim is E (=32 < 128 lanes); a single ~2 KB masked
        # store at the end of a single-invocation kernel is immaterial.
        out_ref[...] = h.astype(out_ref.dtype)

    return kernel


# ----------------------------------------------------------------------------
# One-time parameter packing (hoisted out of the per-call path).
# PyTorch conventions: Linear weights are (out, in); in_proj rows are [q; k; v].
# ----------------------------------------------------------------------------
def pack_params(params, cfg):
    E = cfg["n_embd"]
    H = cfg["n_head"]
    NL = cfg["n_decoder_layer"]
    scale = 1.0 / math.sqrt(E // H)

    w_rows, wf2_rows, b_rows, ln_rows = [], [], [], []
    for lp in params["layers"]:
        # self-attention in_proj, q part pre-scaled by 1/sqrt(Dh)
        wq1 = lp["a1_in_w"][:E].T * scale
        wk1 = lp["a1_in_w"][E:2 * E].T
        wv1 = lp["a1_in_w"][2 * E:].T
        bq1 = lp["a1_in_b"][:E] * scale
        bk1 = lp["a1_in_b"][E:2 * E]
        bv1 = lp["a1_in_b"][2 * E:]
        # cross-attention in_proj: Q (scaled) and fused K|V
        wq2 = lp["a2_in_w"][:E].T * scale
        bq2 = lp["a2_in_b"][:E] * scale
        wkv2 = lp["a2_in_w"][E:].T
        bkv2 = lp["a2_in_b"][E:]

        w_l = jnp.concatenate(
            [wq1, wk1, wv1,                 # 0..3E   fused self QKV
             lp["a1_out_w"].T,              # 3E..4E
             lp["a1_proj_w"].T,             # 4E..5E
             wq2,                           # 5E..6E
             wkv2,                          # 6E..8E  fused cross K|V
             lp["a2_out_w"].T,              # 8E..9E
             lp["a2_proj_w"].T,             # 9E..10E
             lp["ffn_w1"].T],               # 10E..14E
            axis=1)                          # (E, 14E)
        b_l = jnp.concatenate(
            [bq1, bk1, bv1,
             lp["a1_out_b"], lp["a1_proj_b"],
             bq2, bkv2,
             lp["a2_out_b"], lp["a2_proj_b"],
             lp["ffn_b1"], lp["ffn_b2"]],
            axis=0)[None, :]                 # (1, 15E)
        ln_l = jnp.stack([lp["ln1_w"], lp["ln1_b"], lp["ln2_w"], lp["ln2_b"],
                          lp["lnf_w"], lp["lnf_b"]], axis=0)   # (6, E)

        w_rows.append(w_l)
        wf2_rows.append(lp["ffn_w2"].T)      # (F, E)
        b_rows.append(b_l)
        ln_rows.append(ln_l)

    return dict(
        w_cat=jnp.stack(w_rows, axis=0),         # (NL, E, 14E)
        wf2_cat=jnp.stack(wf2_rows, axis=0),     # (NL, F, E)
        b_cat=jnp.stack(b_rows, axis=0),         # (NL, 1, 15E)
        ln_cat=jnp.stack(ln_rows, axis=0),       # (NL, 6, E)
        ln_final=jnp.stack([params["norm_w"], params["norm_b"]], axis=0),  # (2, E)
    )


# ----------------------------------------------------------------------------
# Wrapper: flattens activations and invokes the single-call kernel.
# ----------------------------------------------------------------------------
def decoder_forward(encoder_hidden_states, input_embedding, packed, cfg):
    """encoder_hidden_states: (B, Lk, E); input_embedding: (B, Lq, E) -> (B, Lq, E)."""
    B, Lq, E = input_embedding.shape
    _, Lk, _ = encoder_hidden_states.shape
    H = cfg["n_head"]
    NL = cfg["n_decoder_layer"]
    F = E * cfg["ffn_ratio"]
    eps = cfg["norm_eps"]

    enc_flat = encoder_hidden_states.reshape(B * Lk, E)
    x_flat = input_embedding.reshape(B * Lq, E)

    args = (enc_flat, x_flat, packed["w_cat"], packed["wf2_cat"],
            packed["b_cat"], packed["ln_cat"], packed["ln_final"])

    # ---- advisory cost estimate --------------------------------------------
    mm = 0
    mm += 2 * B * Lq * E * 3 * E               # fused self QKV
    mm += 2 * 2 * B * Lq * Lq * E * H          # self scores + probs@V (blockdiag)
    mm += 2 * 2 * B * Lq * E * E               # self out_proj + extra projection
    mm += 2 * B * Lq * E * E                   # cross Q
    mm += 2 * B * Lk * E * 2 * E               # cross fused K|V
    mm += 2 * 2 * B * Lq * Lk * E * H          # cross scores + probs@V
    mm += 2 * 2 * B * Lq * E * E               # cross out_proj + extra projection
    mm += 2 * 2 * B * Lq * E * F               # FFN
    flops = NL * mm
    transcendentals = NL * (B * H * Lq * (Lq + Lk)   # softmax exp
                            + B * Lq * F             # GELU tanh
                            + 7 * B * Lq)            # layernorm rsqrt (approx)
    bytes_accessed = (sum(int(a.size) * a.dtype.itemsize for a in args)
                      + B * Lq * E * 4)
    cost = pl.CostEstimate(flops=int(flops),
                           transcendentals=int(transcendentals),
                           bytes_accessed=int(bytes_accessed))

    kernel = _build_decoder_kernel(B, Lq, Lk, E, H, NL, eps)
    vmem_spec = pl.BlockSpec(memory_space=pltpu.MemorySpace.VMEM)

    # Single invocation, no grid: at these shapes any grid / core split would
    # only add per-step overhead and duplicate weight DMAs (per perf review).
    out_flat = pl.pallas_call(
        kernel,
        out_shape=jax.ShapeDtypeStruct((B * Lq, E), input_embedding.dtype),
        in_specs=[vmem_spec] * len(args),
        out_specs=vmem_spec,
        cost_estimate=cost,
    )(*args)

    return out_flat.reshape(B, Lq, E)


# ----------------------------------------------------------------------------
# Deterministic synthetic parameters (PyTorch conventions: Linear W is (out, in)).
# ----------------------------------------------------------------------------
def init_params(key, cfg):
    E = cfg["n_embd"]
    F = E * cfg["ffn_ratio"]
    NL = cfg["n_decoder_layer"]
    s = 0.15
    keys = jax.random.split(key, NL + 1)

    def rnd(k, shape):
        return s * jax.random.normal(k, shape, jnp.float32)

    layers = []
    for l in range(NL):
        ks = jax.random.split(keys[l], 22)
        layers.append(dict(
            ln1_w=1.0 + rnd(ks[0], (E,)), ln1_b=rnd(ks[1], (E,)),
            a1_in_w=rnd(ks[2], (3 * E, E)), a1_in_b=rnd(ks[3], (3 * E,)),
            a1_out_w=rnd(ks[4], (E, E)), a1_out_b=rnd(ks[5], (E,)),
            a1_proj_w=rnd(ks[6], (E, E)), a1_proj_b=rnd(ks[7], (E,)),
            ln2_w=1.0 + rnd(ks[8], (E,)), ln2_b=rnd(ks[9], (E,)),
            a2_in_w=rnd(ks[10], (3 * E, E)), a2_in_b=rnd(ks[11], (3 * E,)),
            a2_out_w=rnd(ks[12], (E, E)), a2_out_b=rnd(ks[13], (E,)),
            a2_proj_w=rnd(ks[14], (E, E)), a2_proj_b=rnd(ks[15], (E,)),
            lnf_w=1.0 + rnd(ks[16], (E,)), lnf_b=rnd(ks[17], (E,)),
            ffn_w1=rnd(ks[18], (F, E)), ffn_b1=rnd(ks[19], (F,)),
            ffn_w2=rnd(ks[20], (E, F)), ffn_b2=rnd(ks[21], (E,)),
        ))
    kf = jax.random.split(keys[NL], 2)
    return dict(layers=layers,
                norm_w=1.0 + rnd(kf[0], (E,)),
                norm_b=rnd(kf[1], (E,)))


# ----------------------------------------------------------------------------
# Pure-JAX reference matching the PyTorch TransformerDecoder (eval mode).
# ----------------------------------------------------------------------------
def _layer_norm_ref(x, g, b, eps):
    mu = jnp.mean(x, axis=-1, keepdims=True)
    var = jnp.mean((x - mu) ** 2, axis=-1, keepdims=True)
    return (x - mu) * lax.rsqrt(var + eps) * g + b


def _mha_ref(q_in, kv_in, in_w, in_b, out_w, out_b, n_head, mask):
    B, Lq, E = q_in.shape
    Lk = kv_in.shape[1]
    Dh = E // n_head
    wq, wk, wv = in_w[:E], in_w[E:2 * E], in_w[2 * E:]
    bq, bk, bv = in_b[:E], in_b[E:2 * E], in_b[2 * E:]
    q = (q_in @ wq.T + bq).reshape(B, Lq, n_head, Dh).transpose(0, 2, 1, 3)
    k = (kv_in @ wk.T + bk).reshape(B, Lk, n_head, Dh).transpose(0, 2, 1, 3)
    v = (kv_in @ wv.T + bv).reshape(B, Lk, n_head, Dh).transpose(0, 2, 1, 3)
    s = jnp.einsum("bhqd,bhkd->bhqk", q, k) / math.sqrt(Dh)
    if mask is not None:                     # True = disallowed (PyTorch bool attn_mask)
        s = jnp.where(mask, _NEG, s)
    p = jax.nn.softmax(s, axis=-1)
    ctx = jnp.einsum("bhqk,bhkd->bhqd", p, v)
    ctx = ctx.transpose(0, 2, 1, 3).reshape(B, Lq, E)
    return ctx @ out_w.T + out_b


def reference_forward(encoder_hidden_states, input_embedding, params, cfg):
    eps = cfg["norm_eps"]
    H = cfg["n_head"]
    h = input_embedding
    Lq = h.shape[1]
    causal = jnp.triu(jnp.ones((Lq, Lq), dtype=bool), 1)  # torch.triu(..., 1).bool()
    for lp in params["layers"]:
        hn = _layer_norm_ref(h, lp["ln1_w"], lp["ln1_b"], eps)
        a = _mha_ref(hn, hn, lp["a1_in_w"], lp["a1_in_b"],
                     lp["a1_out_w"], lp["a1_out_b"], H, causal)
        h = h + (a @ lp["a1_proj_w"].T + lp["a1_proj_b"])
        hn = _layer_norm_ref(h, lp["ln2_w"], lp["ln2_b"], eps)
        a = _mha_ref(hn, encoder_hidden_states, lp["a2_in_w"], lp["a2_in_b"],
                     lp["a2_out_w"], lp["a2_out_b"], H, None)
        h = h + (a @ lp["a2_proj_w"].T + lp["a2_proj_b"])
        hn = _layer_norm_ref(h, lp["lnf_w"], lp["lnf_b"], eps)
        f = _gelu_tanh(hn @ lp["ffn_w1"].T + lp["ffn_b1"])
        h = h + (f @ lp["ffn_w2"].T + lp["ffn_b2"])
    return _layer_norm_ref(h, params["norm_w"], params["norm_b"], eps)


if __name__ == "__main__":
    cfg = CFG
    B, Lq, Lk = 2, 8, 12          # decoder length 8, encoder length 12
    E = cfg["n_embd"]

    key = jax.random.PRNGKey(0)
    k_enc, k_x, k_p = jax.random.split(key, 3)
    encoder_hidden_states = jax.random.normal(k_enc, (B, Lk, E), jnp.float32)
    input_embedding = jax.random.normal(k_x, (B, Lq, E), jnp.float32)
    params = init_params(k_p, cfg)

    # Weight packing / transposes / scale folding done ONCE, outside the call path.
    packed = pack_params(params, cfg)
    fwd = jax.jit(lambda e, x, pk: decoder_forward(e, x, pk, cfg))

    out = jax.block_until_ready(fwd(encoder_hidden_states, input_embedding, packed))

    ref = reference_forward(encoder_hidden_states, input_embedding, params, cfg)
    assert out.shape == (B, Lq, E)
    max_err = float(jnp.max(jnp.abs(out - ref)))
    assert jnp.allclose(out, ref, atol=1e-3, rtol=1e-3), (
        f"mismatch vs pure-JAX reference (max abs err {max_err:.3e})")
    print("KERNEL_OK")
</pallas_src>

<mosaic_0001>
module attributes {stable_mosaic.version = 11 : i64} {
  func.func @kernel(%arg0: memref<24x32xf32, #tpu.memory_space<vmem>>, %arg1: memref<16x32xf32, #tpu.memory_space<vmem>>, %arg2: memref<2x32x448xf32, #tpu.memory_space<vmem>>, %arg3: memref<2x128x32xf32, #tpu.memory_space<vmem>>, %arg4: memref<2x1x480xf32, #tpu.memory_space<vmem>>, %arg5: memref<2x6x32xf32, #tpu.memory_space<vmem>>, %arg6: memref<2x32xf32, #tpu.memory_space<vmem>>, %arg7: memref<16x32xf32, #tpu.memory_space<vmem>>) attributes {dimension_semantics = [], scalar_prefetch = 0 : i64, scratch_operands = 0 : i64, tpu.core_type = #tpu.core_type<tc>} {
    %c0 = arith.constant 0 : index
    %c0_0 = arith.constant 0 : index
    %0 = vector.load %arg0[%c0, %c0_0] : memref<24x32xf32, #tpu.memory_space<vmem>>, vector<24x32xf32>
    %c0_1 = arith.constant 0 : index
    %c0_2 = arith.constant 0 : index
    %1 = vector.load %arg1[%c0_1, %c0_2] : memref<16x32xf32, #tpu.memory_space<vmem>>, vector<16x32xf32>
    %2 = tpu.iota {dimensions = array<i32: 0>} : vector<64x32xi32>
    %3 = tpu.iota {dimensions = array<i32: 1>} : vector<64x32xi32>
    %false = arith.constant false
    %4 = vector.broadcast %false : i1 to vector<64x32xi1>
    %c0_i32 = arith.constant 0 : i32
    %5 = vector.broadcast %c0_i32 : i32 to vector<64x32xi32>
    %6 = arith.cmpi sge, %2, %5 : vector<64x32xi32>
    %c16_i32 = arith.constant 16 : i32
    %7 = vector.broadcast %c16_i32 : i32 to vector<64x32xi32>
    %8 = arith.cmpi slt, %2, %7 : vector<64x32xi32>
    %9 = arith.andi %6, %8 : vector<64x32xi1>
    %c0_i32_3 = arith.constant 0 : i32
    %10 = vector.broadcast %c0_i32_3 : i32 to vector<64x32xi32>
    %11 = arith.cmpi sge, %3, %10 : vector<64x32xi32>
    %12 = arith.andi %9, %11 : vector<64x32xi1>
    %c8_i32 = arith.constant 8 : i32
    %13 = vector.broadcast %c8_i32 : i32 to vector<64x32xi32>
    %14 = arith.cmpi slt, %3, %13 : vector<64x32xi32>
    %15 = arith.andi %12, %14 : vector<64x32xi1>
    %16 = arith.ori %4, %15 : vector<64x32xi1>
    %c16_i32_4 = arith.constant 16 : i32
    %17 = vector.broadcast %c16_i32_4 : i32 to vector<64x32xi32>
    %18 = arith.cmpi sge, %2, %17 : vector<64x32xi32>
    %c32_i32 = arith.constant 32 : i32
    %19 = vector.broadcast %c32_i32 : i32 to vector<64x32xi32>
    %20 = arith.cmpi slt, %2, %19 : vector<64x32xi32>
    %21 = arith.andi %18, %20 : vector<64x32xi1>
    %c8_i32_5 = arith.constant 8 : i32
    %22 = vector.broadcast %c8_i32_5 : i32 to vector<64x32xi32>
    %23 = arith.cmpi sge, %3, %22 : vector<64x32xi32>
    %24 = arith.andi %21, %23 : vector<64x32xi1>
    %c16_i32_6 = arith.constant 16 : i32
    %25 = vector.broadcast %c16_i32_6 : i32 to vector<64x32xi32>
    %26 = arith.cmpi slt, %3, %25 : vector<64x32xi32>
    %27 = arith.andi %24, %26 : vector<64x32xi1>
    %28 = arith.ori %16, %27 : vector<64x32xi1>
    %c32_i32_7 = arith.constant 32 : i32
    %29 = vector.broadcast %c32_i32_7 : i32 to vector<64x32xi32>
    %30 = arith.cmpi sge, %2, %29 : vector<64x32xi32>
    %c48_i32 = arith.constant 48 : i32
    %31 = vector.broadcast %c48_i32 : i32 to vector<64x32xi32>
    %32 = arith.cmpi slt, %2, %31 : vector<64x32xi32>
    %33 = arith.andi %30, %32 : vector<64x32xi1>
    %c16_i32_8 = arith.constant 16 : i32
    %34 = vector.broadcast %c16_i32_8 : i32 to vector<64x32xi32>
    %35 = arith.cmpi sge, %3, %34 : vector<64x32xi32>
    %36 = arith.andi %33, %35 : vector<64x32xi1>
    %c24_i32 = arith.constant 24 : i32
    %37 = vector.broadcast %c24_i32 : i32 to vector<64x32xi32>
    %38 = arith.cmpi slt, %3, %37 : vector<64x32xi32>
    %39 = arith.andi %36, %38 : vector<64x32xi1>
    %40 = arith.ori %28, %39 : vector<64x32xi1>
    %c48_i32_9 = arith.constant 48 : i32
    %41 = vector.broadcast %c48_i32_9 : i32 to vector<64x32xi32>
    %42 = arith.cmpi sge, %2, %41 : vector<64x32xi32>
    %c64_i32 = arith.constant 64 : i32
    %43 = vector.broadcast %c64_i32 : i32 to vector<64x32xi32>
    %44 = arith.cmpi slt, %2, %43 : vector<64x32xi32>
    %45 = arith.andi %42, %44 : vector<64x32xi1>
    %c24_i32_10 = arith.constant 24 : i32
    %46 = vector.broadcast %c24_i32_10 : i32 to vector<64x32xi32>
    %47 = arith.cmpi sge, %3, %46 : vector<64x32xi32>
    %48 = arith.andi %45, %47 : vector<64x32xi1>
    %c32_i32_11 = arith.constant 32 : i32
    %49 = vector.broadcast %c32_i32_11 : i32 to vector<64x32xi32>
    %50 = arith.cmpi slt, %3, %49 : vector<64x32xi32>
    %51 = arith.andi %48, %50 : vector<64x32xi1>
    %52 = arith.ori %40, %51 : vector<64x32xi1>
    %53 = arith.extui %52 : vector<64x32xi1> to vector<64x32xi32>
    %54 = arith.sitofp %53 : vector<64x32xi32> to vector<64x32xf32>
    %55 = tpu.iota {dimensions = array<i32: 0>} : vector<96x32xi32>
    %56 = tpu.iota {dimensions = array<i32: 1>} : vector<96x32xi32>
    %false_12 = arith.constant false
    %57 = vector.broadcast %false_12 : i1 to vector<96x32xi1>
    %c0_i32_13 = arith.constant 0 : i32
    %58 = vector.broadcast %c0_i32_13 : i32 to vector<96x32xi32>
    %59 = arith.cmpi sge, %55, %58 : vector<96x32xi32>
    %c24_i32_14 = arith.constant 24 : i32
    %60 = vector.broadcast %c24_i32_14 : i32 to vector<96x32xi32>
    %61 = arith.cmpi slt, %55, %60 : vector<96x32xi32>
    %62 = arith.andi %59, %61 : vector<96x32xi1>
    %c0_i32_15 = arith.constant 0 : i32
    %63 = vector.broadcast %c0_i32_15 : i32 to vector<96x32xi32>
    %64 = arith.cmpi sge, %56, %63 : vector<96x32xi32>
    %65 = arith.andi %62, %64 : vector<96x32xi1>
    %c8_i32_16 = arith.constant 8 : i32
    %66 = vector.broadcast %c8_i32_16 : i32 to vector<96x32xi32>
    %67 = arith.cmpi slt, %56, %66 : vector<96x32xi32>
    %68 = arith.andi %65, %67 : vector<96x32xi1>
    %69 = arith.ori %57, %68 : vector<96x32xi1>
    %c24_i32_17 = arith.constant 24 : i32
    %70 = vector.broadcast %c24_i32_17 : i32 to vector<96x32xi32>
    %71 = arith.cmpi sge, %55, %70 : vector<96x32xi32>
    %c48_i32_18 = arith.constant 48 : i32
    %72 = vector.broadcast %c48_i32_18 : i32 to vector<96x32xi32>
    %73 = arith.cmpi slt, %55, %72 : vector<96x32xi32>
    %74 = arith.andi %71, %73 : vector<96x32xi1>
    %c8_i32_19 = arith.constant 8 : i32
    %75 = vector.broadcast %c8_i32_19 : i32 to vector<96x32xi32>
    %76 = arith.cmpi sge, %56, %75 : vector<96x32xi32>
    %77 = arith.andi %74, %76 : vector<96x32xi1>
    %c16_i32_20 = arith.constant 16 : i32
    %78 = vector.broadcast %c16_i32_20 : i32 to vector<96x32xi32>
    %79 = arith.cmpi slt, %56, %78 : vector<96x32xi32>
    %80 = arith.andi %77, %79 : vector<96x32xi1>
    %81 = arith.ori %69, %80 : vector<96x32xi1>
    %c48_i32_21 = arith.constant 48 : i32
    %82 = vector.broadcast %c48_i32_21 : i32 to vector<96x32xi32>
    %83 = arith.cmpi sge, %55, %82 : vector<96x32xi32>
    %c72_i32 = arith.constant 72 : i32
    %84 = vector.broadcast %c72_i32 : i32 to vector<96x32xi32>
    %85 = arith.cmpi slt, %55, %84 : vector<96x32xi32>
    %86 = arith.andi %83, %85 : vector<96x32xi1>
    %c16_i32_22 = arith.constant 16 : i32
    %87 = vector.broadcast %c16_i32_22 : i32 to vector<96x32xi32>
    %88 = arith.cmpi sge, %56, %87 : vector<96x32xi32>
    %89 = arith.andi %86, %88 : vector<96x32xi1>
    %c24_i32_23 = arith.constant 24 : i32
    %90 = vector.broadcast %c24_i32_23 : i32 to vector<96x32xi32>
    %91 = arith.cmpi slt, %56, %90 : vector<96x32xi32>
    %92 = arith.andi %89, %91 : vector<96x32xi1>
    %93 = arith.ori %81, %92 : vector<96x32xi1>
    %c72_i32_24 = arith.constant 72 : i32
    %94 = vector.broadcast %c72_i32_24 : i32 to vector<96x32xi32>
    %95 = arith.cmpi sge, %55, %94 : vector<96x32xi32>
    %c96_i32 = arith.constant 96 : i32
    %96 = vector.broadcast %c96_i32 : i32 to vector<96x32xi32>
    %97 = arith.cmpi slt, %55, %96 : vector<96x32xi32>
    %98 = arith.andi %95, %97 : vector<96x32xi1>
    %c24_i32_25 = arith.constant 24 : i32
    %99 = vector.broadcast %c24_i32_25 : i32 to vector<96x32xi32>
    %100 = arith.cmpi sge, %56, %99 : vector<96x32xi32>
    %101 = arith.andi %98, %100 : vector<96x32xi1>
    %c32_i32_26 = arith.constant 32 : i32
    %102 = vector.broadcast %c32_i32_26 : i32 to vector<96x32xi32>
    %103 = arith.cmpi slt, %56, %102 : vector<96x32xi32>
    %104 = arith.andi %101, %103 : vector<96x32xi1>
    %105 = arith.ori %93, %104 : vector<96x32xi1>
    %106 = arith.extui %105 : vector<96x32xi1> to vector<96x32xi32>
    %107 = arith.sitofp %106 : vector<96x32xi32> to vector<96x32xf32>
    %108 = tpu.iota {dimensions = array<i32: 0>} : vector<16x64xi32>
    %109 = tpu.iota {dimensions = array<i32: 1>} : vector<16x64xi32>
    %false_27 = arith.constant false
    %110 = vector.broadcast %false_27 : i1 to vector<16x64xi1>
    %c0_i32_28 = arith.constant 0 : i32
    %111 = vector.broadcast %c0_i32_28 : i32 to vector<16x64xi32>
    %112 = arith.cmpi sge, %109, %111 : vector<16x64xi32>
    %c8_i32_29 = arith.constant 8 : i32
    %113 = vector.broadcast %c8_i32_29 : i32 to vector<16x64xi32>
    %114 = arith.cmpi slt, %109, %113 : vector<16x64xi32>
    %115 = arith.andi %112, %114 : vector<16x64xi1>
    %c0_i32_30 = arith.constant 0 : i32
    %116 = vector.broadcast %c0_i32_30 : i32 to vector<16x64xi32>
    %117 = arith.cmpi sge, %108, %116 : vector<16x64xi32>
    %118 = arith.andi %115, %117 : vector<16x64xi1>
    %c8_i32_31 = arith.constant 8 : i32
    %119 = vector.broadcast %c8_i32_31 : i32 to vector<16x64xi32>
    %120 = arith.cmpi slt, %108, %119 : vector<16x64xi32>
    %121 = arith.andi %118, %120 : vector<16x64xi1>
    %c0_i32_32 = arith.constant 0 : i32
    %122 = vector.broadcast %c0_i32_32 : i32 to vector<16x64xi32>
    %123 = arith.subi %109, %122 : vector<16x64xi32>
    %c0_i32_33 = arith.constant 0 : i32
    %124 = vector.broadcast %c0_i32_33 : i32 to vector<16x64xi32>
    %125 = arith.subi %108, %124 : vector<16x64xi32>
    %126 = arith.cmpi sle, %123, %125 : vector<16x64xi32>
    %127 = arith.andi %121, %126 : vector<16x64xi1>
    %128 = arith.ori %110, %127 : vector<16x64xi1>
    %c8_i32_34 = arith.constant 8 : i32
    %129 = vector.broadcast %c8_i32_34 : i32 to vector<16x64xi32>
    %130 = arith.cmpi sge, %109, %129 : vector<16x64xi32>
    %c16_i32_35 = arith.constant 16 : i32
    %131 = vector.broadcast %c16_i32_35 : i32 to vector<16x64xi32>
    %132 = arith.cmpi slt, %109, %131 : vector<16x64xi32>
    %133 = arith.andi %130, %132 : vector<16x64xi1>
    %c8_i32_36 = arith.constant 8 : i32
    %134 = vector.broadcast %c8_i32_36 : i32 to vector<16x64xi32>
    %135 = arith.cmpi sge, %108, %134 : vector<16x64xi32>
    %136 = arith.andi %133, %135 : vector<16x64xi1>
    %c16_i32_37 = arith.constant 16 : i32
    %137 = vector.broadcast %c16_i32_37 : i32 to vector<16x64xi32>
    %138 = arith.cmpi slt, %108, %137 : vector<16x64xi32>
    %139 = arith.andi %136, %138 : vector<16x64xi1>
    %c8_i32_38 = arith.constant 8 : i32
    %140 = vector.broadcast %c8_i32_38 : i32 to vector<16x64xi32>
    %141 = arith.subi %109, %140 : vector<16x64xi32>
    %c8_i32_39 = arith.constant 8 : i32
    %142 = vector.broadcast %c8_i32_39 : i32 to vector<16x64xi32>
    %143 = arith.subi %108, %142 : vector<16x64xi32>
    %144 = arith.cmpi sle, %141, %143 : vector<16x64xi32>
    %145 = arith.andi %139, %144 : vector<16x64xi1>
    %146 = arith.ori %128, %145 : vector<16x64xi1>
    %c16_i32_40 = arith.constant 16 : i32
    %147 = vector.broadcast %c16_i32_40 : i32 to vector<16x64xi32>
    %148 = arith.cmpi sge, %109, %147 : vector<16x64xi32>
    %c24_i32_41 = arith.constant 24 : i32
    %149 = vector.broadcast %c24_i32_41 : i32 to vector<16x64xi32>
    %150 = arith.cmpi slt, %109, %149 : vector<16x64xi32>
    %151 = arith.andi %148, %150 : vector<16x64xi1>
    %c0_i32_42 = arith.constant 0 : i32
    %152 = vector.broadcast %c0_i32_42 : i32 to vector<16x64xi32>
    %153 = arith.cmpi sge, %108, %152 : vector<16x64xi32>
    %154 = arith.andi %151, %153 : vector<16x64xi1>
    %c8_i32_43 = arith.constant 8 : i32
    %155 = vector.broadcast %c8_i32_43 : i32 to vector<16x64xi32>
    %156 = arith.cmpi slt, %108, %155 : vector<16x64xi32>
    %157 = arith.andi %154, %156 : vector<16x64xi1>
    %c16_i32_44 = arith.constant 16 : i32
    %158 = vector.broadcast %c16_i32_44 : i32 to vector<16x64xi32>
    %159 = arith.subi %109, %158 : vector<16x64xi32>
    %c0_i32_45 = arith.constant 0 : i32
    %160 = vector.broadcast %c0_i32_45 : i32 to vector<16x64xi32>
    %161 = arith.subi %108, %160 : vector<16x64xi32>
    %162 = arith.cmpi sle, %159, %161 : vector<16x64xi32>
    %163 = arith.andi %157, %162 : vector<16x64xi1>
    %164 = arith.ori %146, %163 : vector<16x64xi1>
    %c24_i32_46 = arith.constant 24 : i32
    %165 = vector.broadcast %c24_i32_46 : i32 to vector<16x64xi32>
    %166 = arith.cmpi sge, %109, %165 : vector<16x64xi32>
    %c32_i32_47 = arith.constant 32 : i32
    %167 = vector.broadcast %c32_i32_47 : i32 to vector<16x64xi32>
    %168 = arith.cmpi slt, %109, %167 : vector<16x64xi32>
    %169 = arith.andi %166, %168 : vector<16x64xi1>
    %c8_i32_48 = arith.constant 8 : i32
    %170 = vector.broadcast %c8_i32_48 : i32 to vector<16x64xi32>
    %171 = arith.cmpi sge, %108, %170 : vector<16x64xi32>
    %172 = arith.andi %169, %171 : vector<16x64xi1>
    %c16_i32_49 = arith.constant 16 : i32
    %173 = vector.broadcast %c16_i32_49 : i32 to vector<16x64xi32>
    %174 = arith.cmpi slt, %108, %173 : vector<16x64xi32>
    %175 = arith.andi %172, %174 : vector<16x64xi1>
    %c24_i32_50 = arith.constant 24 : i32
    %176 = vector.broadcast %c24_i32_50 : i32 to vector<16x64xi32>
    %177 = arith.subi %109, %176 : vector<16x64xi32>
    %c8_i32_51 = arith.constant 8 : i32
    %178 = vector.broadcast %c8_i32_51 : i32 to vector<16x64xi32>
    %179 = arith.subi %108, %178 : vector<16x64xi32>
    %180 = arith.cmpi sle, %177, %179 : vector<16x64xi32>
    %181 = arith.andi %175, %180 : vector<16x64xi1>
    %182 = arith.ori %164, %181 : vector<16x64xi1>
    %c32_i32_52 = arith.constant 32 : i32
    %183 = vector.broadcast %c32_i32_52 : i32 to vector<16x64xi32>
    %184 = arith.cmpi sge, %109, %183 : vector<16x64xi32>
    %c40_i32 = arith.constant 40 : i32
    %185 = vector.broadcast %c40_i32 : i32 to vector<16x64xi32>
    %186 = arith.cmpi slt, %109, %185 : vector<16x64xi32>
    %187 = arith.andi %184, %186 : vector<16x64xi1>
    %c0_i32_53 = arith.constant 0 : i32
    %188 = vector.broadcast %c0_i32_53 : i32 to vector<16x64xi32>
    %189 = arith.cmpi sge, %108, %188 : vector<16x64xi32>
    %190 = arith.andi %187, %189 : vector<16x64xi1>
    %c8_i32_54 = arith.constant 8 : i32
    %191 = vector.broadcast %c8_i32_54 : i32 to vector<16x64xi32>
    %192 = arith.cmpi slt, %108, %191 : vector<16x64xi32>
    %193 = arith.andi %190, %192 : vector<16x64xi1>
    %c32_i32_55 = arith.constant 32 : i32
    %194 = vector.broadcast %c32_i32_55 : i32 to vector<16x64xi32>
    %195 = arith.subi %109, %194 : vector<16x64xi32>
    %c0_i32_56 = arith.constant 0 : i32
    %196 = vector.broadcast %c0_i32_56 : i32 to vector<16x64xi32>
    %197 = arith.subi %108, %196 : vector<16x64xi32>
    %198 = arith.cmpi sle, %195, %197 : vector<16x64xi32>
    %199 = arith.andi %193, %198 : vector<16x64xi1>
    %200 = arith.ori %182, %199 : vector<16x64xi1>
    %c40_i32_57 = arith.constant 40 : i32
    %201 = vector.broadcast %c40_i32_57 : i32 to vector<16x64xi32>
    %202 = arith.cmpi sge, %109, %201 : vector<16x64xi32>
    %c48_i32_58 = arith.constant 48 : i32
    %203 = vector.broadcast %c48_i32_58 : i32 to vector<16x64xi32>
    %204 = arith.cmpi slt, %109, %203 : vector<16x64xi32>
    %205 = arith.andi %202, %204 : vector<16x64xi1>
    %c8_i32_59 = arith.constant 8 : i32
    %206 = vector.broadcast %c8_i32_59 : i32 to vector<16x64xi32>
    %207 = arith.cmpi sge, %108, %206 : vector<16x64xi32>
    %208 = arith.andi %205, %207 : vector<16x64xi1>
    %c16_i32_60 = arith.constant 16 : i32
    %209 = vector.broadcast %c16_i32_60 : i32 to vector<16x64xi32>
    %210 = arith.cmpi slt, %108, %209 : vector<16x64xi32>
    %211 = arith.andi %208, %210 : vector<16x64xi1>
    %c40_i32_61 = arith.constant 40 : i32
    %212 = vector.broadcast %c40_i32_61 : i32 to vector<16x64xi32>
    %213 = arith.subi %109, %212 : vector<16x64xi32>
    %c8_i32_62 = arith.constant 8 : i32
    %214 = vector.broadcast %c8_i32_62 : i32 to vector<16x64xi32>
    %215 = arith.subi %108, %214 : vector<16x64xi32>
    %216 = arith.cmpi sle, %213, %215 : vector<16x64xi32>
    %217 = arith.andi %211, %216 : vector<16x64xi1>
    %218 = arith.ori %200, %217 : vector<16x64xi1>
    %c48_i32_63 = arith.constant 48 : i32
    %219 = vector.broadcast %c48_i32_63 : i32 to vector<16x64xi32>
    %220 = arith.cmpi sge, %109, %219 : vector<16x64xi32>
    %c56_i32 = arith.constant 56 : i32
    %221 = vector.broadcast %c56_i32 : i32 to vector<16x64xi32>
    %222 = arith.cmpi slt, %109, %221 : vector<16x64xi32>
    %223 = arith.andi %220, %222 : vector<16x64xi1>
    %c0_i32_64 = arith.constant 0 : i32
    %224 = vector.broadcast %c0_i32_64 : i32 to vector<16x64xi32>
    %225 = arith.cmpi sge, %108, %224 : vector<16x64xi32>
    %226 = arith.andi %223, %225 : vector<16x64xi1>
    %c8_i32_65 = arith.constant 8 : i32
    %227 = vector.broadcast %c8_i32_65 : i32 to vector<16x64xi32>
    %228 = arith.cmpi slt, %108, %227 : vector<16x64xi32>
    %229 = arith.andi %226, %228 : vector<16x64xi1>
    %c48_i32_66 = arith.constant 48 : i32
    %230 = vector.broadcast %c48_i32_66 : i32 to vector<16x64xi32>
    %231 = arith.subi %109, %230 : vector<16x64xi32>
    %c0_i32_67 = arith.constant 0 : i32
    %232 = vector.broadcast %c0_i32_67 : i32 to vector<16x64xi32>
    %233 = arith.subi %108, %232 : vector<16x64xi32>
    %234 = arith.cmpi sle, %231, %233 : vector<16x64xi32>
    %235 = arith.andi %229, %234 : vector<16x64xi1>
    %236 = arith.ori %218, %235 : vector<16x64xi1>
    %c56_i32_68 = arith.constant 56 : i32
    %237 = vector.broadcast %c56_i32_68 : i32 to vector<16x64xi32>
    %238 = arith.cmpi sge, %109, %237 : vector<16x64xi32>
    %c64_i32_69 = arith.constant 64 : i32
    %239 = vector.broadcast %c64_i32_69 : i32 to vector<16x64xi32>
    %240 = arith.cmpi slt, %109, %239 : vector<16x64xi32>
    %241 = arith.andi %238, %240 : vector<16x64xi1>
    %c8_i32_70 = arith.constant 8 : i32
    %242 = vector.broadcast %c8_i32_70 : i32 to vector<16x64xi32>
    %243 = arith.cmpi sge, %108, %242 : vector<16x64xi32>
    %244 = arith.andi %241, %243 : vector<16x64xi1>
    %c16_i32_71 = arith.constant 16 : i32
    %245 = vector.broadcast %c16_i32_71 : i32 to vector<16x64xi32>
    %246 = arith.cmpi slt, %108, %245 : vector<16x64xi32>
    %247 = arith.andi %244, %246 : vector<16x64xi1>
    %c56_i32_72 = arith.constant 56 : i32
    %248 = vector.broadcast %c56_i32_72 : i32 to vector<16x64xi32>
    %249 = arith.subi %109, %248 : vector<16x64xi32>
    %c8_i32_73 = arith.constant 8 : i32
    %250 = vector.broadcast %c8_i32_73 : i32 to vector<16x64xi32>
    %251 = arith.subi %108, %250 : vector<16x64xi32>
    %252 = arith.cmpi sle, %249, %251 : vector<16x64xi32>
    %253 = arith.andi %247, %252 : vector<16x64xi1>
    %254 = arith.ori %236, %253 : vector<16x64xi1>
    %cst = arith.constant 0.000000e+00 : f32
    %cst_74 = arith.constant -1.000000e+30 : f32
    %255 = vector.broadcast %cst : f32 to vector<16x64xf32>
    %256 = vector.broadcast %cst_74 : f32 to vector<16x64xf32>
    %257 = arith.select %254, %255, %256 : vector<16x64xi1>, vector<16x64xf32>
    %258 = tpu.iota {dimensions = array<i32: 0>} : vector<16x96xi32>
    %259 = tpu.iota {dimensions = array<i32: 1>} : vector<16x96xi32>
    %false_75 = arith.constant false
    %260 = vector.broadcast %false_75 : i1 to vector<16x96xi1>
    %c0_i32_76 = arith.constant 0 : i32
    %261 = vector.broadcast %c0_i32_76 : i32 to vector<16x96xi32>
    %262 = arith.cmpi sge, %259, %261 : vector<16x96xi32>
    %c12_i32 = arith.constant 12 : i32
    %263 = vector.broadcast %c12_i32 : i32 to vector<16x96xi32>
    %264 = arith.cmpi slt, %259, %263 : vector<16x96xi32>
    %265 = arith.andi %262, %264 : vector<16x96xi1>
    %c0_i32_77 = arith.constant 0 : i32
    %266 = vector.broadcast %c0_i32_77 : i32 to vector<16x96xi32>
    %267 = arith.cmpi sge, %258, %266 : vector<16x96xi32>
    %268 = arith.andi %265, %267 : vector<16x96xi1>
    %c8_i32_78 = arith.constant 8 : i32
    %269 = vector.broadcast %c8_i32_78 : i32 to vector<16x96xi32>
    %270 = arith.cmpi slt, %258, %269 : vector<16x96xi32>
    %271 = arith.andi %268, %270 : vector<16x96xi1>
    %272 = arith.ori %260, %271 : vector<16x96xi1>
    %c12_i32_79 = arith.constant 12 : i32
    %273 = vector.broadcast %c12_i32_79 : i32 to vector<16x96xi32>
    %274 = arith.cmpi sge, %259, %273 : vector<16x96xi32>
    %c24_i32_80 = arith.constant 24 : i32
    %275 = vector.broadcast %c24_i32_80 : i32 to vector<16x96xi32>
    %276 = arith.cmpi slt, %259, %275 : vector<16x96xi32>
    %277 = arith.andi %274, %276 : vector<16x96xi1>
    %c8_i32_81 = arith.constant 8 : i32
    %278 = vector.broadcast %c8_i32_81 : i32 to vector<16x96xi32>
    %279 = arith.cmpi sge, %258, %278 : vector<16x96xi32>
    %280 = arith.andi %277, %279 : vector<16x96xi1>
    %c16_i32_82 = arith.constant 16 : i32
    %281 = vector.broadcast %c16_i32_82 : i32 to vector<16x96xi32>
    %282 = arith.cmpi slt, %258, %281 : vector<16x96xi32>
    %283 = arith.andi %280, %282 : vector<16x96xi1>
    %284 = arith.ori %272, %283 : vector<16x96xi1>
    %c24_i32_83 = arith.constant 24 : i32
    %285 = vector.broadcast %c24_i32_83 : i32 to vector<16x96xi32>
    %286 = arith.cmpi sge, %259, %285 : vector<16x96xi32>
    %c36_i32 = arith.constant 36 : i32
    %287 = vector.broadcast %c36_i32 : i32 to vector<16x96xi32>
    %288 = arith.cmpi slt, %259, %287 : vector<16x96xi32>
    %289 = arith.andi %286, %288 : vector<16x96xi1>
    %c0_i32_84 = arith.constant 0 : i32
    %290 = vector.broadcast %c0_i32_84 : i32 to vector<16x96xi32>
    %291 = arith.cmpi sge, %258, %290 : vector<16x96xi32>
    %292 = arith.andi %289, %291 : vector<16x96xi1>
    %c8_i32_85 = arith.constant 8 : i32
    %293 = vector.broadcast %c8_i32_85 : i32 to vector<16x96xi32>
    %294 = arith.cmpi slt, %258, %293 : vector<16x96xi32>
    %295 = arith.andi %292, %294 : vector<16x96xi1>
    %296 = arith.ori %284, %295 : vector<16x96xi1>
    %c36_i32_86 = arith.constant 36 : i32
    %297 = vector.broadcast %c36_i32_86 : i32 to vector<16x96xi32>
    %298 = arith.cmpi sge, %259, %297 : vector<16x96xi32>
    %c48_i32_87 = arith.constant 48 : i32
    %299 = vector.broadcast %c48_i32_87 : i32 to vector<16x96xi32>
    %300 = arith.cmpi slt, %259, %299 : vector<16x96xi32>
    %301 = arith.andi %298, %300 : vector<16x96xi1>
    %c8_i32_88 = arith.constant 8 : i32
    %302 = vector.broadcast %c8_i32_88 : i32 to vector<16x96xi32>
    %303 = arith.cmpi sge, %258, %302 : vector<16x96xi32>
    %304 = arith.andi %301, %303 : vector<16x96xi1>
    %c16_i32_89 = arith.constant 16 : i32
    %305 = vector.broadcast %c16_i32_89 : i32 to vector<16x96xi32>
    %306 = arith.cmpi slt, %258, %305 : vector<16x96xi32>
    %307 = arith.andi %304, %306 : vector<16x96xi1>
    %308 = arith.ori %296, %307 : vector<16x96xi1>
    %c48_i32_90 = arith.constant 48 : i32
    %309 = vector.broadcast %c48_i32_90 : i32 to vector<16x96xi32>
    %310 = arith.cmpi sge, %259, %309 : vector<16x96xi32>
    %c60_i32 = arith.constant 60 : i32
    %311 = vector.broadcast %c60_i32 : i32 to vector<16x96xi32>
    %312 = arith.cmpi slt, %259, %311 : vector<16x96xi32>
    %313 = arith.andi %310, %312 : vector<16x96xi1>
    %c0_i32_91 = arith.constant 0 : i32
    %314 = vector.broadcast %c0_i32_91 : i32 to vector<16x96xi32>
    %315 = arith.cmpi sge, %258, %314 : vector<16x96xi32>
    %316 = arith.andi %313, %315 : vector<16x96xi1>
    %c8_i32_92 = arith.constant 8 : i32
    %317 = vector.broadcast %c8_i32_92 : i32 to vector<16x96xi32>
    %318 = arith.cmpi slt, %258, %317 : vector<16x96xi32>
    %319 = arith.andi %316, %318 : vector<16x96xi1>
    %320 = arith.ori %308, %319 : vector<16x96xi1>
    %c60_i32_93 = arith.constant 60 : i32
    %321 = vector.broadcast %c60_i32_93 : i32 to vector<16x96xi32>
    %322 = arith.cmpi sge, %259, %321 : vector<16x96xi32>
    %c72_i32_94 = arith.constant 72 : i32
    %323 = vector.broadcast %c72_i32_94 : i32 to vector<16x96xi32>
    %324 = arith.cmpi slt, %259, %323 : vector<16x96xi32>
    %325 = arith.andi %322, %324 : vector<16x96xi1>
    %c8_i32_95 = arith.constant 8 : i32
    %326 = vector.broadcast %c8_i32_95 : i32 to vector<16x96xi32>
    %327 = arith.cmpi sge, %258, %326 : vector<16x96xi32>
    %328 = arith.andi %325, %327 : vector<16x96xi1>
    %c16_i32_96 = arith.constant 16 : i32
    %329 = vector.broadcast %c16_i32_96 : i32 to vector<16x96xi32>
    %330 = arith.cmpi slt, %258, %329 : vector<16x96xi32>
    %331 = arith.andi %328, %330 : vector<16x96xi1>
    %332 = arith.ori %320, %331 : vector<16x96xi1>
    %c72_i32_97 = arith.constant 72 : i32
    %333 = vector.broadcast %c72_i32_97 : i32 to vector<16x96xi32>
    %334 = arith.cmpi sge, %259, %333 : vector<16x96xi32>
    %c84_i32 = arith.constant 84 : i32
    %335 = vector.broadcast %c84_i32 : i32 to vector<16x96xi32>
    %336 = arith.cmpi slt, %259, %335 : vector<16x96xi32>
    %337 = arith.andi %334, %336 : vector<16x96xi1>
    %c0_i32_98 = arith.constant 0 : i32
    %338 = vector.broadcast %c0_i32_98 : i32 to vector<16x96xi32>
    %339 = arith.cmpi sge, %258, %338 : vector<16x96xi32>
    %340 = arith.andi %337, %339 : vector<16x96xi1>
    %c8_i32_99 = arith.constant 8 : i32
    %341 = vector.broadcast %c8_i32_99 : i32 to vector<16x96xi32>
    %342 = arith.cmpi slt, %258, %341 : vector<16x96xi32>
    %343 = arith.andi %340, %342 : vector<16x96xi1>
    %344 = arith.ori %332, %343 : vector<16x96xi1>
    %c84_i32_100 = arith.constant 84 : i32
    %345 = vector.broadcast %c84_i32_100 : i32 to vector<16x96xi32>
    %346 = arith.cmpi sge, %259, %345 : vector<16x96xi32>
    %c96_i32_101 = arith.constant 96 : i32
    %347 = vector.broadcast %c96_i32_101 : i32 to vector<16x96xi32>
    %348 = arith.cmpi slt, %259, %347 : vector<16x96xi32>
    %349 = arith.andi %346, %348 : vector<16x96xi1>
    %c8_i32_102 = arith.constant 8 : i32
    %350 = vector.broadcast %c8_i32_102 : i32 to vector<16x96xi32>
    %351 = arith.cmpi sge, %258, %350 : vector<16x96xi32>
    %352 = arith.andi %349, %351 : vector<16x96xi1>
    %c16_i32_103 = arith.constant 16 : i32
    %353 = vector.broadcast %c16_i32_103 : i32 to vector<16x96xi32>
    %354 = arith.cmpi slt, %258, %353 : vector<16x96xi32>
    %355 = arith.andi %352, %354 : vector<16x96xi1>
    %356 = arith.ori %344, %355 : vector<16x96xi1>
    %cst_104 = arith.constant 0.000000e+00 : f32
    %cst_105 = arith.constant -1.000000e+30 : f32
    %357 = vector.broadcast %cst_104 : f32 to vector<16x96xf32>
    %358 = vector.broadcast %cst_105 : f32 to vector<16x96xf32>
    %359 = arith.select %356, %357, %358 : vector<16x96xi1>, vector<16x96xf32>
    %c0_106 = arith.constant 0 : index
    %c0_107 = arith.constant 0 : index
    %c0_108 = arith.constant 0 : index
    %360 = vector.load %arg5[%c0_106, %c0_107, %c0_108] : memref<2x6x32xf32, #tpu.memory_space<vmem>>, vector<1x1x32xf32>
    %361 = vector.shape_cast %360 : vector<1x1x32xf32> to vector<1x32xf32>
    %c0_109 = arith.constant 0 : index
    %c1 = arith.constant 1 : index
    %c0_110 = arith.constant 0 : index
    %362 = vector.load %arg5[%c0_109, %c1, %c0_110] : memref<2x6x32xf32, #tpu.memory_space<vmem>>, vector<1x1x32xf32>
    %363 = vector.shape_cast %362 : vector<1x1x32xf32> to vector<1x32xf32>
    %cst_111 = arith.constant dense<0.000000e+00> : vector<16xf32>
    %364 = vector.multi_reduction <add>, %1, %cst_111 [1] : vector<16x32xf32> to vector<16xf32>
    %365 = vector.shape_cast %364 : vector<16xf32> to vector<16x1xf32>
    %cst_112 = arith.constant 3.200000e+01 : f32
    %366 = vector.broadcast %cst_112 : f32 to vector<16x1xf32>
    %367 = arith.divf %365, %366 : vector<16x1xf32>
    %368 = vector.broadcast %367 : vector<16x1xf32> to vector<16x32xf32>
    %369 = arith.subf %1, %368 : vector<16x32xf32>
    %370 = arith.mulf %369, %369 : vector<16x32xf32>
    %cst_113 = arith.constant dense<0.000000e+00> : vector<16xf32>
    %371 = vector.multi_reduction <add>, %370, %cst_113 [1] : vector<16x32xf32> to vector<16xf32>
    %372 = vector.shape_cast %371 : vector<16xf32> to vector<16x1xf32>
    %cst_114 = arith.constant 3.200000e+01 : f32
    %373 = vector.broadcast %cst_114 : f32 to vector<16x1xf32>
    %374 = arith.divf %372, %373 : vector<16x1xf32>
    %cst_115 = arith.constant 9.99999974E-6 : f32
    %375 = vector.broadcast %cst_115 : f32 to vector<16x1xf32>
    %376 = arith.addf %374, %375 : vector<16x1xf32>
    %377 = math.rsqrt %376 : vector<16x1xf32>
    %378 = vector.broadcast %377 : vector<16x1xf32> to vector<16x32xf32>
    %379 = arith.mulf %369, %378 : vector<16x32xf32>
    %380 = vector.broadcast %361 : vector<1x32xf32> to vector<16x32xf32>
    %381 = arith.mulf %379, %380 : vector<16x32xf32>
    %382 = vector.broadcast %363 : vector<1x32xf32> to vector<16x32xf32>
    %383 = arith.addf %381, %382 : vector<16x32xf32>
    %c0_116 = arith.constant 0 : index
    %c0_117 = arith.constant 0 : index
    %c0_118 = arith.constant 0 : index
    %384 = vector.load %arg2[%c0_116, %c0_117, %c0_118] : memref<2x32x448xf32, #tpu.memory_space<vmem>>, vector<1x32x96xf32>
    %385 = vector.shape_cast %384 : vector<1x32x96xf32> to vector<32x96xf32>
    %cst_119 = arith.constant dense<0.000000e+00> : vector<16x96xf32>
    %386 = tpu.matmul %383, %385, %cst_119 {dimension_numbers = #tpu.dot_dimension_numbers<[1], [0], [0], [1], [0, 0, 1, 1], [], []>} : vector<16x32xf32>, vector<32x96xf32>, vector<16x96xf32> -> vector<16x96xf32>
    %c0_120 = arith.constant 0 : index
    %c0_121 = arith.constant 0 : index
    %c0_122 = arith.constant 0 : index
    %387 = vector.load %arg4[%c0_120, %c0_121, %c0_122] : memref<2x1x480xf32, #tpu.memory_space<vmem>>, vector<1x1x96xf32>
    %388 = vector.shape_cast %387 : vector<1x1x96xf32> to vector<1x96xf32>
    %389 = vector.broadcast %388 : vector<1x96xf32> to vector<16x96xf32>
    %390 = arith.addf %386, %389 : vector<16x96xf32>
    %391 = vector.extract_strided_slice %390 {offsets = [0, 0], sizes = [16, 32], strides = [1, 1]} : vector<16x96xf32> to vector<16x32xf32>
    %392 = vector.extract_strided_slice %390 {offsets = [0, 32], sizes = [16, 32], strides = [1, 1]} : vector<16x96xf32> to vector<16x32xf32>
    %393 = vector.extract_strided_slice %390 {offsets = [0, 64], sizes = [16, 32], strides = [1, 1]} : vector<16x96xf32> to vector<16x32xf32>
    %394 = tpu.concatenate %392, %392, %392, %392 in 0 : vector<16x32xf32>, vector<16x32xf32>, vector<16x32xf32>, vector<16x32xf32> -> vector<64x32xf32>
    %395 = arith.mulf %394, %54 : vector<64x32xf32>
    %396 = tpu.concatenate %393, %393, %393, %393 in 0 : vector<16x32xf32>, vector<16x32xf32>, vector<16x32xf32>, vector<16x32xf32> -> vector<64x32xf32>
    %397 = arith.mulf %396, %54 : vector<64x32xf32>
    %cst_123 = arith.constant dense<0.000000e+00> : vector<16x64xf32>
    %398 = tpu.matmul %391, %395, %cst_123 {dimension_numbers = #tpu.dot_dimension_numbers<[1], [1], [0], [0], [0, 0, 1, 0], [], []>} : vector<16x32xf32>, vector<64x32xf32>, vector<16x64xf32> -> vector<16x64xf32>
    %399 = arith.addf %398, %257 : vector<16x64xf32>
    %cst_124 = arith.constant dense<0xFF800000> : vector<16xf32>
    %400 = vector.multi_reduction <maximumf>, %399, %cst_124 [1] : vector<16x64xf32> to vector<16xf32>
    %401 = vector.shape_cast %400 : vector<16xf32> to vector<16x1xf32>
    %402 = vector.broadcast %401 : vector<16x1xf32> to vector<16x64xf32>
    %403 = arith.subf %399, %402 : vector<16x64xf32>
    %404 = math.exp %403 : vector<16x64xf32>
    %cst_125 = arith.constant dense<0.000000e+00> : vector<16x32xf32>
    %405 = tpu.matmul %404, %397, %cst_125 {dimension_numbers = #tpu.dot_dimension_numbers<[1], [0], [0], [1], [0, 0, 1, 1], [], []>} : vector<16x64xf32>, vector<64x32xf32>, vector<16x32xf32> -> vector<16x32xf32>
    %cst_126 = arith.constant dense<0.000000e+00> : vector<16x32xf32>
    %406 = tpu.matmul %404, %54, %cst_126 {dimension_numbers = #tpu.dot_dimension_numbers<[1], [0], [0], [1], [0, 0, 1, 1], [], []>} : vector<16x64xf32>, vector<64x32xf32>, vector<16x32xf32> -> vector<16x32xf32>
    %407 = arith.divf %405, %406 : vector<16x32xf32>
    %c0_127 = arith.constant 0 : index
    %c0_128 = arith.constant 0 : index
    %c96 = arith.constant 96 : index
    %408 = vector.load %arg2[%c0_127, %c0_128, %c96] : memref<2x32x448xf32, #tpu.memory_space<vmem>>, vector<1x32x32xf32>
    %409 = vector.shape_cast %408 : vector<1x32x32xf32> to vector<32x32xf32>
    %cst_129 = arith.constant dense<0.000000e+00> : vector<16x32xf32>
    %410 = tpu.matmul %407, %409, %cst_129 {dimension_numbers = #tpu.dot_dimension_numbers<[1], [0], [0], [1], [0, 0, 1, 1], [], []>} : vector<16x32xf32>, vector<32x32xf32>, vector<16x32xf32> -> vector<16x32xf32>
    %c0_130 = arith.constant 0 : index
    %c0_131 = arith.constant 0 : index
    %c96_132 = arith.constant 96 : index
    %411 = vector.load %arg4[%c0_130, %c0_131, %c96_132] : memref<2x1x480xf32, #tpu.memory_space<vmem>>, vector<1x1x32xf32>
    %412 = vector.shape_cast %411 : vector<1x1x32xf32> to vector<1x32xf32>
    %413 = vector.broadcast %412 : vector<1x32xf32> to vector<16x32xf32>
    %414 = arith.addf %410, %413 : vector<16x32xf32>
    %c0_133 = arith.constant 0 : index
    %c0_134 = arith.constant 0 : index
    %c128 = arith.constant 128 : index
    %415 = vector.load %arg2[%c0_133, %c0_134, %c128] : memref<2x32x448xf32, #tpu.memory_space<vmem>>, vector<1x32x32xf32>
    %416 = vector.shape_cast %415 : vector<1x32x32xf32> to vector<32x32xf32>
    %cst_135 = arith.constant dense<0.000000e+00> : vector<16x32xf32>
    %417 = tpu.matmul %414, %416, %cst_135 {dimension_numbers = #tpu.dot_dimension_numbers<[1], [0], [0], [1], [0, 0, 1, 1], [], []>} : vector<16x32xf32>, vector<32x32xf32>, vector<16x32xf32> -> vector<16x32xf32>
    %c0_136 = arith.constant 0 : index
    %c0_137 = arith.constant 0 : index
    %c128_138 = arith.constant 128 : index
    %418 = vector.load %arg4[%c0_136, %c0_137, %c128_138] : memref<2x1x480xf32, #tpu.memory_space<vmem>>, vector<1x1x32xf32>
    %419 = vector.shape_cast %418 : vector<1x1x32xf32> to vector<1x32xf32>
    %420 = vector.broadcast %419 : vector<1x32xf32> to vector<16x32xf32>
    %421 = arith.addf %417, %420 : vector<16x32xf32>
    %422 = arith.addf %1, %421 : vector<16x32xf32>
    %c0_139 = arith.constant 0 : index
    %c2 = arith.constant 2 : index
    %c0_140 = arith.constant 0 : index
    %423 = vector.load %arg5[%c0_139, %c2, %c0_140] : memref<2x6x32xf32, #tpu.memory_space<vmem>>, vector<1x1x32xf32>
    %424 = vector.shape_cast %423 : vector<1x1x32xf32> to vector<1x32xf32>
    %c0_141 = arith.constant 0 : index
    %c3 = arith.constant 3 : index
    %c0_142 = arith.constant 0 : index
    %425 = vector.load %arg5[%c0_141, %c3, %c0_142] : memref<2x6x32xf32, #tpu.memory_space<vmem>>, vector<1x1x32xf32>
    %426 = vector.shape_cast %425 : vector<1x1x32xf32> to vector<1x32xf32>
    %cst_143 = arith.constant dense<0.000000e+00> : vector<16xf32>
    %427 = vector.multi_reduction <add>, %422, %cst_143 [1] : vector<16x32xf32> to vector<16xf32>
    %428 = vector.shape_cast %427 : vector<16xf32> to vector<16x1xf32>
    %cst_144 = arith.constant 3.200000e+01 : f32
    %429 = vector.broadcast %cst_144 : f32 to vector<16x1xf32>
    %430 = arith.divf %428, %429 : vector<16x1xf32>
    %431 = vector.broadcast %430 : vector<16x1xf32> to vector<16x32xf32>
    %432 = arith.subf %422, %431 : vector<16x32xf32>
    %433 = arith.mulf %432, %432 : vector<16x32xf32>
    %cst_145 = arith.constant dense<0.000000e+00> : vector<16xf32>
    %434 = vector.multi_reduction <add>, %433, %cst_145 [1] : vector<16x32xf32> to vector<16xf32>
    %435 = vector.shape_cast %434 : vector<16xf32> to vector<16x1xf32>
    %cst_146 = arith.constant 3.200000e+01 : f32
    %436 = vector.broadcast %cst_146 : f32 to vector<16x1xf32>
    %437 = arith.divf %435, %436 : vector<16x1xf32>
    %cst_147 = arith.constant 9.99999974E-6 : f32
    %438 = vector.broadcast %cst_147 : f32 to vector<16x1xf32>
    %439 = arith.addf %437, %438 : vector<16x1xf32>
    %440 = math.rsqrt %439 : vector<16x1xf32>
    %441 = vector.broadcast %440 : vector<16x1xf32> to vector<16x32xf32>
    %442 = arith.mulf %432, %441 : vector<16x32xf32>
    %443 = vector.broadcast %424 : vector<1x32xf32> to vector<16x32xf32>
    %444 = arith.mulf %442, %443 : vector<16x32xf32>
    %445 = vector.broadcast %426 : vector<1x32xf32> to vector<16x32xf32>
    %446 = arith.addf %444, %445 : vector<16x32xf32>
    %c0_148 = arith.constant 0 : index
    %c0_149 = arith.constant 0 : index
    %c160 = arith.constant 160 : index
    %447 = vector.load %arg2[%c0_148, %c0_149, %c160] : memref<2x32x448xf32, #tpu.memory_space<vmem>>, vector<1x32x32xf32>
    %448 = vector.shape_cast %447 : vector<1x32x32xf32> to vector<32x32xf32>
    %cst_150 = arith.constant dense<0.000000e+00> : vector<16x32xf32>
    %449 = tpu.matmul %446, %448, %cst_150 {dimension_numbers = #tpu.dot_dimension_numbers<[1], [0], [0], [1], [0, 0, 1, 1], [], []>} : vector<16x32xf32>, vector<32x32xf32>, vector<16x32xf32> -> vector<16x32xf32>
    %c0_151 = arith.constant 0 : index
    %c0_152 = arith.constant 0 : index
    %c160_153 = arith.constant 160 : index
    %450 = vector.load %arg4[%c0_151, %c0_152, %c160_153] : memref<2x1x480xf32, #tpu.memory_space<vmem>>, vector<1x1x32xf32>
    %451 = vector.shape_cast %450 : vector<1x1x32xf32> to vector<1x32xf32>
    %452 = vector.broadcast %451 : vector<1x32xf32> to vector<16x32xf32>
    %453 = arith.addf %449, %452 : vector<16x32xf32>
    %c0_154 = arith.constant 0 : index
    %c0_155 = arith.constant 0 : index
    %c192 = arith.constant 192 : index
    %454 = vector.load %arg2[%c0_154, %c0_155, %c192] : memref<2x32x448xf32, #tpu.memory_space<vmem>>, vector<1x32x64xf32>
    %455 = vector.shape_cast %454 : vector<1x32x64xf32> to vector<32x64xf32>
    %cst_156 = arith.constant dense<0.000000e+00> : vector<24x64xf32>
    %456 = tpu.matmul %0, %455, %cst_156 {dimension_numbers = #tpu.dot_dimension_numbers<[1], [0], [0], [1], [0, 0, 1, 1], [], []>} : vector<24x32xf32>, vector<32x64xf32>, vector<24x64xf32> -> vector<24x64xf32>
    %c0_157 = arith.constant 0 : index
    %c0_158 = arith.constant 0 : index
    %c192_159 = arith.constant 192 : index
    %457 = vector.load %arg4[%c0_157, %c0_158, %c192_159] : memref<2x1x480xf32, #tpu.memory_space<vmem>>, vector<1x1x64xf32>
    %458 = vector.shape_cast %457 : vector<1x1x64xf32> to vector<1x64xf32>
    %459 = vector.broadcast %458 : vector<1x64xf32> to vector<24x64xf32>
    %460 = arith.addf %456, %459 : vector<24x64xf32>
    %461 = vector.extract_strided_slice %460 {offsets = [0, 0], sizes = [24, 32], strides = [1, 1]} : vector<24x64xf32> to vector<24x32xf32>
    %462 = vector.extract_strided_slice %460 {offsets = [0, 32], sizes = [24, 32], strides = [1, 1]} : vector<24x64xf32> to vector<24x32xf32>
    %463 = tpu.concatenate %461, %461, %461, %461 in 0 : vector<24x32xf32>, vector<24x32xf32>, vector<24x32xf32>, vector<24x32xf32> -> vector<96x32xf32>
    %464 = arith.mulf %463, %107 : vector<96x32xf32>
    %465 = tpu.concatenate %462, %462, %462, %462 in 0 : vector<24x32xf32>, vector<24x32xf32>, vector<24x32xf32>, vector<24x32xf32> -> vector<96x32xf32>
    %466 = arith.mulf %465, %107 : vector<96x32xf32>
    %cst_160 = arith.constant dense<0.000000e+00> : vector<16x96xf32>
    %467 = tpu.matmul %453, %464, %cst_160 {dimension_numbers = #tpu.dot_dimension_numbers<[1], [1], [0], [0], [0, 0, 1, 0], [], []>} : vector<16x32xf32>, vector<96x32xf32>, vector<16x96xf32> -> vector<16x96xf32>
    %468 = arith.addf %467, %359 : vector<16x96xf32>
    %cst_161 = arith.constant dense<0xFF800000> : vector<16xf32>
    %469 = vector.multi_reduction <maximumf>, %468, %cst_161 [1] : vector<16x96xf32> to vector<16xf32>
    %470 = vector.shape_cast %469 : vector<16xf32> to vector<16x1xf32>
    %471 = vector.broadcast %470 : vector<16x1xf32> to vector<16x96xf32>
    %472 = arith.subf %468, %471 : vector<16x96xf32>
    %473 = math.exp %472 : vector<16x96xf32>
    %cst_162 = arith.constant dense<0.000000e+00> : vector<16x32xf32>
    %474 = tpu.matmul %473, %466, %cst_162 {dimension_numbers = #tpu.dot_dimension_numbers<[1], [0], [0], [1], [0, 0, 1, 1], [], []>} : vector<16x96xf32>, vector<96x32xf32>, vector<16x32xf32> -> vector<16x32xf32>
    %cst_163 = arith.constant dense<0.000000e+00> : vector<16x32xf32>
    %475 = tpu.matmul %473, %107, %cst_163 {dimension_numbers = #tpu.dot_dimension_numbers<[1], [0], [0], [1], [0, 0, 1, 1], [], []>} : vector<16x96xf32>, vector<96x32xf32>, vector<16x32xf32> -> vector<16x32xf32>
    %476 = arith.divf %474, %475 : vector<16x32xf32>
    %c0_164 = arith.constant 0 : index
    %c0_165 = arith.constant 0 : index
    %c256 = arith.constant 256 : index
    %477 = vector.load %arg2[%c0_164, %c0_165, %c256] : memref<2x32x448xf32, #tpu.memory_space<vmem>>, vector<1x32x32xf32>
    %478 = vector.shape_cast %477 : vector<1x32x32xf32> to vector<32x32xf32>
    %cst_166 = arith.constant dense<0.000000e+00> : vector<16x32xf32>
    %479 = tpu.matmul %476, %478, %cst_166 {dimension_numbers = #tpu.dot_dimension_numbers<[1], [0], [0], [1], [0, 0, 1, 1], [], []>} : vector<16x32xf32>, vector<32x32xf32>, vector<16x32xf32> -> vector<16x32xf32>
    %c0_167 = arith.constant 0 : index
    %c0_168 = arith.constant 0 : index
    %c256_169 = arith.constant 256 : index
    %480 = vector.load %arg4[%c0_167, %c0_168, %c256_169] : memref<2x1x480xf32, #tpu.memory_space<vmem>>, vector<1x1x32xf32>
    %481 = vector.shape_cast %480 : vector<1x1x32xf32> to vector<1x32xf32>
    %482 = vector.broadcast %481 : vector<1x32xf32> to vector<16x32xf32>
    %483 = arith.addf %479, %482 : vector<16x32xf32>
    %c0_170 = arith.constant 0 : index
    %c0_171 = arith.constant 0 : index
    %c288 = arith.constant 288 : index
    %484 = vector.load %arg2[%c0_170, %c0_171, %c288] : memref<2x32x448xf32, #tpu.memory_space<vmem>>, vector<1x32x32xf32>
    %485 = vector.shape_cast %484 : vector<1x32x32xf32> to vector<32x32xf32>
    %cst_172 = arith.constant dense<0.000000e+00> : vector<16x32xf32>
    %486 = tpu.matmul %483, %485, %cst_172 {dimension_numbers = #tpu.dot_dimension_numbers<[1], [0], [0], [1], [0, 0, 1, 1], [], []>} : vector<16x32xf32>, vector<32x32xf32>, vector<16x32xf32> -> vector<16x32xf32>
    %c0_173 = arith.constant 0 : index
    %c0_174 = arith.constant 0 : index
    %c288_175 = arith.constant 288 : index
    %487 = vector.load %arg4[%c0_173, %c0_174, %c288_175] : memref<2x1x480xf32, #tpu.memory_space<vmem>>, vector<1x1x32xf32>
    %488 = vector.shape_cast %487 : vector<1x1x32xf32> to vector<1x32xf32>
    %489 = vector.broadcast %488 : vector<1x32xf32> to vector<16x32xf32>
    %490 = arith.addf %486, %489 : vector<16x32xf32>
    %491 = arith.addf %422, %490 : vector<16x32xf32>
    %c0_176 = arith.constant 0 : index
    %c4 = arith.constant 4 : index
    %c0_177 = arith.constant 0 : index
    %492 = vector.load %arg5[%c0_176, %c4, %c0_177] : memref<2x6x32xf32, #tpu.memory_space<vmem>>, vector<1x1x32xf32>
    %493 = vector.shape_cast %492 : vector<1x1x32xf32> to vector<1x32xf32>
    %c0_178 = arith.constant 0 : index
    %c5 = arith.constant 5 : index
    %c0_179 = arith.constant 0 : index
    %494 = vector.load %arg5[%c0_178, %c5, %c0_179] : memref<2x6x32xf32, #tpu.memory_space<vmem>>, vector<1x1x32xf32>
    %495 = vector.shape_cast %494 : vector<1x1x32xf32> to vector<1x32xf32>
    %cst_180 = arith.constant dense<0.000000e+00> : vector<16xf32>
    %496 = vector.multi_reduction <add>, %491, %cst_180 [1] : vector<16x32xf32> to vector<16xf32>
    %497 = vector.shape_cast %496 : vector<16xf32> to vector<16x1xf32>
    %cst_181 = arith.constant 3.200000e+01 : f32
    %498 = vector.broadcast %cst_181 : f32 to vector<16x1xf32>
    %499 = arith.divf %497, %498 : vector<16x1xf32>
    %500 = vector.broadcast %499 : vector<16x1xf32> to vector<16x32xf32>
    %501 = arith.subf %491, %500 : vector<16x32xf32>
    %502 = arith.mulf %501, %501 : vector<16x32xf32>
    %cst_182 = arith.constant dense<0.000000e+00> : vector<16xf32>
    %503 = vector.multi_reduction <add>, %502, %cst_182 [1] : vector<16x32xf32> to vector<16xf32>
    %504 = vector.shape_cast %503 : vector<16xf32> to vector<16x1xf32>
    %cst_183 = arith.constant 3.200000e+01 : f32
    %505 = vector.broadcast %cst_183 : f32 to vector<16x1xf32>
    %506 = arith.divf %504, %505 : vector<16x1xf32>
    %cst_184 = arith.constant 9.99999974E-6 : f32
    %507 = vector.broadcast %cst_184 : f32 to vector<16x1xf32>
    %508 = arith.addf %506, %507 : vector<16x1xf32>
    %509 = math.rsqrt %508 : vector<16x1xf32>
    %510 = vector.broadcast %509 : vector<16x1xf32> to vector<16x32xf32>
    %511 = arith.mulf %501, %510 : vector<16x32xf32>
    %512 = vector.broadcast %493 : vector<1x32xf32> to vector<16x32xf32>
    %513 = arith.mulf %511, %512 : vector<16x32xf32>
    %514 = vector.broadcast %495 : vector<1x32xf32> to vector<16x32xf32>
    %515 = arith.addf %513, %514 : vector<16x32xf32>
    %c0_185 = arith.constant 0 : index
    %c0_186 = arith.constant 0 : index
    %c320 = arith.constant 320 : index
    %516 = vector.load %arg2[%c0_185, %c0_186, %c320] : memref<2x32x448xf32, #tpu.memory_space<vmem>>, vector<1x32x128xf32>
    %517 = vector.shape_cast %516 : vector<1x32x128xf32> to vector<32x128xf32>
    %cst_187 = arith.constant dense<0.000000e+00> : vector<16x128xf32>
    %518 = tpu.matmul %515, %517, %cst_187 {dimension_numbers = #tpu.dot_dimension_numbers<[1], [0], [0], [1], [0, 0, 1, 1], [], []>} : vector<16x32xf32>, vector<32x128xf32>, vector<16x128xf32> -> vector<16x128xf32>
    %c0_188 = arith.constant 0 : index
    %c0_189 = arith.constant 0 : index
    %c320_190 = arith.constant 320 : index
    %519 = vector.load %arg4[%c0_188, %c0_189, %c320_190] : memref<2x1x480xf32, #tpu.memory_space<vmem>>, vector<1x1x128xf32>
    %520 = vector.shape_cast %519 : vector<1x1x128xf32> to vector<1x128xf32>
    %521 = vector.broadcast %520 : vector<1x128xf32> to vector<16x128xf32>
    %522 = arith.addf %518, %521 : vector<16x128xf32>
    %cst_191 = arith.constant 5.000000e-01 : f32
    %523 = vector.broadcast %cst_191 : f32 to vector<16x128xf32>
    %524 = arith.mulf %523, %522 : vector<16x128xf32>
    %525 = arith.mulf %522, %522 : vector<16x128xf32>
    %526 = arith.mulf %525, %522 : vector<16x128xf32>
    %cst_192 = arith.constant 4.471500e-02 : f32
    %527 = vector.broadcast %cst_192 : f32 to vector<16x128xf32>
    %528 = arith.mulf %527, %526 : vector<16x128xf32>
    %529 = arith.addf %522, %528 : vector<16x128xf32>
    %cst_193 = arith.constant 0.797884583 : f32
    %530 = vector.broadcast %cst_193 : f32 to vector<16x128xf32>
    %531 = arith.mulf %530, %529 : vector<16x128xf32>
    %532 = math.tanh %531 : vector<16x128xf32>
    %cst_194 = arith.constant 1.000000e+00 : f32
    %533 = vector.broadcast %cst_194 : f32 to vector<16x128xf32>
    %534 = arith.addf %533, %532 : vector<16x128xf32>
    %535 = arith.mulf %524, %534 : vector<16x128xf32>
    %c0_195 = arith.constant 0 : index
    %c0_196 = arith.constant 0 : index
    %c0_197 = arith.constant 0 : index
    %536 = vector.load %arg3[%c0_195, %c0_196, %c0_197] : memref<2x128x32xf32, #tpu.memory_space<vmem>>, vector<1x128x32xf32>
    %537 = vector.shape_cast %536 : vector<1x128x32xf32> to vector<128x32xf32>
    %cst_198 = arith.constant dense<0.000000e+00> : vector<16x32xf32>
    %538 = tpu.matmul %535, %537, %cst_198 {dimension_numbers = #tpu.dot_dimension_numbers<[1], [0], [0], [1], [0, 0, 1, 1], [], []>} : vector<16x128xf32>, vector<128x32xf32>, vector<16x32xf32> -> vector<16x32xf32>
    %c0_199 = arith.constant 0 : index
    %c0_200 = arith.constant 0 : index
    %c448 = arith.constant 448 : index
    %539 = vector.load %arg4[%c0_199, %c0_200, %c448] : memref<2x1x480xf32, #tpu.memory_space<vmem>>, vector<1x1x32xf32>
    %540 = vector.shape_cast %539 : vector<1x1x32xf32> to vector<1x32xf32>
    %541 = vector.broadcast %540 : vector<1x32xf32> to vector<16x32xf32>
    %542 = arith.addf %538, %541 : vector<16x32xf32>
    %543 = arith.addf %491, %542 : vector<16x32xf32>
    %c1_201 = arith.constant 1 : index
    %c0_202 = arith.constant 0 : index
    %c0_203 = arith.constant 0 : index
    %544 = vector.load %arg5[%c1_201, %c0_202, %c0_203] : memref<2x6x32xf32, #tpu.memory_space<vmem>>, vector<1x1x32xf32>
    %545 = vector.shape_cast %544 : vector<1x1x32xf32> to vector<1x32xf32>
    %c1_204 = arith.constant 1 : index
    %c1_205 = arith.constant 1 : index
    %c0_206 = arith.constant 0 : index
    %546 = vector.load %arg5[%c1_204, %c1_205, %c0_206] : memref<2x6x32xf32, #tpu.memory_space<vmem>>, vector<1x1x32xf32>
    %547 = vector.shape_cast %546 : vector<1x1x32xf32> to vector<1x32xf32>
    %cst_207 = arith.constant dense<0.000000e+00> : vector<16xf32>
    %548 = vector.multi_reduction <add>, %543, %cst_207 [1] : vector<16x32xf32> to vector<16xf32>
    %549 = vector.shape_cast %548 : vector<16xf32> to vector<16x1xf32>
    %cst_208 = arith.constant 3.200000e+01 : f32
    %550 = vector.broadcast %cst_208 : f32 to vector<16x1xf32>
    %551 = arith.divf %549, %550 : vector<16x1xf32>
    %552 = vector.broadcast %551 : vector<16x1xf32> to vector<16x32xf32>
    %553 = arith.subf %543, %552 : vector<16x32xf32>
    %554 = arith.mulf %553, %553 : vector<16x32xf32>
    %cst_209 = arith.constant dense<0.000000e+00> : vector<16xf32>
    %555 = vector.multi_reduction <add>, %554, %cst_209 [1] : vector<16x32xf32> to vector<16xf32>
    %556 = vector.shape_cast %555 : vector<16xf32> to vector<16x1xf32>
    %cst_210 = arith.constant 3.200000e+01 : f32
    %557 = vector.broadcast %cst_210 : f32 to vector<16x1xf32>
    %558 = arith.divf %556, %557 : vector<16x1xf32>
    %cst_211 = arith.constant 9.99999974E-6 : f32
    %559 = vector.broadcast %cst_211 : f32 to vector<16x1xf32>
    %560 = arith.addf %558, %559 : vector<16x1xf32>
    %561 = math.rsqrt %560 : vector<16x1xf32>
    %562 = vector.broadcast %561 : vector<16x1xf32> to vector<16x32xf32>
    %563 = arith.mulf %553, %562 : vector<16x32xf32>
    %564 = vector.broadcast %545 : vector<1x32xf32> to vector<16x32xf32>
    %565 = arith.mulf %563, %564 : vector<16x32xf32>
    %566 = vector.broadcast %547 : vector<1x32xf32> to vector<16x32xf32>
    %567 = arith.addf %565, %566 : vector<16x32xf32>
    %c1_212 = arith.constant 1 : index
    %c0_213 = arith.constant 0 : index
    %c0_214 = arith.constant 0 : index
    %568 = vector.load %arg2[%c1_212, %c0_213, %c0_214] : memref<2x32x448xf32, #tpu.memory_space<vmem>>, vector<1x32x96xf32>
    %569 = vector.shape_cast %568 : vector<1x32x96xf32> to vector<32x96xf32>
    %cst_215 = arith.constant dense<0.000000e+00> : vector<16x96xf32>
    %570 = tpu.matmul %567, %569, %cst_215 {dimension_numbers = #tpu.dot_dimension_numbers<[1], [0], [0], [1], [0, 0, 1, 1], [], []>} : vector<16x32xf32>, vector<32x96xf32>, vector<16x96xf32> -> vector<16x96xf32>
    %c1_216 = arith.constant 1 : index
    %c0_217 = arith.constant 0 : index
    %c0_218 = arith.constant 0 : index
    %571 = vector.load %arg4[%c1_216, %c0_217, %c0_218] : memref<2x1x480xf32, #tpu.memory_space<vmem>>, vector<1x1x96xf32>
    %572 = vector.shape_cast %571 : vector<1x1x96xf32> to vector<1x96xf32>
    %573 = vector.broadcast %572 : vector<1x96xf32> to vector<16x96xf32>
    %574 = arith.addf %570, %573 : vector<16x96xf32>
    %575 = vector.extract_strided_slice %574 {offsets = [0, 0], sizes = [16, 32], strides = [1, 1]} : vector<16x96xf32> to vector<16x32xf32>
    %576 = vector.extract_strided_slice %574 {offsets = [0, 32], sizes = [16, 32], strides = [1, 1]} : vector<16x96xf32> to vector<16x32xf32>
    %577 = vector.extract_strided_slice %574 {offsets = [0, 64], sizes = [16, 32], strides = [1, 1]} : vector<16x96xf32> to vector<16x32xf32>
    %578 = tpu.concatenate %576, %576, %576, %576 in 0 : vector<16x32xf32>, vector<16x32xf32>, vector<16x32xf32>, vector<16x32xf32> -> vector<64x32xf32>
    %579 = arith.mulf %578, %54 : vector<64x32xf32>
    %580 = tpu.concatenate %577, %577, %577, %577 in 0 : vector<16x32xf32>, vector<16x32xf32>, vector<16x32xf32>, vector<16x32xf32> -> vector<64x32xf32>
    %581 = arith.mulf %580, %54 : vector<64x32xf32>
    %cst_219 = arith.constant dense<0.000000e+00> : vector<16x64xf32>
    %582 = tpu.matmul %575, %579, %cst_219 {dimension_numbers = #tpu.dot_dimension_numbers<[1], [1], [0], [0], [0, 0, 1, 0], [], []>} : vector<16x32xf32>, vector<64x32xf32>, vector<16x64xf32> -> vector<16x64xf32>
    %583 = arith.addf %582, %257 : vector<16x64xf32>
    %cst_220 = arith.constant dense<0xFF800000> : vector<16xf32>
    %584 = vector.multi_reduction <maximumf>, %583, %cst_220 [1] : vector<16x64xf32> to vector<16xf32>
    %585 = vector.shape_cast %584 : vector<16xf32> to vector<16x1xf32>
    %586 = vector.broadcast %585 : vector<16x1xf32> to vector<16x64xf32>
    %587 = arith.subf %583, %586 : vector<16x64xf32>
    %588 = math.exp %587 : vector<16x64xf32>
    %cst_221 = arith.constant dense<0.000000e+00> : vector<16x32xf32>
    %589 = tpu.matmul %588, %581, %cst_221 {dimension_numbers = #tpu.dot_dimension_numbers<[1], [0], [0], [1], [0, 0, 1, 1], [], []>} : vector<16x64xf32>, vector<64x32xf32>, vector<16x32xf32> -> vector<16x32xf32>
    %cst_222 = arith.constant dense<0.000000e+00> : vector<16x32xf32>
    %590 = tpu.matmul %588, %54, %cst_222 {dimension_numbers = #tpu.dot_dimension_numbers<[1], [0], [0], [1], [0, 0, 1, 1], [], []>} : vector<16x64xf32>, vector<64x32xf32>, vector<16x32xf32> -> vector<16x32xf32>
    %591 = arith.divf %589, %590 : vector<16x32xf32>
    %c1_223 = arith.constant 1 : index
    %c0_224 = arith.constant 0 : index
    %c96_225 = arith.constant 96 : index
    %592 = vector.load %arg2[%c1_223, %c0_224, %c96_225] : memref<2x32x448xf32, #tpu.memory_space<vmem>>, vector<1x32x32xf32>
    %593 = vector.shape_cast %592 : vector<1x32x32xf32> to vector<32x32xf32>
    %cst_226 = arith.constant dense<0.000000e+00> : vector<16x32xf32>
    %594 = tpu.matmul %591, %593, %cst_226 {dimension_numbers = #tpu.dot_dimension_numbers<[1], [0], [0], [1], [0, 0, 1, 1], [], []>} : vector<16x32xf32>, vector<32x32xf32>, vector<16x32xf32> -> vector<16x32xf32>
    %c1_227 = arith.constant 1 : index
    %c0_228 = arith.constant 0 : index
    %c96_229 = arith.constant 96 : index
    %595 = vector.load %arg4[%c1_227, %c0_228, %c96_229] : memref<2x1x480xf32, #tpu.memory_space<vmem>>, vector<1x1x32xf32>
    %596 = vector.shape_cast %595 : vector<1x1x32xf32> to vector<1x32xf32>
    %597 = vector.broadcast %596 : vector<1x32xf32> to vector<16x32xf32>
    %598 = arith.addf %594, %597 : vector<16x32xf32>
    %c1_230 = arith.constant 1 : index
    %c0_231 = arith.constant 0 : index
    %c128_232 = arith.constant 128 : index
    %599 = vector.load %arg2[%c1_230, %c0_231, %c128_232] : memref<2x32x448xf32, #tpu.memory_space<vmem>>, vector<1x32x32xf32>
    %600 = vector.shape_cast %599 : vector<1x32x32xf32> to vector<32x32xf32>
    %cst_233 = arith.constant dense<0.000000e+00> : vector<16x32xf32>
    %601 = tpu.matmul %598, %600, %cst_233 {dimension_numbers = #tpu.dot_dimension_numbers<[1], [0], [0], [1], [0, 0, 1, 1], [], []>} : vector<16x32xf32>, vector<32x32xf32>, vector<16x32xf32> -> vector<16x32xf32>
    %c1_234 = arith.constant 1 : index
    %c0_235 = arith.constant 0 : index
    %c128_236 = arith.constant 128 : index
    %602 = vector.load %arg4[%c1_234, %c0_235, %c128_236] : memref<2x1x480xf32, #tpu.memory_space<vmem>>, vector<1x1x32xf32>
    %603 = vector.shape_cast %602 : vector<1x1x32xf32> to vector<1x32xf32>
    %604 = vector.broadcast %603 : vector<1x32xf32> to vector<16x32xf32>
    %605 = arith.addf %601, %604 : vector<16x32xf32>
    %606 = arith.addf %543, %605 : vector<16x32xf32>
    %c1_237 = arith.constant 1 : index
    %c2_238 = arith.constant 2 : index
    %c0_239 = arith.constant 0 : index
    %607 = vector.load %arg5[%c1_237, %c2_238, %c0_239] : memref<2x6x32xf32, #tpu.memory_space<vmem>>, vector<1x1x32xf32>
    %608 = vector.shape_cast %607 : vector<1x1x32xf32> to vector<1x32xf32>
    %c1_240 = arith.constant 1 : index
    %c3_241 = arith.constant 3 : index
    %c0_242 = arith.constant 0 : index
    %609 = vector.load %arg5[%c1_240, %c3_241, %c0_242] : memref<2x6x32xf32, #tpu.memory_space<vmem>>, vector<1x1x32xf32>
    %610 = vector.shape_cast %609 : vector<1x1x32xf32> to vector<1x32xf32>
    %cst_243 = arith.constant dense<0.000000e+00> : vector<16xf32>
    %611 = vector.multi_reduction <add>, %606, %cst_243 [1] : vector<16x32xf32> to vector<16xf32>
    %612 = vector.shape_cast %611 : vector<16xf32> to vector<16x1xf32>
    %cst_244 = arith.constant 3.200000e+01 : f32
    %613 = vector.broadcast %cst_244 : f32 to vector<16x1xf32>
    %614 = arith.divf %612, %613 : vector<16x1xf32>
    %615 = vector.broadcast %614 : vector<16x1xf32> to vector<16x32xf32>
    %616 = arith.subf %606, %615 : vector<16x32xf32>
    %617 = arith.mulf %616, %616 : vector<16x32xf32>
    %cst_245 = arith.constant dense<0.000000e+00> : vector<16xf32>
    %618 = vector.multi_reduction <add>, %617, %cst_245 [1] : vector<16x32xf32> to vector<16xf32>
    %619 = vector.shape_cast %618 : vector<16xf32> to vector<16x1xf32>
    %cst_246 = arith.constant 3.200000e+01 : f32
    %620 = vector.broadcast %cst_246 : f32 to vector<16x1xf32>
    %621 = arith.divf %619, %620 : vector<16x1xf32>
    %cst_247 = arith.constant 9.99999974E-6 : f32
    %622 = vector.broadcast %cst_247 : f32 to vector<16x1xf32>
    %623 = arith.addf %621, %622 : vector<16x1xf32>
    %624 = math.rsqrt %623 : vector<16x1xf32>
    %625 = vector.broadcast %624 : vector<16x1xf32> to vector<16x32xf32>
    %626 = arith.mulf %616, %625 : vector<16x32xf32>
    %627 = vector.broadcast %608 : vector<1x32xf32> to vector<16x32xf32>
    %628 = arith.mulf %626, %627 : vector<16x32xf32>
    %629 = vector.broadcast %610 : vector<1x32xf32> to vector<16x32xf32>
    %630 = arith.addf %628, %629 : vector<16x32xf32>
    %c1_248 = arith.constant 1 : index
    %c0_249 = arith.constant 0 : index
    %c160_250 = arith.constant 160 : index
    %631 = vector.load %arg2[%c1_248, %c0_249, %c160_250] : memref<2x32x448xf32, #tpu.memory_space<vmem>>, vector<1x32x32xf32>
    %632 = vector.shape_cast %631 : vector<1x32x32xf32> to vector<32x32xf32>
    %cst_251 = arith.constant dense<0.000000e+00> : vector<16x32xf32>
    %633 = tpu.matmul %630, %632, %cst_251 {dimension_numbers = #tpu.dot_dimension_numbers<[1], [0], [0], [1], [0, 0, 1, 1], [], []>} : vector<16x32xf32>, vector<32x32xf32>, vector<16x32xf32> -> vector<16x32xf32>
    %c1_252 = arith.constant 1 : index
    %c0_253 = arith.constant 0 : index
    %c160_254 = arith.constant 160 : index
    %634 = vector.load %arg4[%c1_252, %c0_253, %c160_254] : memref<2x1x480xf32, #tpu.memory_space<vmem>>, vector<1x1x32xf32>
    %635 = vector.shape_cast %634 : vector<1x1x32xf32> to vector<1x32xf32>
    %636 = vector.broadcast %635 : vector<1x32xf32> to vector<16x32xf32>
    %637 = arith.addf %633, %636 : vector<16x32xf32>
    %c1_255 = arith.constant 1 : index
    %c0_256 = arith.constant 0 : index
    %c192_257 = arith.constant 192 : index
    %638 = vector.load %arg2[%c1_255, %c0_256, %c192_257] : memref<2x32x448xf32, #tpu.memory_space<vmem>>, vector<1x32x64xf32>
    %639 = vector.shape_cast %638 : vector<1x32x64xf32> to vector<32x64xf32>
    %cst_258 = arith.constant dense<0.000000e+00> : vector<24x64xf32>
    %640 = tpu.matmul %0, %639, %cst_258 {dimension_numbers = #tpu.dot_dimension_numbers<[1], [0], [0], [1], [0, 0, 1, 1], [], []>} : vector<24x32xf32>, vector<32x64xf32>, vector<24x64xf32> -> vector<24x64xf32>
    %c1_259 = arith.constant 1 : index
    %c0_260 = arith.constant 0 : index
    %c192_261 = arith.constant 192 : index
    %641 = vector.load %arg4[%c1_259, %c0_260, %c192_261] : memref<2x1x480xf32, #tpu.memory_space<vmem>>, vector<1x1x64xf32>
    %642 = vector.shape_cast %641 : vector<1x1x64xf32> to vector<1x64xf32>
    %643 = vector.broadcast %642 : vector<1x64xf32> to vector<24x64xf32>
    %644 = arith.addf %640, %643 : vector<24x64xf32>
    %645 = vector.extract_strided_slice %644 {offsets = [0, 0], sizes = [24, 32], strides = [1, 1]} : vector<24x64xf32> to vector<24x32xf32>
    %646 = vector.extract_strided_slice %644 {offsets = [0, 32], sizes = [24, 32], strides = [1, 1]} : vector<24x64xf32> to vector<24x32xf32>
    %647 = tpu.concatenate %645, %645, %645, %645 in 0 : vector<24x32xf32>, vector<24x32xf32>, vector<24x32xf32>, vector<24x32xf32> -> vector<96x32xf32>
    %648 = arith.mulf %647, %107 : vector<96x32xf32>
    %649 = tpu.concatenate %646, %646, %646, %646 in 0 : vector<24x32xf32>, vector<24x32xf32>, vector<24x32xf32>, vector<24x32xf32> -> vector<96x32xf32>
    %650 = arith.mulf %649, %107 : vector<96x32xf32>
    %cst_262 = arith.constant dense<0.000000e+00> : vector<16x96xf32>
    %651 = tpu.matmul %637, %648, %cst_262 {dimension_numbers = #tpu.dot_dimension_numbers<[1], [1], [0], [0], [0, 0, 1, 0], [], []>} : vector<16x32xf32>, vector<96x32xf32>, vector<16x96xf32> -> vector<16x96xf32>
    %652 = arith.addf %651, %359 : vector<16x96xf32>
    %cst_263 = arith.constant dense<0xFF800000> : vector<16xf32>
    %653 = vector.multi_reduction <maximumf>, %652, %cst_263 [1] : vector<16x96xf32> to vector<16xf32>
    %654 = vector.shape_cast %653 : vector<16xf32> to vector<16x1xf32>
    %655 = vector.broadcast %654 : vector<16x1xf32> to vector<16x96xf32>
    %656 = arith.subf %652, %655 : vector<16x96xf32>
    %657 = math.exp %656 : vector<16x96xf32>
    %cst_264 = arith.constant dense<0.000000e+00> : vector<16x32xf32>
    %658 = tpu.matmul %657, %650, %cst_264 {dimension_numbers = #tpu.dot_dimension_numbers<[1], [0], [0], [1], [0, 0, 1, 1], [], []>} : vector<16x96xf32>, vector<96x32xf32>, vector<16x32xf32> -> vector<16x32xf32>
    %cst_265 = arith.constant dense<0.000000e+00> : vector<16x32xf32>
    %659 = tpu.matmul %657, %107, %cst_265 {dimension_numbers = #tpu.dot_dimension_numbers<[1], [0], [0], [1], [0, 0, 1, 1], [], []>} : vector<16x96xf32>, vector<96x32xf32>, vector<16x32xf32> -> vector<16x32xf32>
    %660 = arith.divf %658, %659 : vector<16x32xf32>
    %c1_266 = arith.constant 1 : index
    %c0_267 = arith.constant 0 : index
    %c256_268 = arith.constant 256 : index
    %661 = vector.load %arg2[%c1_266, %c0_267, %c256_268] : memref<2x32x448xf32, #tpu.memory_space<vmem>>, vector<1x32x32xf32>
    %662 = vector.shape_cast %661 : vector<1x32x32xf32> to vector<32x32xf32>
    %cst_269 = arith.constant dense<0.000000e+00> : vector<16x32xf32>
    %663 = tpu.matmul %660, %662, %cst_269 {dimension_numbers = #tpu.dot_dimension_numbers<[1], [0], [0], [1], [0, 0, 1, 1], [], []>} : vector<16x32xf32>, vector<32x32xf32>, vector<16x32xf32> -> vector<16x32xf32>
    %c1_270 = arith.constant 1 : index
    %c0_271 = arith.constant 0 : index
    %c256_272 = arith.constant 256 : index
    %664 = vector.load %arg4[%c1_270, %c0_271, %c256_272] : memref<2x1x480xf32, #tpu.memory_space<vmem>>, vector<1x1x32xf32>
    %665 = vector.shape_cast %664 : vector<1x1x32xf32> to vector<1x32xf32>
    %666 = vector.broadcast %665 : vector<1x32xf32> to vector<16x32xf32>
    %667 = arith.addf %663, %666 : vector<16x32xf32>
    %c1_273 = arith.constant 1 : index
    %c0_274 = arith.constant 0 : index
    %c288_275 = arith.constant 288 : index
    %668 = vector.load %arg2[%c1_273, %c0_274, %c288_275] : memref<2x32x448xf32, #tpu.memory_space<vmem>>, vector<1x32x32xf32>
    %669 = vector.shape_cast %668 : vector<1x32x32xf32> to vector<32x32xf32>
    %cst_276 = arith.constant dense<0.000000e+00> : vector<16x32xf32>
    %670 = tpu.matmul %667, %669, %cst_276 {dimension_numbers = #tpu.dot_dimension_numbers<[1], [0], [0], [1], [0, 0, 1, 1], [], []>} : vector<16x32xf32>, vector<32x32xf32>, vector<16x32xf32> -> vector<16x32xf32>
    %c1_277 = arith.constant 1 : index
    %c0_278 = arith.constant 0 : index
    %c288_279 = arith.constant 288 : index
    %671 = vector.load %arg4[%c1_277, %c0_278, %c288_279] : memref<2x1x480xf32, #tpu.memory_space<vmem>>, vector<1x1x32xf32>
    %672 = vector.shape_cast %671 : vector<1x1x32xf32> to vector<1x32xf32>
    %673 = vector.broadcast %672 : vector<1x32xf32> to vector<16x32xf32>
    %674 = arith.addf %670, %673 : vector<16x32xf32>
    %675 = arith.addf %606, %674 : vector<16x32xf32>
    %c1_280 = arith.constant 1 : index
    %c4_281 = arith.constant 4 : index
    %c0_282 = arith.constant 0 : index
    %676 = vector.load %arg5[%c1_280, %c4_281, %c0_282] : memref<2x6x32xf32, #tpu.memory_space<vmem>>, vector<1x1x32xf32>
    %677 = vector.shape_cast %676 : vector<1x1x32xf32> to vector<1x32xf32>
    %c1_283 = arith.constant 1 : index
    %c5_284 = arith.constant 5 : index
    %c0_285 = arith.constant 0 : index
    %678 = vector.load %arg5[%c1_283, %c5_284, %c0_285] : memref<2x6x32xf32, #tpu.memory_space<vmem>>, vector<1x1x32xf32>
    %679 = vector.shape_cast %678 : vector<1x1x32xf32> to vector<1x32xf32>
    %cst_286 = arith.constant dense<0.000000e+00> : vector<16xf32>
    %680 = vector.multi_reduction <add>, %675, %cst_286 [1] : vector<16x32xf32> to vector<16xf32>
    %681 = vector.shape_cast %680 : vector<16xf32> to vector<16x1xf32>
    %cst_287 = arith.constant 3.200000e+01 : f32
    %682 = vector.broadcast %cst_287 : f32 to vector<16x1xf32>
    %683 = arith.divf %681, %682 : vector<16x1xf32>
    %684 = vector.broadcast %683 : vector<16x1xf32> to vector<16x32xf32>
    %685 = arith.subf %675, %684 : vector<16x32xf32>
    %686 = arith.mulf %685, %685 : vector<16x32xf32>
    %cst_288 = arith.constant dense<0.000000e+00> : vector<16xf32>
    %687 = vector.multi_reduction <add>, %686, %cst_288 [1] : vector<16x32xf32> to vector<16xf32>
    %688 = vector.shape_cast %687 : vector<16xf32> to vector<16x1xf32>
    %cst_289 = arith.constant 3.200000e+01 : f32
    %689 = vector.broadcast %cst_289 : f32 to vector<16x1xf32>
    %690 = arith.divf %688, %689 : vector<16x1xf32>
    %cst_290 = arith.constant 9.99999974E-6 : f32
    %691 = vector.broadcast %cst_290 : f32 to vector<16x1xf32>
    %692 = arith.addf %690, %691 : vector<16x1xf32>
    %693 = math.rsqrt %692 : vector<16x1xf32>
    %694 = vector.broadcast %693 : vector<16x1xf32> to vector<16x32xf32>
    %695 = arith.mulf %685, %694 : vector<16x32xf32>
    %696 = vector.broadcast %677 : vector<1x32xf32> to vector<16x32xf32>
    %697 = arith.mulf %695, %696 : vector<16x32xf32>
    %698 = vector.broadcast %679 : vector<1x32xf32> to vector<16x32xf32>
    %699 = arith.addf %697, %698 : vector<16x32xf32>
    %c1_291 = arith.constant 1 : index
    %c0_292 = arith.constant 0 : index
    %c320_293 = arith.constant 320 : index
    %700 = vector.load %arg2[%c1_291, %c0_292, %c320_293] : memref<2x32x448xf32, #tpu.memory_space<vmem>>, vector<1x32x128xf32>
    %701 = vector.shape_cast %700 : vector<1x32x128xf32> to vector<32x128xf32>
    %cst_294 = arith.constant dense<0.000000e+00> : vector<16x128xf32>
    %702 = tpu.matmul %699, %701, %cst_294 {dimension_numbers = #tpu.dot_dimension_numbers<[1], [0], [0], [1], [0, 0, 1, 1], [], []>} : vector<16x32xf32>, vector<32x128xf32>, vector<16x128xf32> -> vector<16x128xf32>
    %c1_295 = arith.constant 1 : index
    %c0_296 = arith.constant 0 : index
    %c320_297 = arith.constant 320 : index
    %703 = vector.load %arg4[%c1_295, %c0_296, %c320_297] : memref<2x1x480xf32, #tpu.memory_space<vmem>>, vector<1x1x128xf32>
    %704 = vector.shape_cast %703 : vector<1x1x128xf32> to vector<1x128xf32>
    %705 = vector.broadcast %704 : vector<1x128xf32> to vector<16x128xf32>
    %706 = arith.addf %702, %705 : vector<16x128xf32>
    %cst_298 = arith.constant 5.000000e-01 : f32
    %707 = vector.broadcast %cst_298 : f32 to vector<16x128xf32>
    %708 = arith.mulf %707, %706 : vector<16x128xf32>
    %709 = arith.mulf %706, %706 : vector<16x128xf32>
    %710 = arith.mulf %709, %706 : vector<16x128xf32>
    %cst_299 = arith.constant 4.471500e-02 : f32
    %711 = vector.broadcast %cst_299 : f32 to vector<16x128xf32>
    %712 = arith.mulf %711, %710 : vector<16x128xf32>
    %713 = arith.addf %706, %712 : vector<16x128xf32>
    %cst_300 = arith.constant 0.797884583 : f32
    %714 = vector.broadcast %cst_300 : f32 to vector<16x128xf32>
    %715 = arith.mulf %714, %713 : vector<16x128xf32>
    %716 = math.tanh %715 : vector<16x128xf32>
    %cst_301 = arith.constant 1.000000e+00 : f32
    %717 = vector.broadcast %cst_301 : f32 to vector<16x128xf32>
    %718 = arith.addf %717, %716 : vector<16x128xf32>
    %719 = arith.mulf %708, %718 : vector<16x128xf32>
    %c1_302 = arith.constant 1 : index
    %c0_303 = arith.constant 0 : index
    %c0_304 = arith.constant 0 : index
    %720 = vector.load %arg3[%c1_302, %c0_303, %c0_304] : memref<2x128x32xf32, #tpu.memory_space<vmem>>, vector<1x128x32xf32>
    %721 = vector.shape_cast %720 : vector<1x128x32xf32> to vector<128x32xf32>
    %cst_305 = arith.constant dense<0.000000e+00> : vector<16x32xf32>
    %722 = tpu.matmul %719, %721, %cst_305 {dimension_numbers = #tpu.dot_dimension_numbers<[1], [0], [0], [1], [0, 0, 1, 1], [], []>} : vector<16x128xf32>, vector<128x32xf32>, vector<16x32xf32> -> vector<16x32xf32>
    %c1_306 = arith.constant 1 : index
    %c0_307 = arith.constant 0 : index
    %c448_308 = arith.constant 448 : index
    %723 = vector.load %arg4[%c1_306, %c0_307, %c448_308] : memref<2x1x480xf32, #tpu.memory_space<vmem>>, vector<1x1x32xf32>
    %724 = vector.shape_cast %723 : vector<1x1x32xf32> to vector<1x32xf32>
    %725 = vector.broadcast %724 : vector<1x32xf32> to vector<16x32xf32>
    %726 = arith.addf %722, %725 : vector<16x32xf32>
    %727 = arith.addf %675, %726 : vector<16x32xf32>
    %c0_309 = arith.constant 0 : index
    %c0_310 = arith.constant 0 : index
    %728 = vector.load %arg6[%c0_309, %c0_310] : memref<2x32xf32, #tpu.memory_space<vmem>>, vector<1x32xf32>
    %c1_311 = arith.constant 1 : index
    %c0_312 = arith.constant 0 : index
    %729 = vector.load %arg6[%c1_311, %c0_312] : memref<2x32xf32, #tpu.memory_space<vmem>>, vector<1x32xf32>
    %cst_313 = arith.constant dense<0.000000e+00> : vector<16xf32>
    %730 = vector.multi_reduction <add>, %727, %cst_313 [1] : vector<16x32xf32> to vector<16xf32>
    %731 = vector.shape_cast %730 : vector<16xf32> to vector<16x1xf32>
    %cst_314 = arith.constant 3.200000e+01 : f32
    %732 = vector.broadcast %cst_314 : f32 to vector<16x1xf32>
    %733 = arith.divf %731, %732 : vector<16x1xf32>
    %734 = vector.broadcast %733 : vector<16x1xf32> to vector<16x32xf32>
    %735 = arith.subf %727, %734 : vector<16x32xf32>
    %736 = arith.mulf %735, %735 : vector<16x32xf32>
    %cst_315 = arith.constant dense<0.000000e+00> : vector<16xf32>
    %737 = vector.multi_reduction <add>, %736, %cst_315 [1] : vector<16x32xf32> to vector<16xf32>
    %738 = vector.shape_cast %737 : vector<16xf32> to vector<16x1xf32>
    %cst_316 = arith.constant 3.200000e+01 : f32
    %739 = vector.broadcast %cst_316 : f32 to vector<16x1xf32>
    %740 = arith.divf %738, %739 : vector<16x1xf32>
    %cst_317 = arith.constant 9.99999974E-6 : f32
    %741 = vector.broadcast %cst_317 : f32 to vector<16x1xf32>
    %742 = arith.addf %740, %741 : vector<16x1xf32>
    %743 = math.rsqrt %742 : vector<16x1xf32>
    %744 = vector.broadcast %743 : vector<16x1xf32> to vector<16x32xf32>
    %745 = arith.mulf %735, %744 : vector<16x32xf32>
    %746 = vector.broadcast %728 : vector<1x32xf32> to vector<16x32xf32>
    %747 = arith.mulf %745, %746 : vector<16x32xf32>
    %748 = vector.broadcast %729 : vector<1x32xf32> to vector<16x32xf32>
    %749 = arith.addf %747, %748 : vector<16x32xf32>
    %c0_318 = arith.constant 0 : index
    %c0_319 = arith.constant 0 : index
    %750 = vector.load %arg7[%c0_318, %c0_319] : memref<16x32xf32, #tpu.memory_space<vmem>>, vector<16x32xf32>
    tpu.vector_store %arg7[%c0_318, %c0_319], %749 {strides = array<i32>} : memref<16x32xf32, #tpu.memory_space<vmem>>, vector<16x32xf32>,
    return
  }
}

</mosaic_0001>

<bundles_post_ra>
// kernel: _lambda_.1
= control target key start
LH: loop header
LB: loop body
LE: loop exit
PB: predicated region body
PF: predicated region fallthrough
CT: control target
= control target key end

     0   :  { %vm7052_vm0 = vcmask 261120   ;;  %s7042_s0 = inlined_call_operand.vmem [shape: f32[24,32], index: 0, kind: input, shape index: {}]   ;;  %s7043_s1 = inlined_call_operand.vmem [shape: f32[16,32], index: 1, kind: input, shape index: {}]   ;;  %s7044_s2 = inlined_call_operand.vmem [shape: f32[2,32,448], index: 2, kind: input, shape index: {}]   ;;  %s7045_s3 = inlined_call_operand.vmem [shape: f32[2,128,32], index: 3, kind: input, shape index: {}]   ;;  %s7046_s4 = inlined_call_operand.vmem [shape: f32[2,1,480], index: 4, kind: input, shape index: {}]   ;;  %s7047_s5 = inlined_call_operand.vmem [shape: f32[2,6,32], index: 5, kind: input, shape index: {}]   ;;  %s7048_s6 = inlined_call_operand.vmem [shape: f32[2,32], index: 6, kind: input, shape index: {}]   ;;  %s7049_s7 = inlined_call_operand.hbm [shape: f32[16,32], index: 7, kind: output, shape index: {}]  }
   0x1   :  { %v5596_v0 = vld [vmem:[%s7043_s1] sm:$0xff]  ;;  %v5601_v1 = vld [vmem:[%s7043_s1 + $0x8] sm:$0xff] }
   0x2   :  { %12 = vsyncpa [#allocation3], 0  ;;  %v709_v2 = vsel %vm7052_vm0, %v5596_v0, 0.0  ;;  %v712_v3 = vsel %vm7052_vm0, %v5601_v1, 0.0  ;;  %v5614_v14 = vld [vmem:[%s7044_s2 + $0x60] sm:$0xff]  ;;  %v32_v18 = vlaneseq  ;;  %v7076_v20 = vmov 0 }
   0x3   :  { %710 = vadd.xlane.f32.xlu0 %v709_v2  ;;  %v5619_v15 = vld [vmem:[%s7044_s2 + $0x40] sm:$0xff]  ;;  %4906 = vmatprep.subr.mxu0 %v5614_v14  ;;  %v7070_v21 = vmov 0.0   ;;  %v7078_v23 = vmov 0  ;;  %s5544_s12 = smov 32   ;;  %v7080_v24 = vmov 0  ;;  %s5545_s19 = smov 96  }
   0x4   :  { %4907 = vmatpush3.msra.mxu0 %v5614_v14  ;;  %v5626_v16 = vld [vmem:[%s7044_s2 + $0x20] sm:$0xff]  ;;  %v5640_v19 = vand.u32 127, %v32_v18  ;;  %s5546_s20 = smov 64   ;;  %s5550_s8 = smov [#allocation2]  }
   0x5   :  { %4908 = vmatprep.subr.mxu0 %v5619_v15  ;;  %v5635_v17 = vld [vmem:[%s7044_s2] sm:$0xff]  ;;  %s4382_s9 = sshll.u32 %s5550_s8, 4  ;;  %s4383_s9 = int_to_ptr.vmem [resolvable:$true] %s4382_s9 }
   0x6   :  { %4909 = vmatpush3.msra.mxu0 %v5619_v15  ;;  %vm7050_vm1 = vcmp.ge.s32.totalorder %v5640_v19, 24  ;;  %vm218_vm2 = vcmp.lt.s32.totalorder %v5640_v19, 32  ;;  %vm159_vm3 = vcmp.ge.s32.totalorder %v5640_v19, 16  ;;  %vm7051_vm4 = vcmp.lt.s32.totalorder %v5640_v19, 24  ;;  %v4421_v35 = vld [vmem:[%s7047_s5] ss:$0 sm:$0xff]  ;;  %p5526_p1 = scmp.lt.s32.totalorder %s4383_s9, %s4383_s9 }
   0x7   :  { %713 = vadd.xlane.f32.xlu0 %v712_v3  ;;  %4910 = vmatprep.subr.mxu0 %v5626_v16  ;;  %vm5648_vm5 = vmand %vm7050_vm1, %vm218_vm2  ;;  %vm109_vm6 = vcmp.ge.s32.totalorder %v5640_v19, 8  ;;  %vm118_vm7 = vcmp.lt.s32.totalorder %v5640_v19, 16  ;;  %vm7058_vm10 = vcmp.lt.s32.totalorder %v5640_v19, 8  ;;  %v4422_v37 = vld [vmem:[%s7047_s5 + $0x1] ss:$0 sm:$0xff]  ;;  %vm595_vm13 = vcmp.ge.s32.totalorder %v5640_v19, 40 }
   0x8   :  { %4911 = vmatpush3.msra.mxu0 %v5626_v16  ;;  %v7077_v20 = vsel %vm5648_vm5, 4294967295, %v7076_v20  ;;  %v5657_v22 = vsel %vm5648_vm5, 1.0, %v7070_v21  ;;  %vm5661_vm8 = vmand %vm159_vm3, %vm7051_vm4  ;;  %v5691_v27 = vsel %vm7058_vm10, 1.0, %v7070_v21  ;;  %v5716_v46 = vld [vmem:[%s7046_s4] ss:$0 sm:$0xff]  ;;  %vm7053_vm14 = vcmp.lt.s32.totalorder %v5640_v19, 48 }
   0x9   :  { %4912 = vmatprep.subr.mxu0 %v5635_v17  ;;  %v7079_v23 = vsel %vm5661_vm8, 4294967295, %v7078_v23  ;;  %vm5669_vm9 = vmand %vm109_vm6, %vm118_vm7  ;;  %v5676_v25 = vsel %vm5661_vm8, 1.0, %v7070_v21  ;;  %s5521_s10 = scalar_lea.vmem %s4383_s9, 256 }
   0xa   :  { %4913 = vmatpush3.msra.mxu0 %v5635_v17  ;;  %v7081_v24 = vsel %vm5669_vm9, 4294967295, %v7080_v24  ;;  %v5681_v26 = vsel %vm5669_vm9, 1.0, %v7070_v21  ;;  %vm597_vm3 = vmand %vm595_vm13, %vm7053_vm14  ;;  %vm582_vm13 = vcmp.lt.s32.totalorder %v5640_v19, 40  ;;  %vm623_vm14 = vcmp.ge.s32.totalorder %v5640_v19, 56  ;;  %p5522_p0 = scmp.ne.s32.totalorder %s4383_s9, %s5521_s10  ;;  %p5527_p2 = scmp.lt.s32.totalorder %s5521_s10, %s5521_s10 }
   0xc   :  { %p5528_p3 = por %p5527_p2, %p5526_p1 }
   0xe   :  { %p5529_p4 = pnand %p5528_p3, %p5522_p0 }
  0x1d   :  { %862 = vrot.lane.b32.xlu0 %v5657_v22, %s5544_s12 }
  0x21   :  { %854 = vrot.lane.b32.xlu0 %v5681_v26, %s5544_s12 }
  0x25   :  { %850 = vrot.lane.b32.xlu0 %v5691_v27, %s5544_s12 }
  0x8c   :  { %v711_v4 = vpop.xlane.xlu0 %710 }
  0x8d   :  { %v716_v5 = vmul.f32 0.03125, %v711_v4 }
  0x8f   :  { %v718_v6 = vsub.f32 %v5596_v0, %v716_v5 }
  0x90   :  { %v714_v7 = vpop.xlane.xlu0 %713 }
  0x91   :  { %v717_v8 = vmul.f32 0.03125, %v714_v7  ;;  %v720_v9 = vmul.f32 %v718_v6, %v718_v6 }
  0x93   :  { %v719_v10 = vsub.f32 %v5601_v1, %v717_v8  ;;  %v722_v11 = vsel %vm7052_vm0, %v720_v9, 0.0 }
  0x94   :  { %723 = vadd.xlane.f32.xlu1 %v722_v11  ;;  %v5718_v47 = vpop.permute.xlu0 %862  ;;  %v5797_v11 = vshrl.u32 %v32_v18, 7  ;;  %v4415_v18 = vadd.s32 4294967280, %v5640_v19 }
  0x95   :  { %v721_v12 = vmul.f32 %v719_v10, %v719_v10 }
  0x96   :  { %7082 = vst [vmem:[#allocation5_spill] sm:$0xff] %v5797_v11  ;;  %vm538_vm4 = vcmp.le.s32.totalorder %v5640_v19, %v5797_v11 }
  0x97   :  { %v725_v13 = vsel %vm7052_vm0, %v721_v12, 0.0  ;;  %v4413_v12 = vadd.s32 4294967288, %v5640_v19 }
  0x98   :  { %726 = vadd.xlane.f32.xlu1 %v725_v13  ;;  %v5735_v55 = vpop.permute.xlu0 %854  ;;  %v4416_v13 = vadd.s32 4294967272, %v5640_v19 }
  0x99   :  { %vm552_vm11 = vcmp.le.s32.totalorder %v4413_v12, %v5797_v11 }
  0x9a   :  { %vm576_vm12 = vcmp.le.s32.totalorder %v4416_v13, %v5797_v11  ;;  %vm554_vm15 = vmand %vm5669_vm9, %vm552_vm11  ;;  %vm7064_vm9 = vcmp.ge.s32.totalorder %v5640_v19, 48 }
  0x9b   :  { %vm578_vm2 = vmand %vm5648_vm5, %vm576_vm12  ;;  %vm581_vm12 = vcmp.ge.s32.totalorder %v5640_v19, 32  ;;  %vm610_vm5 = vcmp.lt.s32.totalorder %v5640_v19, 56 }
  0x9c   :  { %v5748_v60 = vpop.permute.xlu0 %850  ;;  %vm580_vm7 = vmor %vm554_vm15, %vm578_vm2  ;;  %vm624_vm15 = vcmp.lt.s32.totalorder %v5640_v19, 64 }
  0x9d   :  { %vm5829_vm2 = vmand %vm7058_vm10, %vm538_vm4 }
  0xa9   :  { %860 = vrot.lane.b32.xlu1 %v5657_v22, %s5544_s12 }
  0xad   :  { %858 = vrot.lane.b32.xlu1 %v5676_v25, %s5544_s12 }
  0xb1   :  { %856 = vrot.lane.b32.xlu1 %v5676_v25, %s5544_s12 }
  0xb5   :  { %852 = vrot.lane.b32.xlu1 %v5681_v26, %s5544_s12 }
  0xb9   :  { %848 = vrot.lane.b32.xlu1 %v5691_v27, %s5544_s12 }
 0x11d   :  { %v724_v28 = vpop.xlane.xlu1 %723 }
 0x11e   :  { %v728_v29 = vmul.f32 0.03125, %v724_v28  ;;  %v4418_v28 = vadd.s32 4294967256, %v5640_v19 }
 0x120   :  { %v730_v30 = vadd.f32 1e-05, %v728_v29  ;;  %vm604_vm6 = vcmp.le.s32.totalorder %v4418_v28, %v5797_v11  ;;  %v4417_v29 = vadd.s32 4294967264, %v5640_v19 }
 0x121   :  { %v727_v31 = vpop.xlane.xlu1 %726  ;;  %vm606_vm1 = vmand %vm597_vm3, %vm604_vm6 }
 0x122   :  { %5450 = vrsqrt.f32 %v730_v30  ;;  %v729_v32 = vmul.f32 0.03125, %v727_v31  ;;  %vm5818_vm11 = vmor %vm580_vm7, %vm606_vm1  ;;  %v7083_v30 = vmov 0  ;;  %v4420_v31 = vadd.s32 4294967240, %v5640_v19 }
 0x123   :  { %v7084_v30 = vsel %vm5818_vm11, 4294967295, %v7083_v30  ;;  %vm583_vm3 = vmand %vm581_vm12, %vm582_vm13  ;;  %vm589_vm6 = vcmp.le.s32.totalorder %v4417_v29, %v5797_v11 }
 0x124   :  { %v731_v33 = vadd.f32 1e-05, %v729_v32  ;;  %vm625_vm7 = vmand %vm623_vm14, %vm624_vm15  ;;  %vm632_vm11 = vcmp.le.s32.totalorder %v4420_v31, %v5797_v11  ;;  %vm7087_vm15 = vnez %v7084_v30 }
 0x125   :  { %v5709_v44 = vpop.permute.xlu1 %860  ;;  %vm591_vm10 = vmand %vm583_vm3, %vm589_vm6  ;;  %vm7063_vm3 = vcmask 523264  }
 0x126   :  { %5452 = vrsqrt.f32 %v731_v33  ;;  %v4419_v33 = vadd.s32 4294967248, %v5640_v19  ;;  %vm634_vm13 = vmand %vm625_vm7, %vm632_vm11  ;;  %vm7091_vm11 = vcmp.lt.s32.totalorder %v5640_v19, 8 }
 0x127   :  { %vm7092_vm6 = vmmov %vm7091_vm11 }
 0x128   :  { %vm617_vm12 = vcmp.le.s32.totalorder %v4419_v33, %v5797_v11  ;;  %vm7093_vm7 = vmmov %vm7092_vm6 }
 0x129   :  { %v5711_v45 = vpop.permute.xlu1 %858 }
 0x12d   :  { %v5723_v50 = vpop.permute.xlu1 %856 }
 0x12f   :  { %v5451_v34 = vpop.eup %5450 }
 0x130   :  { %v734_v36 = vmul.f32 %v5451_v34, %v718_v6  ;;  %v5547_v34 = vmov -1e+30  }
 0x131   :  { %v5740_v57 = vpop.permute.xlu1 %852 }
 0x132   :  { %v740_v38 = vmul.f32 %v4421_v35, %v734_v36 }
 0x133   :  { %v5453_v39 = vpop.eup %5452 }
 0x134   :  { %v735_v40 = vmul.f32 %v5453_v39, %v719_v10  ;;  %v746_v41 = vadd.f32 %v4422_v37, %v740_v38 }
 0x135   :  { %v5753_v62 = vpop.permute.xlu1 %848 }
 0x136   :  { %v741_v42 = vmul.f32 %v4421_v35, %v735_v40  ;;  %4914 = vmatprep.mubr.msk.f32.mxu0 %vm7052_vm0, %v746_v41 }
 0x138   :  { %v747_v43 = vadd.f32 %v4422_v37, %v741_v42 }
 0x13a   :  { %4915 = vmatmul.mubr.msk.f32.vlgmr.msra.gmra.mxu0 %vm7052_vm0, %v747_v43 }
 0x1fa   :  { %v4916_v48 = vpop.f32.mrf.mxu0 }
 0x1fb   :  { %v5721_v49 = vadd.f32 %v4916_v48, %v5716_v46 }
 0x1fc   :  { %v831_v51 = vpop.f32.mrf.mxu0 }
 0x1fd   :  { %v5726_v52 = vadd.f32 %v5716_v46, %v831_v51  ;;  %v879_v53 = vmul.f32 %v5718_v47, %v5721_v49  ;;  %v877_v56 = vmul.f32 %v5711_v45, %v5721_v49  ;;  %v875_v59 = vmul.f32 %v5735_v55, %v5721_v49 }
 0x1fe   :  { %v873_v63 = vmul.f32 %v5748_v60, %v5721_v49 }
 0x1ff   :  { %4933 = vmatprep.mubr.msk.f32.mxu1 %vm7052_vm0, %v5726_v52  ;;  %934 = vrot.lane.b32.xlu0 %v879_v53, %s5545_s19  ;;  %v878_v54 = vmul.f32 %v5709_v44, %v5726_v52  ;;  %v876_v58 = vmul.f32 %v5723_v50, %v5726_v52  ;;  %v874_v61 = vmul.f32 %v5740_v57, %v5726_v52 }
 0x200   :  { %v872_v2 = vmul.f32 %v5753_v62, %v5726_v52 }
 0x201   :  { %932 = vrot.lane.b32.xlu1 %v878_v54, %s5545_s19  ;;  %v7072_v54 = vmov 1.0  }
 0x203   :  { %930 = vrot.lane.b32.xlu0 %v877_v56, %s5545_s19 }
 0x205   :  { %928 = vrot.lane.b32.xlu1 %v876_v58, %s5545_s19 }
 0x207   :  { %926 = vrot.lane.b32.xlu0 %v875_v59, %s5545_s19 }
 0x209   :  { %924 = vrot.lane.b32.xlu1 %v874_v61, %s5545_s19 }
 0x20b   :  { %922 = vrot.lane.b32.xlu0 %v873_v63, %s5545_s19 }
 0x20d   :  { %920 = vrot.lane.b32.xlu1 %v872_v2, %s5545_s19 }
 0x20f   :  { %894 = vrot.lane.b32.xlu0 %v5657_v22, %s5546_s20 }
 0x211   :  { %892 = vrot.lane.b32.xlu1 %v5657_v22, %s5546_s20 }
 0x213   :  { %890 = vrot.lane.b32.xlu0 %v5676_v25, %s5546_s20 }
 0x215   :  { %888 = vrot.lane.b32.xlu1 %v5676_v25, %s5546_s20 }
 0x217   :  { %886 = vrot.lane.b32.xlu0 %v5681_v26, %s5546_s20 }
 0x219   :  { %884 = vrot.lane.b32.xlu1 %v5681_v26, %s5546_s20 }
 0x21b   :  { %882 = vrot.lane.b32.xlu0 %v5691_v27, %s5546_s20 }
 0x21d   :  { %880 = vrot.lane.b32.xlu1 %v5691_v27, %s5546_s20 }
 0x271   :  { %v935_v3 = vpop.permute.xlu0 %934 }
 0x272   :  { %4917 = vmatprep.subr.msk.mxu1 %vm7052_vm0, %v935_v3 }
 0x273   :  { %v933_v4 = vpop.permute.xlu1 %932  ;;  %4918 = vmatpush3.xpose.msk.msra.mxu1 %vm7052_vm0, %v935_v3 }
 0x274   :  { %4919 = vmatprep.subr.msk.mxu1 %vm7052_vm0, %v933_v4 }
 0x275   :  { %v931_v5 = vpop.permute.xlu0 %930 }
 0x277   :  { %4920 = vmatpush3.xpose.msk.msra.mxu1 %vm7052_vm0, %v933_v4  ;;  %v929_v6 = vpop.permute.xlu1 %928 }
 0x278   :  { %4921 = vmatprep.subr.msk.mxu1 %vm7052_vm0, %v931_v5 }
 0x279   :  { %v927_v7 = vpop.permute.xlu0 %926 }
 0x27b   :  { %4922 = vmatpush3.xpose.msk.msra.mxu1 %vm7052_vm0, %v931_v5  ;;  %v925_v8 = vpop.permute.xlu1 %924 }
 0x27c   :  { %4923 = vmatprep.subr.msk.mxu1 %vm7052_vm0, %v929_v6 }
 0x27d   :  { %v923_v9 = vpop.permute.xlu0 %922 }
 0x27f   :  { %4924 = vmatpush3.xpose.msk.msra.mxu1 %vm7052_vm0, %v929_v6  ;;  %v921_v10 = vpop.permute.xlu1 %920 }
 0x280   :  { %4925 = vmatprep.subr.msk.mxu1 %vm7052_vm0, %v927_v7 }
 0x281   :  { %v5861_v51 = vpop.permute.xlu0 %894 }
 0x282   :  { %v911_v61 = vmul.f32 %v5861_v51, %v5721_v49 }
 0x283   :  { %4926 = vmatpush3.xpose.msk.msra.mxu1 %vm7052_vm0, %v927_v7  ;;  %v5857_v43 = vpop.permute.xlu1 %892 }
 0x284   :  { %4927 = vmatprep.subr.msk.mxu1 %vm7052_vm0, %v925_v8  ;;  %v910_v53 = vmul.f32 %v5857_v43, %v5726_v52 }
 0x285   :  { %v5877_v58 = vpop.permute.xlu0 %890 }
 0x286   :  { %v909_v4 = vmul.f32 %v5877_v58, %v5721_v49 }
 0x287   :  { %4928 = vmatpush3.xpose.msk.msra.mxu1 %vm7052_vm0, %v925_v8  ;;  %v5859_v48 = vpop.permute.xlu1 %888 }
 0x288   :  { %4929 = vmatprep.subr.msk.mxu1 %vm7052_vm0, %v923_v9  ;;  %v908_v59 = vmul.f32 %v5859_v48, %v5726_v52 }
 0x289   :  { %v5907_v3 = vpop.permute.xlu0 %886 }
 0x28a   :  { %v907_v6 = vmul.f32 %v5907_v3, %v5721_v49 }
 0x28b   :  { %4930 = vmatpush3.xpose.msk.msra.mxu1 %vm7052_vm0, %v923_v9  ;;  %v5872_v56 = vpop.permute.xlu1 %884 }
 0x28c   :  { %4931 = vmatprep.subr.msk.mxu1 %vm7052_vm0, %v921_v10  ;;  %v906_v63 = vmul.f32 %v5872_v56, %v5726_v52 }
 0x28f   :  { %4932 = vmatpush3.xpose.msk.msra.mxu1 %vm7052_vm0, %v921_v10  ;;  %v5901_v2 = vpop.permute.xlu1 %880 }
 0x290   :  { %v904_v5 = vmul.f32 %v5901_v2, %v5726_v52  ;;  %v5936_v52 = vpop.permute.xlu0 %882 }
 0x291   :  { %v905_v7 = vmul.f32 %v5936_v52, %v5721_v49 }
 0x292   :  { %4934 = vmatmul.mubr.msk.f32.vlgmr.msra.gmra.mxu1 %vm7052_vm0, %v5721_v49  ;;  %vm563_vm0 = vcmp.le.s32.totalorder %v4415_v18, %v5797_v11 }
 0x293   :  { %vm565_vm1 = vmand %vm5661_vm8, %vm563_vm0 }
 0x294   :  { %vm567_vm4 = vmor %vm5829_vm2, %vm565_vm1 }
 0x295   :  { %vm611_vm0 = vmand %vm7064_vm9, %vm610_vm5  ;;  %vm7088_vm5 = vnez %v7077_v20 }
 0x296   :  { %vm593_vm8 = vmor %vm567_vm4, %vm591_vm10  ;;  %4955 = vmatprep.subr.msk.mxu0 %vm7088_vm5, %v7072_v54  ;;  %vm7090_vm10 = vnez %v7081_v24 }
 0x297   :  { %vm619_vm14 = vmand %vm611_vm0, %vm617_vm12  ;;  %4956 = vmatpush3.msk.msra.mxu0 %vm7088_vm5, %v7072_v54  ;;  %vm7095_vm0 = vcmask 261120  }
 0x298   :  { %vm636_vm1 = vmor %vm7087_vm15, %vm634_vm13  ;;  %4957 = vmatprep.subr.msk.mxu0 %vm7088_vm5, %v7072_v54 }
 0x299   :  { %vm621_vm2 = vmor %vm593_vm8, %vm619_vm14  ;;  %v5848_v35 = vsel %vm636_vm1, 0.0, %v5547_v34  ;;  %4958 = vmatpush3.msk.msra.mxu0 %vm7088_vm5, %v7072_v54  ;;  %vm7089_vm8 = vnez %v7079_v23 }
 0x29a   :  { %v5851_v37 = vsel %vm621_vm2, 0.0, %v5547_v34  ;;  %4959 = vmatprep.subr.msk.mxu0 %vm7089_vm8, %v7072_v54  ;;  %vm7094_vm4 = vmmov %vm7092_vm6  ;;  %vm7061_vm2 = vmmov 0  }
 0x29b   :  { %4960 = vmatpush3.msk.msra.mxu0 %vm7089_vm8, %v7072_v54  ;;  %vm7096_vm12 = vmmov %vm7095_vm0 }
 0x29c   :  { %4961 = vmatprep.subr.msk.mxu0 %vm7089_vm8, %v7072_v54  ;;  %vm7097_vm13 = vmmov %vm7095_vm0 }
 0x29d   :  { %4962 = vmatpush3.msk.msra.mxu0 %vm7089_vm8, %v7072_v54  ;;  %vm7098_vm14 = vmmov %vm7095_vm0  ;;  %vm696_vm8 = vcmp.lt.s32.totalorder %v5640_v19, 96 }
 0x29e   :  { %4963 = vmatprep.subr.msk.mxu0 %vm7090_vm10, %v7072_v54  ;;  %vm7099_vm15 = vmmov %vm7095_vm0 }
 0x29f   :  { %4964 = vmatpush3.msk.msra.mxu0 %vm7090_vm10, %v7072_v54  ;;  %vm7100_vm1 = vmmov %vm7095_vm0 }
 0x2a0   :  { %4965 = vmatprep.subr.msk.mxu0 %vm7090_vm10, %v7072_v54 }
 0x2a1   :  { %4966 = vmatpush3.msk.msra.mxu0 %vm7090_vm10, %v7072_v54  ;;  %vm695_vm10 = vcmp.ge.s32.totalorder %v5640_v19, 84 }
 0x2a2   :  { %4967 = vmatprep.subr.msk.mxu0 %vm7091_vm11, %v7072_v54  ;;  %vm7101_vm11 = vmmov %vm7095_vm0 }
 0x2a3   :  { %4968 = vmatpush3.msk.msra.mxu0 %vm7092_vm6, %v7072_v54  ;;  %vm7102_vm6 = vmmov %vm7095_vm0 }
 0x2a4   :  { %4969 = vmatprep.subr.msk.mxu0 %vm7093_vm7, %v7072_v54  ;;  %vm7103_vm7 = vmmov %vm7095_vm0 }
 0x2a5   :  { %4970 = vmatpush3.msk.msra.mxu0 %vm7094_vm4, %v7072_v54  ;;  %vm7104_vm4 = vmmov %vm7095_vm0 }
 0x352   :  { %v4935_v36 = vpop.f32.mrf.mxu1 }
 0x353   :  { %v1030_v38 = vadd.f32 %v4935_v36, %v5848_v35 }
 0x354   :  { %v1024_v39 = vpop.f32.mrf.mxu1 }
 0x355   :  { %v1025_v40 = vadd.f32 %v1024_v39, %v5851_v37  ;;  %v1037_v41 = vsel %vm7063_vm3, %v1030_v38, -inf  ;;  %v5962_v39 = vld [vmem:[%s7044_s2 + $0x68] sm:$0xff] }
 0x356   :  { %1038 = vmax.xlane.f32.xlu1 %v1037_v41  ;;  %4985 = vmatprep.subr.mxu0 %v5962_v39 }
 0x357   :  { %v1034_v42 = vsel %vm7063_vm3, %v1025_v40, -inf }
 0x358   :  { %1035 = vmax.xlane.f32.xlu0 %v1034_v42 }
 0x367   :  { %1066 = vrot.lane.b32.xlu1 %v910_v53, %s5546_s20 }
 0x36b   :  { %1062 = vrot.lane.b32.xlu1 %v908_v59, %s5546_s20 }
 0x36e   :  { %1068 = vrot.lane.b32.xlu0 %v911_v61, %s5546_s20 }
 0x36f   :  { %1058 = vrot.lane.b32.xlu1 %v906_v63, %s5546_s20 }
 0x372   :  { %1064 = vrot.lane.b32.xlu0 %v909_v4, %s5546_s20 }
 0x373   :  { %1054 = vrot.lane.b32.xlu1 %v904_v5, %s5546_s20  ;;  %v1340_v5 = vld [vmem:[%s7044_s2 + $0x48] sm:$0xff] }
 0x376   :  { %1060 = vrot.lane.b32.xlu0 %v907_v6, %s5546_s20  ;;  %v5974_v6 = vld [vmem:[%s7044_s2 + $0x28] sm:$0xff] }
 0x377   :  { %1246 = vrot.lane.b32.xlu1 %v5619_v15, %s5544_s12 }
 0x37a   :  { %1056 = vrot.lane.b32.xlu0 %v905_v7, %s5546_s20  ;;  %v1338_v7 = vld [vmem:[%s7044_s2 + $0x8] sm:$0xff] }
 0x37b   :  { %1242 = vrot.lane.b32.xlu1 %v5635_v17, %s5544_s12 }
 0x37e   :  { %1248 = vrot.lane.b32.xlu0 %v5614_v14, %s5544_s12 }
 0x382   :  { %1244 = vrot.lane.b32.xlu0 %v5626_v16, %s5544_s12 }
 0x386   :  { %1254 = vrot.lane.b32.xlu0 %v5716_v46, %s5544_s12 }
 0x3df   :  { %v1039_v8 = vpop.xlane.xlu1 %1038 }
 0x3e0   :  { %v1041_v9 = vsub.f32 %v1030_v38, %v1039_v8 }
 0x3e1   :  { %v1036_v15 = vpop.xlane.xlu0 %1035 }
 0x3e2   :  { %v1040_v10 = vsub.f32 %v1025_v40, %v1036_v15  ;;  %v1044_v49 = vmul.f32 1.442695, %v1041_v9 }
 0x3e3   :  { %v1067_v12 = vpop.permute.xlu1 %1066 }
 0x3e4   :  { %v1042_v13 = vmul.f32 1.442695, %v1040_v10 }
 0x3e5   :  { %v1069_v28 = vpop.permute.xlu0 %1068 }
 0x3e6   :  { %5454 = vpow2.f32 %v1042_v13  ;;  %4936 = vmatprep.subr.mxu1 %v1069_v28 }
 0x3e7   :  { %v1063_v17 = vpop.permute.xlu1 %1062  ;;  %4937 = vmatpush3.msra.mxu1 %v1069_v28  ;;  %5456 = vpow2.f32 %v1044_v49  ;;  %v4450_v49 = vld [vmem:[%s7046_s4 + $0x1] ss:$0 sm:$0xff] }
 0x3e8   :  { %4938 = vmatprep.subr.mxu1 %v1067_v12 }
 0x3e9   :  { %4939 = vmatpush3.msra.mxu1 %v1067_v12  ;;  %v1065_v14 = vpop.permute.xlu0 %1064 }
 0x3ea   :  { %4940 = vmatprep.subr.mxu1 %v1065_v14 }
 0x3eb   :  { %4941 = vmatpush3.msra.mxu1 %v1065_v14  ;;  %v1059_v16 = vpop.permute.xlu1 %1058 }
 0x3ec   :  { %4942 = vmatprep.subr.mxu1 %v1063_v17 }
 0x3ed   :  { %4943 = vmatpush3.msra.mxu1 %v1063_v17  ;;  %v1061_v46 = vpop.permute.xlu0 %1060 }
 0x3ee   :  { %4944 = vmatprep.subr.mxu1 %v1061_v46 }
 0x3ef   :  { %4945 = vmatpush3.msra.mxu1 %v1061_v46  ;;  %v1055_v30 = vpop.permute.xlu1 %1054 }
 0x3f0   :  { %4946 = vmatprep.subr.mxu1 %v1059_v16 }
 0x3f1   :  { %4947 = vmatpush3.msra.mxu1 %v1059_v16  ;;  %v1057_v18 = vpop.permute.xlu0 %1056 }
 0x3f2   :  { %4948 = vmatprep.subr.mxu1 %v1057_v18 }
 0x3f3   :  { %v5455_v29 = vpop.eup %5454  ;;  %4949 = vmatpush3.msra.mxu1 %v1057_v18  ;;  %v1247_v33 = vpop.permute.xlu1 %1246 }
 0x3f4   :  { %4950 = vmatprep.subr.mxu1 %v1055_v30  ;;  %4952 = vmatprep.mubr.msk.f32.mxu1 %vm7063_vm3, %v5455_v29  ;;  %v5457_v31 = vpop.eup %5456 }
 0x3f5   :  { %4971 = vmatprep.mubr.msk.f32.mxu0 %vm7063_vm3, %v5455_v29  ;;  %4951 = vmatpush3.msra.mxu1 %v1055_v30  ;;  %v1249_v32 = vpop.permute.xlu0 %1248 }
 0x3f6   :  { %4972 = vmatmul.mubr.msk.f32.vlgmr.msra.gmra.mxu0 %vm7063_vm3, %v5457_v31  ;;  %4953 = vmatmul.mubr.msk.f32.vlgmr.msra.gmra.mxu1 %vm7063_vm3, %v5457_v31 }
 0x3f7   :  { %4974 = vmatprep.subr.mxu1 %v1249_v32  ;;  %v1243_v38 = vpop.permute.xlu1 %1242  ;;  %4986 = vmatpush3.msra.mxu0 %v5962_v39 }
 0x3f8   :  { %4975 = vmatpush3.msra.mxu1 %v1249_v32  ;;  %4987 = vmatprep.subr.mxu0 %v1340_v5 }
 0x3f9   :  { %4976 = vmatprep.subr.mxu1 %v1247_v33  ;;  %v1245_v36 = vpop.permute.xlu0 %1244  ;;  %4988 = vmatpush3.msra.mxu0 %v1340_v5 }
 0x3fa   :  { %4977 = vmatpush3.msra.mxu1 %v1247_v33  ;;  %4989 = vmatprep.subr.mxu0 %v5974_v6 }
 0x3fb   :  { %4978 = vmatprep.subr.mxu1 %v1245_v36  ;;  %4990 = vmatpush3.msra.mxu0 %v5974_v6 }
 0x3fc   :  { %4979 = vmatpush3.msra.mxu1 %v1245_v36  ;;  %4991 = vmatprep.subr.mxu0 %v1338_v7 }
 0x3fd   :  { %4980 = vmatprep.subr.mxu1 %v1243_v38  ;;  %4992 = vmatpush3.msra.mxu0 %v1338_v7  ;;  %v1255_v9 = vpop.permute.xlu0 %1254 }
 0x3fe   :  { %4981 = vmatpush3.msra.mxu1 %v1243_v38  ;;  %5007 = vmatprep.subr.mxu0 %v7070_v21 }
 0x4b6   :  { %v4973_v40 = vpop.f32.mrf.mxu0  ;;  %v4954_v42 = vpop.f32.mrf.mxu1 }
 0x4b7   :  { %5458 = vrcp.f32 %v4973_v40 }
 0x4b8   :  { %v1225_v41 = vpop.f32.mrf.mxu0  ;;  %v1150_v61 = vpop.f32.mrf.mxu1 }
 0x4b9   :  { %5460 = vrcp.f32 %v1225_v41 }
 0x4c4   :  { %v5459_v53 = vpop.eup %5458 }
 0x4c5   :  { %v1237_v4 = vmul.f32 %v5459_v53, %v4954_v42 }
 0x4c6   :  { %v5461_v59 = vpop.eup %5460 }
 0x4c7   :  { %v1235_v63 = vmul.f32 %v5461_v59, %v1150_v61 }
 0x4c9   :  { %4982 = vmatprep.mubr.msk.f32.mxu1 %vm7095_vm0, %v1235_v63  ;;  %v27_v63 = vld [vmem:[%s7042_s0] sm:$0xff] }
 0x4ca   :  { %4983 = vmatmul.mubr.msk.f32.vlgmr.msra.gmra.mxu1 %vm7096_vm12, %v1237_v4  ;;  %v28_v4 = vld [vmem:[%s7042_s0 + $0x8] sm:$0xff]  ;;  %vm7105_vm12 = vmmov %vm7095_vm0 }
 0x58a   :  { %v4984_v8 = vpop.f32.mrf.mxu1 }
 0x58b   :  { %v1335_v12 = vadd.f32 %v4984_v8, %v1255_v9 }
 0x58c   :  { %v1329_v15 = vpop.f32.mrf.mxu1 }
 0x58d   :  { %v1330_v10 = vadd.f32 %v1329_v15, %v1255_v9 }
 0x58f   :  { %4993 = vmatprep.mubr.msk.f32.mxu0 %vm7097_vm13, %v1330_v10  ;;  %vm7106_vm13 = vmmov %vm7095_vm0 }
 0x590   :  { %4994 = vmatmul.mubr.msk.f32.vlgmr.msra.gmra.mxu0 %vm7098_vm14, %v1335_v12  ;;  %vm7107_vm14 = vmmov %vm7095_vm0 }
 0x591   :  { %5015 = vmatprep.mubr.msk.f32.mxu0 %vm7061_vm2, %v7070_v21 }
 0x650   :  { %v4995_v13 = vpop.f32.mrf.mxu0 }
 0x651   :  { %v1427_v28 = vadd.f32 %v4995_v13, %v4450_v49 }
 0x652   :  { %v1421_v17 = vpop.f32.mrf.mxu0 }
 0x653   :  { %v5988_v14 = vadd.f32 %v1427_v28, %v5601_v1  ;;  %v1422_v16 = vadd.f32 %v4450_v49, %v1421_v17  ;;  %v4453_v17 = vld [vmem:[%s7047_s5 + $0x2] ss:$0 sm:$0xff] }
 0x655   :  { %v5991_v46 = vadd.f32 %v1422_v16, %v5596_v0  ;;  %v1437_v18 = vsel %vm7099_vm15, %v5988_v14, 0.0  ;;  %vm7108_vm15 = vmmov %vm7095_vm0 }
 0x656   :  { %1438 = vadd.xlane.f32.xlu0 %v1437_v18 }
 0x657   :  { %v1434_v29 = vsel %vm7100_vm1, %v5991_v46, 0.0  ;;  %vm7109_vm1 = vmmov %vm7095_vm0 }
 0x658   :  { %1435 = vadd.xlane.f32.xlu1 %v1434_v29 }
 0x669   :  { %1576 = vrot.lane.b32.xlu1 %v1340_v5, %s5546_s20 }
 0x66c   :  { %1578 = vrot.lane.b32.xlu0 %v5962_v39, %s5546_s20 }
 0x66d   :  { %1574 = vrot.lane.b32.xlu1 %v5974_v6, %s5546_s20 }
 0x670   :  { %1572 = vrot.lane.b32.xlu0 %v1338_v7, %s5546_s20 }
 0x671   :  { %1480 = vrot.lane.b32.xlu1 %v1340_v5, %s5545_s19  ;;  %v29_v5 = vld [vmem:[%s7042_s0 + $0x10] sm:$0xff] }
 0x6df   :  { %v1439_v0 = vpop.xlane.xlu0 %1438 }
 0x6e0   :  { %v1441_v1 = vmul.f32 0.03125, %v1439_v0 }
 0x6e1   :  { %v1436_v30 = vpop.xlane.xlu1 %1435 }
 0x6e2   :  { %v6007_v31 = vsub.f32 %v5988_v14, %v1441_v1  ;;  %v1440_v32 = vmul.f32 0.03125, %v1436_v30  ;;  %v4454_v1 = vld [vmem:[%s7047_s5 + $0x3] ss:$0 sm:$0xff] }
 0x6e3   :  { %v1579_v33 = vpop.permute.xlu0 %1578 }
 0x6e4   :  { %v6010_v36 = vsub.f32 %v5991_v46, %v1440_v32  ;;  %v1445_v38 = vmul.f32 %v6007_v31, %v6007_v31  ;;  %5008 = vmatpush3.msra.mxu0 %v1579_v33 }
 0x6e5   :  { %v1577_v40 = vpop.permute.xlu1 %1576  ;;  %5009 = vmatprep.subr.mxu0 %v7070_v21 }
 0x6e6   :  { %v1449_v41 = vsel %vm7101_vm11, %v1445_v38, 0.0  ;;  %v1444_v42 = vmul.f32 %v6010_v36, %v6010_v36  ;;  %5010 = vmatpush3.msra.mxu0 %v1577_v40  ;;  %vm7110_vm11 = vmmov %vm7095_vm0 }
 0x6e7   :  { %1450 = vadd.xlane.f32.xlu0 %v1449_v41  ;;  %5011 = vmatprep.subr.mxu0 %v7070_v21  ;;  %v1573_v61 = vpop.permute.xlu0 %1572 }
 0x6e8   :  { %v1446_v53 = vsel %vm7102_vm6, %v1444_v42, 0.0  ;;  %vm7111_vm6 = vmmov %vm7095_vm0 }
 0x6e9   :  { %1447 = vadd.xlane.f32.xlu1 %v1446_v53  ;;  %v1575_v59 = vpop.permute.xlu1 %1574 }
 0x6ea   :  { %5012 = vmatpush3.msra.mxu0 %v1575_v59 }
 0x6eb   :  { %5013 = vmatprep.subr.mxu0 %v7070_v21 }
 0x6ec   :  { %5014 = vmatpush3.msra.mxu0 %v1573_v61 }
 0x6ed   :  { %5016 = vmatmul.mubr.msk.f32.vlgmr.msra.gmra.mxu0 %vm7103_vm7, %v27_v63  ;;  %vm7112_vm7 = vmmov %vm7095_vm0 }
 0x6ee   :  { %5018 = vmatprep.mubr.msk.f32.mxu0 %vm7061_vm2, %v7070_v21 }
 0x6f1   :  { %5019 = vmatmul.mubr.msk.f32.gmra.mxu0 %vm7104_vm4, %v28_v4  ;;  %vm7113_vm4 = vmmov %vm7095_vm0 }
 0x6f2   :  { %5021 = vmatprep.mubr.msk.f32.mxu0 %vm7061_vm2, %v7070_v21  ;;  %vm7135_vm2 = vcmp.ge.s32.totalorder %v5640_v19, 24 }
 0x6f5   :  { %5022 = vmatmul.mubr.msk.f32.gmra.mxu0 %vm7095_vm0, %v29_v5 }
 0x6fa   :  { %1478 = vrot.lane.b32.xlu1 %v5974_v6, %s5545_s19 }
 0x6fd   :  { %1482 = vrot.lane.b32.xlu0 %v5962_v39, %s5545_s19  ;;  %v1481_v39 = vpop.permute.xlu1 %1480 }
 0x6fe   :  { %1584 = vrot.lane.b32.xlu1 %v4450_v49, %s5546_s20 }
 0x701   :  { %1476 = vrot.lane.b32.xlu0 %v1338_v7, %s5545_s19 }
 0x702   :  { %1722 = vrot.lane.b32.xlu1 %v5657_v22, %s5544_s12 }
 0x705   :  { %1488 = vrot.lane.b32.xlu0 %v4450_v49, %s5545_s19 }
 0x706   :  { %1718 = vrot.lane.b32.xlu1 %v5657_v22, %s5544_s12 }
 0x709   :  { %1720 = vrot.lane.b32.xlu0 %v5657_v22, %s5544_s12 }
 0x70a   :  { %1714 = vrot.lane.b32.xlu1 %v5676_v25, %s5544_s12 }
 0x70d   :  { %1716 = vrot.lane.b32.xlu0 %v5676_v25, %s5544_s12 }
 0x70e   :  { %1710 = vrot.lane.b32.xlu1 %v5681_v26, %s5544_s12 }
 0x711   :  { %1712 = vrot.lane.b32.xlu0 %v5676_v25, %s5544_s12 }
 0x712   :  { %1706 = vrot.lane.b32.xlu1 %v5681_v26, %s5544_s12 }
 0x715   :  { %1708 = vrot.lane.b32.xlu0 %v5681_v26, %s5544_s12 }
 0x716   :  { %1702 = vrot.lane.b32.xlu1 %v5691_v27, %s5544_s12 }
 0x719   :  { %1704 = vrot.lane.b32.xlu0 %v5691_v27, %s5544_s12 }
 0x71d   :  { %1700 = vrot.lane.b32.xlu0 %v5691_v27, %s5544_s12 }
 0x770   :  { %v1451_v6 = vpop.xlane.xlu0 %1450 }
 0x771   :  { %v1453_v7 = vmul.f32 0.03125, %v1451_v6 }
 0x772   :  { %v1448_v8 = vpop.xlane.xlu1 %1447 }
 0x773   :  { %v1455_v9 = vadd.f32 1e-05, %v1453_v7  ;;  %v1452_v15 = vmul.f32 0.03125, %v1448_v8 }
 0x774   :  { %v1483_v10 = vpop.permute.xlu0 %1482 }
 0x775   :  { %5462 = vrsqrt.f32 %v1455_v9  ;;  %v1454_v12 = vadd.f32 1e-05, %v1452_v15  ;;  %4996 = vmatprep.subr.mxu1 %v1483_v10 }
 0x776   :  { %4997 = vmatpush3.msra.mxu1 %v1483_v10  ;;  %v1479_v49 = vpop.permute.xlu1 %1478 }
 0x777   :  { %5464 = vrsqrt.f32 %v1454_v12  ;;  %4998 = vmatprep.subr.mxu1 %v1481_v39 }
 0x778   :  { %4999 = vmatpush3.msra.mxu1 %v1481_v39  ;;  %v1477_v13 = vpop.permute.xlu0 %1476 }
 0x779   :  { %5000 = vmatprep.subr.mxu1 %v1479_v49 }
 0x77a   :  { %5001 = vmatpush3.msra.mxu1 %v1479_v49  ;;  %v1585_v38 = vpop.permute.xlu1 %1584 }
 0x77b   :  { %5002 = vmatprep.subr.mxu1 %v1477_v13 }
 0x77c   :  { %5003 = vmatpush3.msra.mxu1 %v1477_v13  ;;  %v6078_v40 = vpop.permute.xlu0 %1488 }
 0x77e   :  { %v6080_v41 = vpop.permute.xlu1 %1722 }
 0x780   :  { %v6082_v42 = vpop.permute.xlu0 %1720 }
 0x782   :  { %v5463_v28 = vpop.eup %5462 }
 0x783   :  { %v1459_v16 = vmul.f32 %v5463_v28, %v6007_v31 }
 0x784   :  { %v5465_v18 = vpop.eup %5464  ;;  %v6088_v4 = vpop.permute.xlu0 %1716 }
 0x785   :  { %v1458_v29 = vmul.f32 %v5465_v18, %v6010_v36  ;;  %v1465_v0 = vmul.f32 %v4453_v17, %v1459_v16  ;;  %v6084_v36 = vpop.permute.xlu1 %1718 }
 0x787   :  { %v1464_v30 = vmul.f32 %v4453_v17, %v1458_v29  ;;  %v1471_v33 = vadd.f32 %v4454_v1, %v1465_v0 }
 0x788   :  { %v6103_v13 = vpop.permute.xlu0 %1712 }
 0x789   :  { %v1470_v32 = vadd.f32 %v4454_v1, %v1464_v30  ;;  %v6092_v39 = vpop.permute.xlu1 %1714 }
 0x78b   :  { %5004 = vmatprep.mubr.msk.f32.mxu1 %vm7105_vm12, %v1470_v32  ;;  %vm7114_vm12 = vmmov %vm7095_vm0 }
 0x78c   :  { %5005 = vmatmul.mubr.msk.f32.vlgmr.msra.gmra.mxu1 %vm7106_vm13, %v1471_v33  ;;  %v6121_v0 = vpop.permute.xlu0 %1708  ;;  %vm7115_vm13 = vmmov %vm7095_vm0 }
 0x78d   :  { %v6108_v17 = vpop.permute.xlu1 %1710 }
 0x791   :  { %v6127_v32 = vpop.permute.xlu1 %1706 }
 0x7ad   :  { %v1662_v31 = vpop.f32.mrf.mxu0 }
 0x7ae   :  { %v6094_v6 = vadd.f32 %v1662_v31, %v1585_v38 }
 0x7af   :  { %v5017_v53 = vpop.f32.mrf.mxu0 }
 0x7b0   :  { %v1745_v9 = vmul.f32 %v6084_v36, %v6094_v6  ;;  %v1685_v18 = vmul.f32 %v5657_v22, %v6094_v6  ;;  %v1742_v29 = vmul.f32 %v6103_v13, %v6094_v6  ;;  %v6139_v53 = vpop.permute.xlu0 %1704 }
 0x7b1   :  { %v1667_v59 = vpop.f32.mrf.mxu0 }
 0x7b2   :  { %v6086_v61 = vadd.f32 %v1667_v59, %v1585_v38 }
 0x7b3   :  { %v5020_v63 = vpop.f32.mrf.mxu0 }
 0x7b4   :  { %v1746_v5 = vmul.f32 %v6082_v42, %v6086_v61  ;;  %v1686_v12 = vmul.f32 %v5657_v22, %v6086_v61  ;;  %v1743_v16 = vmul.f32 %v6092_v39, %v6086_v61  ;;  %v1740_v33 = vmul.f32 %v6121_v0, %v6086_v61 }
 0x7b5   :  { %v1672_v7 = vpop.f32.mrf.mxu0  ;;  %v1683_v31 = vmul.f32 %v5676_v25, %v6086_v61  ;;  %v1682_v63 = vmul.f32 %v5676_v25, %v6094_v6 }
 0x7b6   :  { %v1673_v8 = vadd.f32 %v1672_v7, %v1585_v38  ;;  %1910 = vrot.lane.b32.xlu1 %v1746_v5, %s5545_s19  ;;  %v1739_v38 = vmul.f32 %v6127_v32, %v6094_v6  ;;  %v1680_v7 = vmul.f32 %v5681_v26, %v6086_v61 }
 0x7b7   :  { %v5023_v15 = vpop.f32.mrf.mxu0 }
 0x7b8   :  { %v1687_v10 = vmul.f32 %v5657_v22, %v1673_v8  ;;  %v1747_v49 = vmul.f32 %v6080_v41, %v1673_v8  ;;  %v1744_v28 = vmul.f32 %v6088_v4, %v1673_v8  ;;  %v1741_v1 = vmul.f32 %v6108_v17, %v1673_v8 }
 0x7b9   :  { %v1684_v30 = vmul.f32 %v5676_v25, %v1673_v8  ;;  %v1738_v59 = vmul.f32 %v6139_v53, %v1673_v8  ;;  %v1681_v5 = vmul.f32 %v5681_v26, %v1673_v8  ;;  %v1678_v15 = vmul.f32 %v5691_v27, %v1673_v8  ;;  %v6174_v8 = vpop.permute.xlu1 %1702 }
 0x7ba   :  { %5024 = vmatprep.subr.msk.mxu1 %vm7107_vm14, %v1687_v10  ;;  %1912 = vrot.lane.b32.xlu0 %v1747_v49, %s5545_s19  ;;  %vm7116_vm14 = vmmov %vm7095_vm0  ;;  %v6176_v49 = vpop.permute.xlu0 %1700 }
 0x7bb   :  { %5025 = vmatpush3.xpose.msk.msra.mxu1 %vm7108_vm15, %v1687_v10  ;;  %1908 = vrot.lane.b32.xlu1 %v1745_v9, %s5545_s19  ;;  %vm7117_vm15 = vmmov %vm7095_vm0  ;;  %v1679_v9 = vmul.f32 %v5681_v26, %v6094_v6  ;;  %v1677_v10 = vmul.f32 %v5691_v27, %v6086_v61 }
 0x7bc   :  { %5026 = vmatprep.subr.msk.mxu1 %vm7109_vm1, %v1686_v12  ;;  %vm7118_vm1 = vmmov %vm7095_vm0 }
 0x7be   :  { %1906 = vrot.lane.b32.xlu0 %v1744_v28, %s5545_s19 }
 0x7bf   :  { %5027 = vmatpush3.xpose.msk.msra.mxu1 %vm7110_vm11, %v1686_v12  ;;  %1904 = vrot.lane.b32.xlu1 %v1743_v16, %s5545_s19  ;;  %vm7119_vm11 = vmmov %vm7095_vm0  ;;  %v1676_v12 = vmul.f32 %v5691_v27, %v6094_v6 }
 0x7c0   :  { %5028 = vmatprep.subr.msk.mxu1 %vm7111_vm6, %v1685_v18  ;;  %vm7120_vm6 = vmmov %vm7095_vm0 }
 0x7c2   :  { %1902 = vrot.lane.b32.xlu0 %v1742_v29, %s5545_s19 }
 0x7c3   :  { %5029 = vmatpush3.xpose.msk.msra.mxu1 %vm7112_vm7, %v1685_v18  ;;  %1900 = vrot.lane.b32.xlu1 %v1741_v1, %s5545_s19  ;;  %vm7121_vm7 = vmmov %vm7095_vm0 }
 0x7c4   :  { %5030 = vmatprep.subr.msk.mxu1 %vm7113_vm4, %v1684_v30  ;;  %vm7122_vm4 = vmmov %vm7095_vm0 }
 0x7c6   :  { %1898 = vrot.lane.b32.xlu0 %v1740_v33, %s5545_s19 }
 0x7c7   :  { %5031 = vmatpush3.xpose.msk.msra.mxu1 %vm7095_vm0, %v1684_v30  ;;  %1896 = vrot.lane.b32.xlu1 %v1739_v38, %s5545_s19 }
 0x7c8   :  { %5032 = vmatprep.subr.msk.mxu1 %vm7114_vm12, %v1683_v31  ;;  %vm7123_vm12 = vmmov %vm7095_vm0 }
 0x7ca   :  { %1894 = vrot.lane.b32.xlu0 %v1738_v59, %s5545_s19 }
 0x7cb   :  { %5033 = vmatpush3.xpose.msk.msra.mxu1 %vm7115_vm13, %v1683_v31  ;;  %vm7124_vm13 = vmmov %vm7095_vm0 }
 0x7cc   :  { %5034 = vmatprep.subr.msk.mxu1 %vm7116_vm14, %v1682_v63  ;;  %vm7125_vm14 = vmmov %vm7095_vm0 }
 0x7cf   :  { %5035 = vmatpush3.xpose.msk.msra.mxu1 %vm7117_vm15, %v1682_v63  ;;  %vm7126_vm15 = vmmov %vm7095_vm0 }
 0x7d0   :  { %5036 = vmatprep.subr.msk.mxu1 %vm7118_vm1, %v1681_v5  ;;  %vm7127_vm1 = vmmov %vm7095_vm0 }
 0x7d3   :  { %5037 = vmatpush3.xpose.msk.msra.mxu1 %vm7119_vm11, %v1681_v5  ;;  %vm7128_vm11 = vmmov %vm7095_vm0 }
 0x7d4   :  { %5038 = vmatprep.subr.msk.mxu1 %vm7120_vm6, %v1680_v7  ;;  %vm7129_vm6 = vmmov %vm7095_vm0 }
 0x7d7   :  { %5039 = vmatpush3.xpose.msk.msra.mxu1 %vm7121_vm7, %v1680_v7  ;;  %vm7130_vm7 = vmmov %vm7095_vm0 }
 0x7d8   :  { %5040 = vmatprep.subr.msk.mxu1 %vm7122_vm4, %v1679_v9  ;;  %vm645_vm4 = vcmp.ge.s32.totalorder %v5640_v19, 12 }
 0x7db   :  { %5041 = vmatpush3.xpose.msk.msra.mxu1 %vm7095_vm0, %v1679_v9  ;;  %vm661_vm0 = vcmp.ge.s32.totalorder %v5640_v19, 36 }
 0x7dc   :  { %5042 = vmatprep.subr.msk.mxu1 %vm7123_vm12, %v1678_v15  ;;  %vm7131_vm12 = vcmp.lt.s32.totalorder %v5640_v19, 24 }
 0x7df   :  { %5043 = vmatpush3.xpose.msk.msra.mxu1 %vm7124_vm13, %v1678_v15  ;;  %vm6186_vm13 = vmand %vm645_vm4, %vm7131_vm12  ;;  %vm669_vm12 = vcmp.lt.s32.totalorder %v5640_v19, 60  ;;  %v2089_v15 = vld [vmem:[%s7044_s2 + $0x70] sm:$0xff] }
 0x7e0   :  { %5044 = vmatprep.subr.msk.mxu1 %vm7125_vm14, %v1677_v10  ;;  %vm653_vm14 = vcmp.lt.s32.totalorder %v5640_v19, 36 }
 0x7e1   :  { %vm654_vm3 = vmand %vm7135_vm2, %vm653_vm14  ;;  %vm686_vm14 = vcmp.ge.s32.totalorder %v5640_v19, 72 }
 0x7e3   :  { %5045 = vmatpush3.xpose.msk.msra.mxu1 %vm7126_vm15, %v1677_v10  ;;  %vm7134_vm15 = vcmp.lt.s32.totalorder %v5640_v19, 48 }
 0x7e4   :  { %5046 = vmatprep.subr.msk.mxu1 %vm7127_vm1, %v1676_v12  ;;  %vm662_vm1 = vmand %vm661_vm0, %vm7134_vm15  ;;  %vm7136_vm15 = vcmp.ge.s32.totalorder %v5640_v19, 48 }
 0x7e5   :  { %vm668_vm4 = vmor %vm6186_vm13, %vm662_vm1  ;;  %vm687_vm1 = vcmp.lt.s32.totalorder %v5640_v19, 84 }
 0x7e6   :  { %vm670_vm5 = vmand %vm7136_vm15, %vm669_vm12  ;;  %vm1865_vm12 = vcmask 785408  }
 0x7e7   :  { %5047 = vmatpush3.xpose.msk.msra.mxu1 %vm7128_vm11, %v1676_v12  ;;  %vm677_vm11 = vcmp.ge.s32.totalorder %v5640_v19, 60  ;;  %vm697_vm13 = vmand %vm695_vm10, %vm696_vm8  ;;  %vm7139_vm8 = vnez %v7081_v24  ;;  %vm7140_vm10 = vcmp.lt.s32.totalorder %v5640_v19, 8  ;;  %v4584_v24 = vld [vmem:[%s7044_s2 + $0xb0] sm:$0xff] }
 0x7e8   :  { %5105 = vmatprep.subr.mxu1 %v2089_v15 }
 0x828   :  { %v1911_v28 = vpop.permute.xlu1 %1910 }
 0x82c   :  { %v1913_v16 = vpop.permute.xlu0 %1912 }
 0x82d   :  { %5051 = vmatprep.subr.mxu0 %v1913_v16  ;;  %v1909_v18 = vpop.permute.xlu1 %1908 }
 0x82e   :  { %5052 = vmatpush3.msra.mxu0 %v1913_v16 }
 0x82f   :  { %5053 = vmatprep.subr.mxu0 %v1911_v28 }
 0x830   :  { %5054 = vmatpush3.msra.mxu0 %v1911_v28  ;;  %v1907_v29 = vpop.permute.xlu0 %1906 }
 0x831   :  { %5055 = vmatprep.subr.mxu0 %v1909_v18  ;;  %v1905_v1 = vpop.permute.xlu1 %1904 }
 0x832   :  { %5056 = vmatpush3.msra.mxu0 %v1909_v18 }
 0x833   :  { %5057 = vmatprep.subr.mxu0 %v1907_v29 }
 0x834   :  { %5058 = vmatpush3.msra.mxu0 %v1907_v29  ;;  %v1903_v30 = vpop.permute.xlu0 %1902 }
 0x835   :  { %5059 = vmatprep.subr.mxu0 %v1905_v1  ;;  %v1901_v33 = vpop.permute.xlu1 %1900 }
 0x836   :  { %5060 = vmatpush3.msra.mxu0 %v1905_v1 }
 0x837   :  { %5061 = vmatprep.subr.mxu0 %v1903_v30 }
 0x838   :  { %5062 = vmatpush3.msra.mxu0 %v1903_v30  ;;  %v1899_v38 = vpop.permute.xlu0 %1898  ;;  %v1737_v30 = vmul.f32 %v6174_v8, %v6086_v61 }
 0x839   :  { %5063 = vmatprep.subr.mxu0 %v1901_v33  ;;  %v1897_v31 = vpop.permute.xlu1 %1896 }
 0x83a   :  { %5064 = vmatpush3.msra.mxu0 %v1901_v33 }
 0x83b   :  { %5065 = vmatprep.subr.mxu0 %v1899_v38 }
 0x83c   :  { %5066 = vmatpush3.msra.mxu0 %v1899_v38  ;;  %v1895_v59 = vpop.permute.xlu0 %1894 }
 0x83d   :  { %5067 = vmatprep.subr.mxu0 %v1897_v31 }
 0x83e   :  { %5068 = vmatpush3.msra.mxu0 %v1897_v31 }
 0x83f   :  { %5069 = vmatprep.subr.mxu0 %v1895_v59 }
 0x840   :  { %5070 = vmatpush3.msra.mxu0 %v1895_v59 }
 0x84c   :  { %v5006_v63 = vpop.f32.mrf.mxu1 }
 0x84d   :  { %v1569_v9 = vadd.f32 %v5006_v63, %v6078_v40 }
 0x84e   :  { %v1563_v5 = vpop.f32.mrf.mxu1 }
 0x84f   :  { %v1564_v7 = vadd.f32 %v1563_v5, %v6078_v40 }
 0x851   :  { %5048 = vmatprep.mubr.msk.f32.mxu1 %vm7129_vm6, %v1564_v7  ;;  %vm678_vm6 = vcmp.lt.s32.totalorder %v5640_v19, 72 }
 0x852   :  { %5049 = vmatmul.mubr.msk.f32.vlgmr.msra.gmra.mxu1 %vm7130_vm7, %v1569_v9  ;;  %vm639_vm7 = vcmp.lt.s32.totalorder %v5640_v19, 12  ;;  %vm679_vm9 = vmand %vm677_vm11, %vm678_vm6 }
 0x853   :  { %vm659_vm0 = vmor %vm639_vm7, %vm654_vm3  ;;  %5106 = vmatpush3.msra.mxu1 %v2089_v15 }
 0x854   :  { %vm685_vm2 = vmor %vm668_vm4, %vm679_vm9  ;;  %vm7137_vm9 = vnez %v7077_v20  ;;  %v4586_v20 = vld [vmem:[%s7044_s2 + $0xf0] sm:$0xff] }
 0x855   :  { %vm675_vm6 = vmor %vm659_vm0, %vm670_vm5  ;;  %vm7138_vm5 = vnez %v7079_v23  ;;  %v4585_v23 = vld [vmem:[%s7044_s2 + $0xd0] sm:$0xff] }
 0x856   :  { %vm688_vm11 = vmand %vm686_vm14, %vm687_vm1  ;;  %vm7146_vm1 = vcmask 261120  }
 0x857   :  { %vm703_vm3 = vmor %vm685_vm2, %vm697_vm13 }
 0x858   :  { %vm693_vm7 = vmor %vm675_vm6, %vm688_vm11  ;;  %v6208_v40 = vsel %vm703_vm3, 0.0, %v5547_v34 }
 0x859   :  { %v6211_v12 = vsel %vm693_vm7, 0.0, %v5547_v34  ;;  %v1736_v34 = vmul.f32 %v6176_v49, %v6094_v6  ;;  %vm7141_vm4 = vmmov %vm7140_vm10 }
 0x85a   :  { %vm7142_vm0 = vmmov %vm7141_vm4 }
 0x85b   :  { %vm7143_vm15 = vmmov %vm7142_vm0 }
 0x85c   :  { %vm7144_vm2 = vmmov %vm7142_vm0 }
 0x85d   :  { %vm7145_vm14 = vmmov %vm7142_vm0 }
 0x85e   :  { %vm7147_vm13 = vmmov %vm7146_vm1 }
 0x85f   :  { %vm7148_vm6 = vmmov %vm7146_vm1 }
 0x860   :  { %vm7149_vm11 = vmmov %vm7146_vm1 }
 0x861   :  { %vm7150_vm3 = vmmov %vm7146_vm1 }
 0x862   :  { %vm7151_vm7 = vmmov %vm7146_vm1 }
 0x912   :  { %v5050_v10 = vpop.f32.mrf.mxu1 }
 0x913   :  { %v1862_v28 = vadd.f32 %v5050_v10, %v6208_v40  ;;  %v2088_v10 = vld [vmem:[%s7044_s2 + $0x50] sm:$0xff] }
 0x914   :  { %v1856_v16 = vpop.f32.mrf.mxu1  ;;  %5107 = vmatprep.subr.mxu1 %v2088_v10 }
 0x915   :  { %v1857_v18 = vadd.f32 %v1856_v16, %v6211_v12  ;;  %v1869_v29 = vsel %vm1865_vm12, %v1862_v28, -inf  ;;  %5108 = vmatpush3.msra.mxu1 %v2088_v10  ;;  %v6315_v16 = vld [vmem:[%s7044_s2 + $0x10] sm:$0xff] }
 0x916   :  { %1870 = vmax.xlane.f32.xlu0 %v1869_v29 }
 0x917   :  { %v1866_v1 = vsel %vm1865_vm12, %v1857_v18, -inf }
 0x918   :  { %1867 = vmax.xlane.f32.xlu1 %v1866_v1 }
 0x929   :  { %1892 = vrot.lane.b32.xlu1 %v1737_v30, %s5545_s19 }
 0x92c   :  { %1890 = vrot.lane.b32.xlu0 %v1736_v34, %s5545_s19 }
 0x92d   :  { %2188 = vrot.lane.b32.xlu1 %v2089_v15, %s5545_s19 }
 0x930   :  { %2186 = vrot.lane.b32.xlu0 %v2088_v10, %s5545_s19 }
 0x934   :  { %2182 = vrot.lane.b32.xlu0 %v6315_v16, %s5545_s19 }
 0x99f   :  { %v1871_v33 = vpop.xlane.xlu0 %1870 }
 0x9a0   :  { %v1873_v38 = vsub.f32 %v1862_v28, %v1871_v33  ;;  %v6309_v28 = vld [vmem:[%s7044_s2 + $0x30] sm:$0xff] }
 0x9a1   :  { %v1868_v31 = vpop.xlane.xlu1 %1867  ;;  %5109 = vmatprep.subr.mxu1 %v6309_v28  ;;  %2184 = vrot.lane.b32.xlu1 %v6309_v28, %s5545_s19 }
 0x9a2   :  { %v1872_v59 = vsub.f32 %v1857_v18, %v1868_v31  ;;  %v1876_v63 = vmul.f32 1.442695, %v1873_v38  ;;  %5110 = vmatpush3.msra.mxu1 %v6309_v28 }
 0x9a3   :  { %v1891_v9 = vpop.permute.xlu0 %1890  ;;  %5111 = vmatprep.subr.mxu1 %v6315_v16 }
 0x9a4   :  { %v1874_v5 = vmul.f32 1.442695, %v1872_v59  ;;  %5112 = vmatpush3.msra.mxu1 %v6315_v16 }
 0x9a5   :  { %v1893_v7 = vpop.permute.xlu1 %1892 }
 0x9a6   :  { %5466 = vpow2.f32 %v1874_v5  ;;  %5071 = vmatprep.subr.mxu0 %v1893_v7 }
 0x9a7   :  { %5468 = vpow2.f32 %v1876_v63  ;;  %5072 = vmatpush3.msra.mxu0 %v1893_v7  ;;  %v2187_v29 = vpop.permute.xlu0 %2186  ;;  %v4490_v7 = vld [vmem:[%s7046_s4 + $0x2] ss:$0 sm:$0xff] }
 0x9a8   :  { %5073 = vmatprep.subr.mxu0 %v1891_v9  ;;  %2194 = vrot.lane.b32.xlu1 %v4490_v7, %s5545_s19 }
 0x9a9   :  { %5074 = vmatpush3.msra.mxu0 %v1891_v9  ;;  %v2189_v18 = vpop.permute.xlu1 %2188 }
 0x9aa   :  { %5078 = vmatprep.subr.msk.mxu0 %vm7137_vm9, %v7072_v54 }
 0x9ab   :  { %v2183_v9 = vpop.permute.xlu0 %2182 }
 0x9b3   :  { %v5467_v61 = vpop.eup %5466 }
 0x9b4   :  { %v5469_v6 = vpop.eup %5468  ;;  %5075 = vmatprep.mubr.msk.f32.mxu0 %vm1865_vm12, %v5467_v61 }
 0x9b5   :  { %5076 = vmatmul.mubr.msk.f32.vlgmr.msra.gmra.mxu0 %vm1865_vm12, %v5469_v6 }
 0x9b6   :  { %5079 = vmatpush3.msk.msra.mxu0 %vm7137_vm9, %v7072_v54  ;;  %5102 = vmatprep.mubr.msk.f32.mxu0 %vm1865_vm12, %v5467_v61 }
 0x9b7   :  { %5080 = vmatprep.subr.msk.mxu0 %vm7137_vm9, %v7072_v54 }
 0x9b8   :  { %5081 = vmatpush3.msk.msra.mxu0 %vm7137_vm9, %v7072_v54 }
 0x9b9   :  { %5082 = vmatprep.subr.msk.mxu0 %vm7137_vm9, %v7072_v54 }
 0x9ba   :  { %5083 = vmatpush3.msk.msra.mxu0 %vm7137_vm9, %v7072_v54 }
 0x9bb   :  { %5084 = vmatprep.subr.msk.mxu0 %vm7138_vm5, %v7072_v54 }
 0x9bc   :  { %5085 = vmatpush3.msk.msra.mxu0 %vm7138_vm5, %v7072_v54 }
 0x9bd   :  { %5086 = vmatprep.subr.msk.mxu0 %vm7138_vm5, %v7072_v54 }
 0x9be   :  { %5087 = vmatpush3.msk.msra.mxu0 %vm7138_vm5, %v7072_v54 }
 0x9bf   :  { %5088 = vmatprep.subr.msk.mxu0 %vm7138_vm5, %v7072_v54 }
 0x9c0   :  { %5089 = vmatpush3.msk.msra.mxu0 %vm7138_vm5, %v7072_v54 }
 0x9c1   :  { %5090 = vmatprep.subr.msk.mxu0 %vm7139_vm8, %v7072_v54 }
 0x9c2   :  { %5091 = vmatpush3.msk.msra.mxu0 %vm7139_vm8, %v7072_v54 }
 0x9c3   :  { %5092 = vmatprep.subr.msk.mxu0 %vm7139_vm8, %v7072_v54 }
 0x9c4   :  { %5093 = vmatpush3.msk.msra.mxu0 %vm7139_vm8, %v7072_v54 }
 0x9c5   :  { %5094 = vmatprep.subr.msk.mxu0 %vm7139_vm8, %v7072_v54 }
 0x9c6   :  { %5095 = vmatpush3.msk.msra.mxu0 %vm7139_vm8, %v7072_v54 }
 0x9c7   :  { %5096 = vmatprep.subr.msk.mxu0 %vm7140_vm10, %v7072_v54  ;;  %vm7152_vm10 = vmmov %vm7146_vm1 }
 0x9c8   :  { %5097 = vmatpush3.msk.msra.mxu0 %vm7141_vm4, %v7072_v54  ;;  %vm7153_vm4 = vcmask 523264  }
 0x9c9   :  { %5098 = vmatprep.subr.msk.mxu0 %vm7142_vm0, %v7072_v54  ;;  %vm7154_vm0 = vmmov %vm7146_vm1 }
 0x9ca   :  { %5099 = vmatpush3.msk.msra.mxu0 %vm7143_vm15, %v7072_v54  ;;  %vm7155_vm15 = vmmov %vm7153_vm4 }
 0x9cb   :  { %5100 = vmatprep.subr.msk.mxu0 %vm7144_vm2, %v7072_v54  ;;  %vm7156_vm2 = vmmov %vm7153_vm4 }
 0x9cc   :  { %5101 = vmatpush3.msk.msra.mxu0 %vm7145_vm14, %v7072_v54  ;;  %vm7157_vm14 = vmmov %vm7156_vm2 }
 0x9cd   :  { %5103 = vmatmul.mubr.msk.f32.vlgmr.msra.gmra.mxu0 %vm1865_vm12, %v5469_v6  ;;  %5116 = vmatprep.subr.mxu0 %v2189_v18 }
 0x9ce   :  { %5117 = vmatpush3.msra.mxu0 %v2189_v18 }
 0x9cf   :  { %5118 = vmatprep.subr.mxu0 %v2187_v29 }
 0x9d0   :  { %5119 = vmatpush3.msra.mxu0 %v2187_v29 }
 0xa13   :  { %v2185_v30 = vpop.permute.xlu1 %2184 }
 0xa14   :  { %5120 = vmatprep.subr.mxu0 %v2185_v30 }
 0xa15   :  { %5121 = vmatpush3.msra.mxu0 %v2185_v30 }
 0xa16   :  { %5122 = vmatprep.subr.mxu0 %v2183_v9 }
 0xa17   :  { %5123 = vmatpush3.msra.mxu0 %v2183_v9  ;;  %v2321_v9 = vld [vmem:[%s7044_s2 + $0x18] sm:$0xff] }
 0xa75   :  { %v5077_v1 = vpop.f32.mrf.mxu0 }
 0xa77   :  { %v1998_v34 = vpop.f32.mrf.mxu0 }
 0xa8d   :  { %v5104_v33 = vpop.f32.mrf.mxu0 }
 0xa8e   :  { %5470 = vrcp.f32 %v5104_v33 }
 0xa8f   :  { %v2073_v38 = vpop.f32.mrf.mxu0 }
 0xa90   :  { %5472 = vrcp.f32 %v2073_v38 }
 0xa9b   :  { %v5471_v31 = vpop.eup %5470 }
 0xa9c   :  { %v2085_v5 = vmul.f32 %v5471_v31, %v5077_v1  ;;  %v2195_v1 = vpop.permute.xlu1 %2194 }
 0xa9d   :  { %v5473_v59 = vpop.eup %5472 }
 0xa9e   :  { %v2083_v63 = vmul.f32 %v5473_v59, %v1998_v34 }
 0xaa0   :  { %5113 = vmatprep.mubr.msk.f32.mxu1 %vm7146_vm1, %v2083_v63  ;;  %vm7158_vm1 = vmmov %vm7154_vm0 }
 0xaa1   :  { %5114 = vmatmul.mubr.msk.f32.vlgmr.msra.gmra.mxu1 %vm7147_vm13, %v2085_v5  ;;  %vm7159_vm13 = vmmov %vm7154_vm0 }
 0xb61   :  { %v5115_v61 = vpop.f32.mrf.mxu1 }
 0xb62   :  { %v2175_v29 = vadd.f32 %v5115_v61, %v4490_v7 }
 0xb63   :  { %v2169_v6 = vpop.f32.mrf.mxu1 }
 0xb64   :  { %v2170_v18 = vadd.f32 %v4490_v7, %v2169_v6  ;;  %v2327_v7 = vld [vmem:[%s7044_s2 + $0x78] sm:$0xff] }
 0xb66   :  { %5124 = vmatprep.mubr.msk.f32.mxu0 %vm7148_vm6, %v2170_v18  ;;  %vm7160_vm6 = vmmov %vm7156_vm2 }
 0xb67   :  { %5125 = vmatmul.mubr.msk.f32.vlgmr.msra.gmra.mxu0 %vm7149_vm11, %v2175_v29  ;;  %vm7161_vm11 = vmmov %vm7154_vm0 }
 0xc27   :  { %v5126_v30 = vpop.f32.mrf.mxu0 }
 0xc28   :  { %v2275_v34 = vadd.f32 %v5126_v30, %v2195_v1 }
 0xc29   :  { %v2269_v33 = vpop.f32.mrf.mxu0 }
 0xc2a   :  { %v6334_v38 = vadd.f32 %v2275_v34, %v5988_v14  ;;  %v2270_v31 = vadd.f32 %v2269_v33, %v2195_v1  ;;  %v2325_v14 = vld [vmem:[%s7044_s2 + $0x58] sm:$0xff] }
 0xc2c   :  { %v6337_v59 = vadd.f32 %v2270_v31, %v5991_v46  ;;  %v2285_v63 = vsel %vm7150_vm3, %v6334_v38, 0.0  ;;  %v2323_v46 = vld [vmem:[%s7044_s2 + $0x38] sm:$0xff]  ;;  %vm7162_vm3 = vmmov %vm7154_vm0 }
 0xc2d   :  { %2286 = vadd.xlane.f32.xlu1 %v2285_v63 }
 0xc2e   :  { %v2282_v5 = vsel %vm7151_vm7, %v6337_v59, 0.0  ;;  %vm7163_vm7 = vmmov %vm7154_vm0 }
 0xc2f   :  { %2283 = vadd.xlane.f32.xlu0 %v2282_v5 }
 0xc3e   :  { %2360 = vrot.lane.b32.xlu1 %v2327_v7, %s5546_s20 }
 0xc42   :  { %2354 = vrot.lane.b32.xlu1 %v2088_v10, %s5546_s20 }
 0xc45   :  { %2358 = vrot.lane.b32.xlu0 %v2089_v15, %s5546_s20 }
 0xc46   :  { %2356 = vrot.lane.b32.xlu1 %v2325_v14, %s5546_s20 }
 0xc4a   :  { %2352 = vrot.lane.b32.xlu1 %v2323_v46, %s5546_s20 }
 0xc4e   :  { %2348 = vrot.lane.b32.xlu1 %v2321_v9, %s5546_s20  ;;  %v2328_v9 = vld [vmem:[%s7046_s4 + $0x2] sm:$0x3] }
 0xcb6   :  { %v2287_v10 = vpop.xlane.xlu1 %2286 }
 0xcb7   :  { %v2289_v61 = vmul.f32 0.03125, %v2287_v10  ;;  %v7068_v10 = vsub.s32 1, %v5797_v11 }
 0xcb8   :  { %v2284_v6 = vpop.xlane.xlu0 %2283 }
 0xcb9   :  { %v2291_v18 = vsub.f32 %v6334_v38, %v2289_v61  ;;  %v2288_v15 = vmul.f32 0.03125, %v2284_v6  ;;  %v7069_v61 = vsub.s32 0, %v5797_v11  ;;  %v2337_v6 = vrot.slane %v2328_v9, %v7068_v10 }
 0xcba   :  { %v2361_v29 = vpop.permute.xlu1 %2360 }
 0xcbb   :  { %v2290_v1 = vsub.f32 %v6337_v59, %v2288_v15  ;;  %v2293_v30 = vmul.f32 %v2291_v18, %v2291_v18  ;;  %v2333_v15 = vrot.slane %v2328_v9, %v7069_v61  ;;  %2372 = vrot.lane.b32.xlu1 %v2337_v6, %s5546_s20 }
 0xcbc   :  { %v2359_v34 = vpop.permute.xlu0 %2358 }
 0xcbd   :  { %v2297_v33 = vsel %vm7152_vm10, %v2293_v30, 0.0  ;;  %v2292_v31 = vmul.f32 %v2290_v1, %v2290_v1  ;;  %v2365_v63 = vsel %vm7153_vm4, %v2359_v34, %v2361_v29  ;;  %vm7164_vm10 = vmmov %vm7154_vm0 }
 0xcbe   :  { %2298 = vadd.xlane.f32.xlu0 %v2297_v33  ;;  %5127 = vmatprep.subr.mxu1 %v2365_v63  ;;  %v2355_v7 = vpop.permute.xlu1 %2354  ;;  %vm7165_vm4 = vmmov %vm7154_vm0 }
 0xcbf   :  { %5128 = vmatpush3.msra.mxu1 %v2365_v63  ;;  %v2294_v5 = vsel %vm7154_vm0, %v2292_v31, 0.0 }
 0xcc2   :  { %2295 = vadd.xlane.f32.xlu0 %v2294_v5  ;;  %v2357_v14 = vpop.permute.xlu1 %2356 }
 0xcc3   :  { %v2364_v46 = vsel %vm7155_vm15, %v2355_v7, %v2357_v14  ;;  %vm7166_vm15 = vmmov %vm7154_vm0 }
 0xcc4   :  { %5129 = vmatprep.subr.mxu1 %v2364_v46 }
 0xcc5   :  { %5130 = vmatpush3.msra.mxu1 %v2364_v46 }
 0xcc6   :  { %v2353_v34 = vpop.permute.xlu1 %2352 }
 0xcca   :  { %v2349_v7 = vpop.permute.xlu1 %2348 }
 0xcd8   :  { %2350 = vrot.lane.b32.xlu0 %v6309_v28, %s5546_s20 }
 0xcdc   :  { %2346 = vrot.lane.b32.xlu0 %v6315_v16, %s5546_s20 }
 0xce0   :  { %2370 = vrot.lane.b32.xlu0 %v2333_v15, %s5546_s20  ;;  %v4495_v15 = vld [vmem:[%s7047_s5 + $0x4] ss:$0 sm:$0xff] }
 0xd47   :  { %v2299_v28 = vpop.xlane.xlu0 %2298 }
 0xd48   :  { %v2301_v16 = vmul.f32 0.03125, %v2299_v28 }
 0xd4a   :  { %v2303_v29 = vadd.f32 1e-05, %v2301_v16 }
 0xd4b   :  { %v2296_v30 = vpop.xlane.xlu0 %2295 }
 0xd4c   :  { %5474 = vrsqrt.f32 %v2303_v29  ;;  %v2300_v33 = vmul.f32 0.03125, %v2296_v30  ;;  %v4496_v30 = vld [vmem:[%s7047_s5 + $0x5] ss:$0 sm:$0xff] }
 0xd4e   :  { %v2302_v31 = vadd.f32 1e-05, %v2300_v33 }
 0xd4f   :  { %v2351_v63 = vpop.permute.xlu0 %2350 }
 0xd50   :  { %5476 = vrsqrt.f32 %v2302_v31  ;;  %v2363_v5 = vsel %vm7156_vm2, %v2351_v63, %v2353_v34  ;;  %v2488_v63 = vld [vmem:[%s7045_s3 + $0x68] sm:$0xff]  ;;  %vm7167_vm2 = vmmov %vm7154_vm0 }
 0xd51   :  { %5131 = vmatprep.subr.mxu1 %v2363_v5 }
 0xd52   :  { %5132 = vmatpush3.msra.mxu1 %v2363_v5  ;;  %v2487_v5 = vld [vmem:[%s7045_s3 + $0x60] sm:$0xff] }
 0xd53   :  { %v2347_v14 = vpop.permute.xlu0 %2346 }
 0xd54   :  { %v2362_v46 = vsel %vm7157_vm14, %v2347_v14, %v2349_v7  ;;  %v2486_v7 = vld [vmem:[%s7045_s3 + $0x58] sm:$0xff]  ;;  %v2485_v14 = vld [vmem:[%s7045_s3 + $0x50] sm:$0xff]  ;;  %vm7168_vm14 = vmmov %vm7154_vm0 }
 0xd55   :  { %5133 = vmatprep.subr.mxu1 %v2362_v46 }
 0xd56   :  { %5134 = vmatpush3.msra.mxu1 %v2362_v46  ;;  %v2484_v46 = vld [vmem:[%s7045_s3 + $0x48] sm:$0xff] }
 0xd59   :  { %v5475_v9 = vpop.eup %5474 }
 0xd5a   :  { %v2307_v6 = vmul.f32 %v5475_v9, %v2291_v18  ;;  %v2490_v18 = vld [vmem:[%s7045_s3 + $0x78] sm:$0xff]  ;;  %v2483_v9 = vld [vmem:[%s7045_s3 + $0x40] sm:$0xff] }
 0xd5b   :  { %5138 = vmatprep.subr.mxu0 %v2490_v18 }
 0xd5c   :  { %v2313_v29 = vmul.f32 %v4495_v15, %v2307_v6  ;;  %5139 = vmatpush3.msra.mxu0 %v2490_v18  ;;  %v2482_v6 = vld [vmem:[%s7045_s3 + $0x38] sm:$0xff]  ;;  %v2373_v18 = vpop.permute.xlu1 %2372 }
 0xd5d   :  { %v5477_v28 = vpop.eup %5476 }
 0xd5e   :  { %v2306_v16 = vmul.f32 %v5477_v28, %v2290_v1  ;;  %v2319_v31 = vadd.f32 %v4496_v30, %v2313_v29  ;;  %v2489_v1 = vld [vmem:[%s7045_s3 + $0x70] sm:$0xff]  ;;  %v2480_v28 = vld [vmem:[%s7045_s3 + $0x28] sm:$0xff]  ;;  %v2478_v29 = vld [vmem:[%s7045_s3 + $0x18] sm:$0xff] }
 0xd5f   :  { %5140 = vmatprep.subr.mxu0 %v2489_v1 }
 0xd60   :  { %v2312_v34 = vmul.f32 %v4495_v15, %v2306_v16  ;;  %5141 = vmatpush3.msra.mxu0 %v2489_v1  ;;  %v2481_v15 = vld [vmem:[%s7045_s3 + $0x30] sm:$0xff]  ;;  %v2479_v16 = vld [vmem:[%s7045_s3 + $0x20] sm:$0xff]  ;;  %v2371_v1 = vpop.permute.xlu0 %2370 }
 0xd61   :  { %5142 = vmatprep.subr.mxu0 %v2488_v63 }
 0xd62   :  { %v2318_v33 = vadd.f32 %v4496_v30, %v2312_v34  ;;  %5143 = vmatpush3.msra.mxu0 %v2488_v63  ;;  %v2477_v30 = vld [vmem:[%s7045_s3 + $0x10] sm:$0xff]  ;;  %v2476_v34 = vld [vmem:[%s7045_s3 + $0x8] sm:$0xff]  ;;  %v2374_v63 = vsel %vm7160_vm6, %v2371_v1, %v2373_v18  ;;  %vm7171_vm6 = vmmov %vm7154_vm0 }
 0xd63   :  { %5144 = vmatprep.subr.mxu0 %v2487_v5 }
 0xd64   :  { %5135 = vmatprep.mubr.msk.f32.mxu1 %vm7158_vm1, %v2318_v33  ;;  %5145 = vmatpush3.msra.mxu0 %v2487_v5  ;;  %v2475_v33 = vld [vmem:[%s7045_s3] sm:$0xff]  ;;  %vm7169_vm1 = vmmov %vm7154_vm0 }
 0xd65   :  { %5136 = vmatmul.mubr.msk.f32.vlgmr.msra.gmra.mxu1 %vm7159_vm13, %v2319_v31  ;;  %5146 = vmatprep.subr.mxu0 %v2486_v7  ;;  %v4499_v31 = vld [vmem:[%s7046_s4 + $0x3] ss:$0 sm:$0xff]  ;;  %vm7170_vm13 = vmmov %vm7154_vm0 }
 0xd66   :  { %5147 = vmatpush3.msra.mxu0 %v2486_v7  ;;  %2497 = vrot.lane.b32.xlu0 %v4499_v31, %s5546_s20 }
 0xd67   :  { %5148 = vmatprep.subr.mxu0 %v2485_v14 }
 0xd68   :  { %5149 = vmatpush3.msra.mxu0 %v2485_v14 }
 0xd69   :  { %5150 = vmatprep.subr.mxu0 %v2484_v46 }
 0xd6a   :  { %5151 = vmatpush3.msra.mxu0 %v2484_v46 }
 0xd6b   :  { %5152 = vmatprep.subr.mxu0 %v2483_v9 }
 0xd6c   :  { %5153 = vmatpush3.msra.mxu0 %v2483_v9 }
 0xd6d   :  { %5154 = vmatprep.subr.mxu0 %v2482_v6 }
 0xd6e   :  { %5155 = vmatpush3.msra.mxu0 %v2482_v6 }
 0xd6f   :  { %5156 = vmatprep.subr.mxu0 %v2481_v15 }
 0xd70   :  { %5157 = vmatpush3.msra.mxu0 %v2481_v15 }
 0xd71   :  { %5158 = vmatprep.subr.mxu0 %v2480_v28 }
 0xd72   :  { %5159 = vmatpush3.msra.mxu0 %v2480_v28 }
 0xd73   :  { %5160 = vmatprep.subr.mxu0 %v2479_v16 }
 0xd74   :  { %5161 = vmatpush3.msra.mxu0 %v2479_v16 }
 0xd75   :  { %5162 = vmatprep.subr.mxu0 %v2478_v29 }
 0xd76   :  { %5163 = vmatpush3.msra.mxu0 %v2478_v29 }
 0xd77   :  { %5164 = vmatprep.subr.mxu0 %v2477_v30 }
 0xd78   :  { %5165 = vmatpush3.msra.mxu0 %v2477_v30 }
 0xd79   :  { %5166 = vmatprep.subr.mxu0 %v2476_v34 }
 0xd7a   :  { %5167 = vmatpush3.msra.mxu0 %v2476_v34 }
 0xd7b   :  { %5168 = vmatprep.subr.mxu0 %v2475_v33 }
 0xd7c   :  { %5169 = vmatpush3.msra.mxu0 %v2475_v33 }
 0xe25   :  { %v5137_v5 = vpop.f32.mrf.mxu1 }
 0xe26   :  { %v2454_v7 = vadd.f32 %v5137_v5, %v2374_v63 }
 0xe27   :  { %v2448_v14 = vpop.f32.mrf.mxu1 }
 0xe28   :  { %v2460_v46 = vmul.f32 %v2454_v7, %v2454_v7  ;;  %v2449_v9 = vadd.f32 %v2448_v14, %v2374_v63  ;;  %v2458_v5 = vmul.f32 0.5, %v2454_v7  ;;  %v2498_v63 = vpop.permute.xlu0 %2497 }
 0xe2a   :  { %v2462_v6 = vmul.f32 %v2460_v46, %v2454_v7  ;;  %v2459_v15 = vmul.f32 %v2449_v9, %v2449_v9  ;;  %v2457_v18 = vmul.f32 0.5, %v2449_v9 }
 0xe2c   :  { %v2464_v28 = vmul.f32 0.044715, %v2462_v6  ;;  %v2461_v16 = vmul.f32 %v2459_v15, %v2449_v9 }
 0xe2e   :  { %v2466_v29 = vadd.f32 %v2464_v28, %v2454_v7  ;;  %v2463_v30 = vmul.f32 0.044715, %v2461_v16 }
 0xe30   :  { %v2468_v34 = vmul.f32 0.7978846, %v2466_v29  ;;  %v2465_v33 = vadd.f32 %v2463_v30, %v2449_v9 }
 0xe32   :  { %5478 = vtanh.f32 %v2468_v34  ;;  %v2467_v10 = vmul.f32 0.7978846, %v2465_v33  ;;  %v6462_v33 = vld [vmem:[%s7044_s2 + $0xe0] sm:$0xff] }
 0xe33   :  { %5173 = vmatprep.subr.mxu1 %v6462_v33 }
 0xe34   :  { %5480 = vtanh.f32 %v2467_v10  ;;  %5174 = vmatpush3.msra.mxu1 %v6462_v33 }
 0xe3f   :  { %v5479_v31 = vpop.eup %5478 }
 0xe40   :  { %v2472_v21 = vadd.f32 1.0, %v5479_v31  ;;  %v6467_v31 = vld [vmem:[%s7044_s2 + $0xc0] sm:$0xff] }
 0xe41   :  { %v5481_v61 = vpop.eup %5480  ;;  %5175 = vmatprep.subr.mxu1 %v6467_v31 }
 0xe42   :  { %v2471_v1 = vadd.f32 1.0, %v5481_v61  ;;  %v2474_v11 = vmul.f32 %v2472_v21, %v2458_v5  ;;  %5176 = vmatpush3.msra.mxu1 %v6467_v31 }
 0xe44   :  { %v2473_v54 = vmul.f32 %v2471_v1, %v2457_v18  ;;  %v6474_v18 = vld [vmem:[%s7044_s2 + $0xa0] sm:$0xff] }
 0xe45   :  { %5177 = vmatprep.subr.mxu1 %v6474_v18  ;;  %v6483_v1 = vld [vmem:[%s7044_s2 + $0x80] sm:$0xff] }
 0xe46   :  { %5170 = vmatprep.mubr.f32.mxu0 %v2473_v54  ;;  %5178 = vmatpush3.msra.mxu1 %v6474_v18 }
 0xe47   :  { %5171 = vmatmul.mubr.f32.vlgmr.msra.gmra.mxu0 %v2474_v11  ;;  %5179 = vmatprep.subr.mxu1 %v6483_v1 }
 0xe48   :  { %5180 = vmatpush3.msra.mxu1 %v6483_v1 }
 0xf07   :  { %v5172_v14 = vpop.f32.mrf.mxu0 }
 0xf08   :  { %v2572_v46 = vadd.f32 %v5172_v14, %v2498_v63 }
 0xf09   :  { %v2566_v6 = vpop.f32.mrf.mxu0 }
 0xf0a   :  { %v6446_v15 = vadd.f32 %v2572_v46, %v6334_v38  ;;  %v2567_v28 = vadd.f32 %v2566_v6, %v2498_v63 }
 0xf0c   :  { %v6449_v10 = vadd.f32 %v2567_v28, %v6337_v59  ;;  %v2583_v9 = vsel %vm7161_vm11, %v6446_v15, 0.0  ;;  %vm7172_vm11 = vmmov %vm7154_vm0 }
 0xf0d   :  { %2584 = vadd.xlane.f32.xlu0 %v2583_v9 }
 0xf0e   :  { %v2580_v21 = vsel %vm7162_vm3, %v6449_v10, 0.0  ;;  %vm7173_vm3 = vmmov %vm7154_vm0 }
 0xf0f   :  { %2581 = vadd.xlane.f32.xlu1 %v2580_v21  ;;  %v4502_v21 = vld [vmem:[%s7047_s5 + $0x8] ss:$0 sm:$0xff] }
 0xf96   :  { %v2585_v11 = vpop.xlane.xlu0 %2584 }
 0xf97   :  { %v2587_v54 = vmul.f32 0.03125, %v2585_v11 }
 0xf98   :  { %v2582_v61 = vpop.xlane.xlu1 %2581 }
 0xf99   :  { %v2586_v7 = vmul.f32 0.03125, %v2582_v61  ;;  %v2589_v16 = vsub.f32 %v6446_v15, %v2587_v54  ;;  %v4503_v54 = vld [vmem:[%s7047_s5 + $0x9] ss:$0 sm:$0xff] }
 0xf9b   :  { %v2588_v38 = vsub.f32 %v6449_v10, %v2586_v7  ;;  %v2591_v30 = vmul.f32 %v2589_v16, %v2589_v16 }
 0xf9d   :  { %v2590_v29 = vmul.f32 %v2588_v38, %v2588_v38  ;;  %v2595_v34 = vsel %vm7164_vm10, %v2591_v30, 0.0  ;;  %vm7175_vm10 = vmmov %vm7154_vm0 }
 0xf9f   :  { %v2592_v59 = vsel %vm7163_vm7, %v2590_v29, 0.0  ;;  %vm7174_vm7 = vmmov %vm7154_vm0 }
 0xfa0   :  { %2593 = vadd.xlane.f32.xlu0 %v2592_v59 }
 0xfa4   :  { %2596 = vadd.xlane.f32.xlu0 %v2595_v34 }
0x1029   :  { %v2594_v5 = vpop.xlane.xlu0 %2593 }
0x102a   :  { %v2598_v63 = vmul.f32 0.03125, %v2594_v5  ;;  %v6498_v5 = vld [vmem:[%s7046_s4 + $0x4] ss:$0 sm:$0xff] }
0x102c   :  { %v2600_v14 = vadd.f32 1e-05, %v2598_v63 }
0x102d   :  { %v2597_v46 = vpop.xlane.xlu0 %2596 }
0x102e   :  { %5482 = vrsqrt.f32 %v2600_v14  ;;  %v2599_v6 = vmul.f32 0.03125, %v2597_v46 }
0x1030   :  { %v2601_v28 = vadd.f32 1e-05, %v2599_v6 }
0x1032   :  { %5484 = vrsqrt.f32 %v2601_v28 }
0x103b   :  { %v5483_v9 = vpop.eup %5482 }
0x103c   :  { %v2604_v11 = vmul.f32 %v5483_v9, %v2588_v38 }
0x103e   :  { %v2610_v61 = vmul.f32 %v4502_v21, %v2604_v11 }
0x103f   :  { %v5485_v7 = vpop.eup %5484 }
0x1040   :  { %v2605_v29 = vmul.f32 %v5485_v7, %v2589_v16  ;;  %v2616_v59 = vadd.f32 %v4503_v54, %v2610_v61  ;;  %v7182_v7 = vmov 1.0  }
0x1042   :  { %v2611_v30 = vmul.f32 %v4502_v21, %v2605_v29  ;;  %5181 = vmatprep.mubr.msk.f32.mxu1 %vm7165_vm4, %v2616_v59  ;;  %vm7176_vm4 = vmmov %vm7154_vm0 }
0x1044   :  { %v2617_v34 = vadd.f32 %v4503_v54, %v2611_v30 }
0x1046   :  { %5182 = vmatmul.mubr.msk.f32.vlgmr.msra.gmra.mxu1 %vm7154_vm0, %v2617_v34 }
0x1106   :  { %v5183_v38 = vpop.f32.mrf.mxu1 }
0x1107   :  { %v6501_v63 = vadd.f32 %v5183_v38, %v6498_v5 }
0x1108   :  { %v2703_v14 = vpop.f32.mrf.mxu1 }
0x1109   :  { %v6504_v46 = vadd.f32 %v6498_v5, %v2703_v14  ;;  %v2719_v16 = vmul.f32 %v6501_v63, %v5718_v47  ;;  %v2717_v28 = vmul.f32 %v6501_v63, %v5711_v45  ;;  %v2715_v45 = vmul.f32 %v6501_v63, %v5735_v55 }
0x110b   :  { %2750 = vrot.lane.b32.xlu1 %v2719_v16, %s5545_s19  ;;  %5200 = vmatprep.mubr.msk.f32.mxu1 %vm7166_vm15, %v6504_v46  ;;  %v2718_v6 = vmul.f32 %v6504_v46, %v5709_v44  ;;  %v2714_v9 = vmul.f32 %v6504_v46, %v5740_v57  ;;  %v2716_v47 = vmul.f32 %v6504_v46, %v5723_v50  ;;  %vm7177_vm15 = vmmov %vm7154_vm0 }
0x110c   :  { %v2712_v44 = vmul.f32 %v6504_v46, %v5753_v62  ;;  %v2713_v57 = vmul.f32 %v6501_v63, %v5748_v60  ;;  %v2726_v50 = vmul.f32 %v6504_v46, %v5857_v43  ;;  %v2725_v16 = vmul.f32 %v6501_v63, %v5877_v58 }
0x110d   :  { %2748 = vrot.lane.b32.xlu0 %v2718_v6, %s5545_s19  ;;  %v2727_v6 = vmul.f32 %v6501_v63, %v5861_v51  ;;  %v2722_v51 = vmul.f32 %v6504_v46, %v5872_v56  ;;  %v2720_v58 = vmul.f32 %v6504_v46, %v5901_v2 }
0x110f   :  { %2746 = vrot.lane.b32.xlu1 %v2717_v28, %s5545_s19  ;;  %v2721_v28 = vmul.f32 %v6501_v63, %v5936_v52 }
0x1111   :  { %2740 = vrot.lane.b32.xlu0 %v2714_v9, %s5545_s19 }
0x1113   :  { %2744 = vrot.lane.b32.xlu1 %v2716_v47, %s5545_s19 }
0x1115   :  { %2736 = vrot.lane.b32.xlu0 %v2712_v44, %s5545_s19 }
0x1117   :  { %2742 = vrot.lane.b32.xlu1 %v2715_v45, %s5545_s19 }
0x111b   :  { %2738 = vrot.lane.b32.xlu1 %v2713_v57, %s5545_s19 }
0x111f   :  { %2881 = vrot.lane.b32.xlu1 %v2726_v50, %s5546_s20 }
0x117d   :  { %v2751_v21 = vpop.permute.xlu1 %2750 }
0x117e   :  { %5184 = vmatprep.subr.msk.mxu1 %vm7167_vm2, %v2751_v21  ;;  %vm7178_vm2 = vmmov %vm7154_vm0 }
0x117f   :  { %5185 = vmatpush3.xpose.msk.msra.mxu1 %vm7168_vm14, %v2751_v21  ;;  %v2749_v62 = vpop.permute.xlu0 %2748  ;;  %vm7179_vm14 = vmmov %vm7154_vm0 }
0x1180   :  { %5186 = vmatprep.subr.msk.mxu1 %vm7169_vm1, %v2749_v62  ;;  %vm7180_vm1 = vmmov %vm7154_vm0 }
0x1181   :  { %v2747_v55 = vpop.permute.xlu1 %2746 }
0x1183   :  { %5187 = vmatpush3.xpose.msk.msra.mxu1 %vm7170_vm13, %v2749_v62  ;;  %v2741_v11 = vpop.permute.xlu0 %2740  ;;  %vm7181_vm13 = vmmov %vm7154_vm0 }
0x1184   :  { %5188 = vmatprep.subr.msk.mxu1 %vm7171_vm6, %v2747_v55  ;;  %vm7183_vm6 = vmmov %vm7154_vm0 }
0x1185   :  { %v2745_v60 = vpop.permute.xlu1 %2744 }
0x1187   :  { %5189 = vmatpush3.xpose.msk.msra.mxu1 %vm7172_vm11, %v2747_v55  ;;  %v2737_v61 = vpop.permute.xlu0 %2736  ;;  %vm7184_vm11 = vcmp.lt.s32.totalorder %v5640_v19, 8  ;;  %v6643_v55 = vld [vmem:[%s7044_s2 + $0xe8] sm:$0xff] }
0x1188   :  { %5190 = vmatprep.subr.msk.mxu1 %vm7173_vm3, %v2745_v60  ;;  %vm7185_vm3 = vmmov %vm7184_vm11 }
0x1189   :  { %v2743_v43 = vpop.permute.xlu1 %2742 }
0x118b   :  { %5191 = vmatpush3.xpose.msk.msra.mxu1 %vm7174_vm7, %v2745_v60  ;;  %vm7186_vm7 = vmmov %vm7185_vm3 }
0x118c   :  { %5192 = vmatprep.subr.msk.mxu1 %vm7175_vm10, %v2743_v43  ;;  %vm7187_vm10 = vmmov %vm7185_vm3 }
0x118d   :  { %v2739_v54 = vpop.permute.xlu1 %2738 }
0x118f   :  { %5193 = vmatpush3.xpose.msk.msra.mxu1 %vm7176_vm4, %v2743_v43  ;;  %vm7188_vm4 = vcmask 523264  }
0x1190   :  { %5194 = vmatprep.subr.msk.mxu1 %vm7154_vm0, %v2741_v11  ;;  %vm7189_vm0 = vmmov %vm7188_vm4 }
0x1193   :  { %5195 = vmatpush3.xpose.msk.msra.mxu1 %vm7177_vm15, %v2741_v11  ;;  %vm7190_vm15 = vmmov %vm7189_vm0 }
0x1194   :  { %5196 = vmatprep.subr.msk.mxu1 %vm7178_vm2, %v2739_v54  ;;  %vm7191_vm2 = vmmov %vm7189_vm0 }
0x1197   :  { %5197 = vmatpush3.xpose.msk.msra.mxu1 %vm7179_vm14, %v2739_v54  ;;  %vm7192_vm14 = vmmov %vm7189_vm0 }
0x1198   :  { %5198 = vmatprep.subr.msk.mxu1 %vm7180_vm1, %v2737_v61  ;;  %vm7193_vm1 = vmmov %vm7189_vm0 }
0x119b   :  { %5199 = vmatpush3.xpose.msk.msra.mxu1 %vm7181_vm13, %v2737_v61  ;;  %vm7194_vm13 = vmmov %vm7183_vm6 }
0x119c   :  { %5222 = vmatprep.subr.msk.mxu1 %vm7137_vm9, %v7182_v7 }
0x119e   :  { %5201 = vmatmul.mubr.msk.f32.vlgmr.msra.gmra.mxu1 %vm7183_vm6, %v6501_v63 }
0x119f   :  { %5223 = vmatpush3.msk.msra.mxu1 %vm7137_vm9, %v7182_v7 }
0x11a0   :  { %5224 = vmatprep.subr.msk.mxu1 %vm7137_vm9, %v7182_v7 }
0x11a1   :  { %5225 = vmatpush3.msk.msra.mxu1 %vm7137_vm9, %v7182_v7 }
0x11a2   :  { %5226 = vmatprep.subr.msk.mxu1 %vm7138_vm5, %v7182_v7 }
0x11a3   :  { %5227 = vmatpush3.msk.msra.mxu1 %vm7138_vm5, %v7182_v7 }
0x11a4   :  { %5228 = vmatprep.subr.msk.mxu1 %vm7138_vm5, %v7182_v7 }
0x11a5   :  { %5229 = vmatpush3.msk.msra.mxu1 %vm7138_vm5, %v7182_v7 }
0x11a6   :  { %5230 = vmatprep.subr.msk.mxu1 %vm7139_vm8, %v7182_v7 }
0x11a7   :  { %5231 = vmatpush3.msk.msra.mxu1 %vm7139_vm8, %v7182_v7 }
0x11a8   :  { %5232 = vmatprep.subr.msk.mxu1 %vm7139_vm8, %v7182_v7 }
0x11a9   :  { %5233 = vmatpush3.msk.msra.mxu1 %vm7139_vm8, %v7182_v7 }
0x11aa   :  { %5234 = vmatprep.subr.msk.mxu1 %vm7184_vm11, %v7182_v7  ;;  %vm7196_vm11 = vmmov %vm7183_vm6 }
0x11ab   :  { %5235 = vmatpush3.msk.msra.mxu1 %vm7185_vm3, %v7182_v7  ;;  %vm7197_vm3 = vmmov %vm7183_vm6 }
0x11ac   :  { %5236 = vmatprep.subr.msk.mxu1 %vm7186_vm7, %v7182_v7  ;;  %vm7198_vm7 = vmmov 0  }
0x11ad   :  { %5237 = vmatpush3.msk.msra.mxu1 %vm7187_vm10, %v7182_v7  ;;  %vm7199_vm10 = vmmov %vm7197_vm3 }
0x125e   :  { %v5202_v29 = vpop.f32.mrf.mxu1 }
0x125f   :  { %v2846_v59 = vadd.f32 %v5202_v29, %v5848_v35  ;;  %v2723_v35 = vmul.f32 %v6501_v63, %v5907_v3 }
0x1260   :  { %v2840_v30 = vpop.f32.mrf.mxu1 }
0x1261   :  { %v2841_v34 = vadd.f32 %v2840_v30, %v5851_v37  ;;  %v2852_v38 = vsel %vm7188_vm4, %v2846_v59, -inf  ;;  %v2724_v37 = vmul.f32 %v6504_v46, %v5859_v48  ;;  %v2882_v48 = vpop.permute.xlu1 %2881  ;;  %vm7200_vm4 = vmmov %vm7197_vm3 }
0x1262   :  { %2853 = vmax.xlane.f32.xlu0 %v2852_v38  ;;  %v6659_v38 = vld [vmem:[%s7044_s2 + $0xa8] sm:$0xff] }
0x1263   :  { %v2849_v14 = vsel %vm7189_vm0, %v2841_v34, -inf  ;;  %vm7201_vm0 = vmmov %vm7197_vm3 }
0x1264   :  { %2850 = vmax.xlane.f32.xlu1 %v2849_v14  ;;  %v4536_v14 = vld [vmem:[%s7044_s2 + $0x88] sm:$0xff] }
0x1275   :  { %2879 = vrot.lane.b32.xlu1 %v2725_v16, %s5546_s20  ;;  %v7195_v16 = vmov 0.0  }
0x1278   :  { %2883 = vrot.lane.b32.xlu0 %v2727_v6, %s5546_s20 }
0x1279   :  { %2875 = vrot.lane.b32.xlu1 %v2723_v35, %s5546_s20 }
0x127c   :  { %2877 = vrot.lane.b32.xlu0 %v2724_v37, %s5546_s20 }
0x127d   :  { %2871 = vrot.lane.b32.xlu1 %v2721_v28, %s5546_s20 }
0x1280   :  { %2873 = vrot.lane.b32.xlu0 %v2722_v51, %s5546_s20 }
0x1281   :  { %3063 = vrot.lane.b32.xlu1 %v6462_v33, %s5544_s12 }
0x1284   :  { %2869 = vrot.lane.b32.xlu0 %v2720_v58, %s5546_s20  ;;  %v4541_v58 = vld [vmem:[%s7046_s4 + $0x5] ss:$0 sm:$0xff] }
0x1285   :  { %3059 = vrot.lane.b32.xlu1 %v6474_v18, %s5544_s12 }
0x1288   :  { %3061 = vrot.lane.b32.xlu0 %v6467_v31, %s5544_s12 }
0x1289   :  { %3069 = vrot.lane.b32.xlu1 %v6498_v5, %s5544_s12 }
0x128c   :  { %3057 = vrot.lane.b32.xlu0 %v6483_v1, %s5544_s12 }
0x12eb   :  { %v2854_v56 = vpop.xlane.xlu0 %2853 }
0x12ec   :  { %v2856_v3 = vsub.f32 %v2846_v59, %v2854_v56 }
0x12ed   :  { %v2851_v52 = vpop.xlane.xlu1 %2850 }
0x12ee   :  { %v2855_v33 = vsub.f32 %v2841_v34, %v2851_v52  ;;  %v2859_v2 = vmul.f32 1.442695, %v2856_v3  ;;  %v6652_v34 = vld [vmem:[%s7044_s2 + $0xc8] sm:$0xff] }
0x12ef   :  { %v2884_v63 = vpop.permute.xlu0 %2883 }
0x12f0   :  { %v2857_v46 = vmul.f32 1.442695, %v2855_v33  ;;  %5203 = vmatprep.subr.mxu0 %v2884_v63 }
0x12f1   :  { %5204 = vmatpush3.msra.mxu0 %v2884_v63  ;;  %v2880_v18 = vpop.permute.xlu1 %2879 }
0x12f2   :  { %5486 = vpow2.f32 %v2857_v46  ;;  %5205 = vmatprep.subr.mxu0 %v2882_v48 }
0x12f3   :  { %5488 = vpow2.f32 %v2859_v2  ;;  %5206 = vmatpush3.msra.mxu0 %v2882_v48  ;;  %v2878_v31 = vpop.permute.xlu0 %2877 }
0x12f4   :  { %5207 = vmatprep.subr.mxu0 %v2880_v18 }
0x12f5   :  { %5208 = vmatpush3.msra.mxu0 %v2880_v18  ;;  %v2876_v5 = vpop.permute.xlu1 %2875 }
0x12f6   :  { %5209 = vmatprep.subr.mxu0 %v2878_v31 }
0x12f7   :  { %v2874_v1 = vpop.permute.xlu0 %2873  ;;  %5210 = vmatpush3.msra.mxu0 %v2878_v31 }
0x12f8   :  { %5211 = vmatprep.subr.mxu0 %v2876_v5 }
0x12f9   :  { %5212 = vmatpush3.msra.mxu0 %v2876_v5  ;;  %v2872_v9 = vpop.permute.xlu1 %2871 }
0x12fa   :  { %5213 = vmatprep.subr.mxu0 %v2874_v1 }
0x12fb   :  { %5214 = vmatpush3.msra.mxu0 %v2874_v1  ;;  %v2870_v47 = vpop.permute.xlu0 %2869 }
0x12fc   :  { %5215 = vmatprep.subr.mxu0 %v2872_v9 }
0x12fd   :  { %5216 = vmatpush3.msra.mxu0 %v2872_v9  ;;  %v3064_v57 = vpop.permute.xlu1 %3063 }
0x12fe   :  { %5217 = vmatprep.subr.mxu0 %v2870_v47 }
0x12ff   :  { %v5487_v44 = vpop.eup %5486  ;;  %5218 = vmatpush3.msra.mxu0 %v2870_v47  ;;  %v3062_v50 = vpop.permute.xlu0 %3061 }
0x1300   :  { %v5489_v45 = vpop.eup %5488  ;;  %5219 = vmatprep.mubr.msk.f32.mxu0 %vm7190_vm15, %v5487_v44  ;;  %5238 = vmatprep.mubr.msk.f32.mxu1 %vm7191_vm2, %v5487_v44  ;;  %vm7202_vm15 = vmmov %vm7201_vm0 }
0x1301   :  { %5220 = vmatmul.mubr.msk.f32.vlgmr.msra.gmra.mxu0 %vm7192_vm14, %v5489_v45  ;;  %5239 = vmatmul.mubr.msk.f32.vlgmr.msra.gmra.mxu1 %vm7193_vm1, %v5489_v45  ;;  %v3060_v21 = vpop.permute.xlu1 %3059  ;;  %vm7203_vm2 = vmmov %vm7201_vm0 }
0x1302   :  { %5241 = vmatprep.subr.mxu0 %v3064_v57  ;;  %vm7204_vm14 = vmmov %vm7201_vm0 }
0x1303   :  { %5242 = vmatpush3.msra.mxu0 %v3064_v57  ;;  %v3058_v62 = vpop.permute.xlu0 %3057  ;;  %vm7205_vm1 = vmmov %vm7201_vm0 }
0x1304   :  { %5243 = vmatprep.subr.mxu0 %v3062_v50 }
0x1305   :  { %5244 = vmatpush3.msra.mxu0 %v3062_v50  ;;  %v3070_v35 = vpop.permute.xlu1 %3069 }
0x1306   :  { %5245 = vmatprep.subr.mxu0 %v3060_v21 }
0x1307   :  { %5246 = vmatpush3.msra.mxu0 %v3060_v21 }
0x1308   :  { %5247 = vmatprep.subr.mxu0 %v3058_v62 }
0x1309   :  { %5248 = vmatpush3.msra.mxu0 %v3058_v62 }
0x130a   :  { %5252 = vmatprep.subr.mxu0 %v6643_v55 }
0x13c1   :  { %v5240_v60 = vpop.f32.mrf.mxu1  ;;  %v5221_v11 = vpop.f32.mrf.mxu0 }
0x13c2   :  { %5490 = vrcp.f32 %v5240_v60  ;;  %v5518_v60 = vld [vmem:[%s7042_s0] sm:$0xff] }
0x13c3   :  { %v3040_v43 = vpop.f32.mrf.mxu1  ;;  %v2965_v29 = vpop.f32.mrf.mxu0 }
0x13c4   :  { %5492 = vrcp.f32 %v3040_v43  ;;  %v5519_v43 = vld [vmem:[%s7042_s0 + $0x8] sm:$0xff] }
0x13cf   :  { %v5491_v54 = vpop.eup %5490 }
0x13d0   :  { %v3052_v30 = vmul.f32 %v5491_v54, %v5221_v11  ;;  %v5520_v11 = vld [vmem:[%s7042_s0 + $0x10] sm:$0xff] }
0x13d1   :  { %v5493_v61 = vpop.eup %5492 }
0x13d2   :  { %v3050_v59 = vmul.f32 %v5493_v61, %v2965_v29 }
0x13d4   :  { %5249 = vmatprep.mubr.msk.f32.mxu0 %vm7194_vm13, %v3050_v59  ;;  %vm7206_vm13 = vmmov %vm7201_vm0 }
0x13d5   :  { %5250 = vmatmul.mubr.msk.f32.vlgmr.msra.gmra.mxu0 %vm7183_vm6, %v3052_v30  ;;  %vm7207_vm6 = vmmov %vm7201_vm0 }
0x13d6   :  { %5253 = vmatpush3.msra.mxu0 %v6643_v55 }
0x13d7   :  { %5254 = vmatprep.subr.mxu0 %v6652_v34 }
0x13d8   :  { %5255 = vmatpush3.msra.mxu0 %v6652_v34 }
0x13d9   :  { %5256 = vmatprep.subr.mxu0 %v6659_v38 }
0x13da   :  { %5257 = vmatpush3.msra.mxu0 %v6659_v38 }
0x13db   :  { %5258 = vmatprep.subr.mxu0 %v4536_v14 }
0x13dc   :  { %5259 = vmatpush3.msra.mxu0 %v4536_v14 }
0x13dd   :  { %5274 = vmatprep.subr.mxu0 %v7195_v16 }
0x1495   :  { %v5251_v6 = vpop.f32.mrf.mxu0 }
0x1496   :  { %v3150_v51 = vadd.f32 %v5251_v6, %v3070_v35 }
0x1497   :  { %v3144_v37 = vpop.f32.mrf.mxu0 }
0x1498   :  { %v3145_v28 = vadd.f32 %v3144_v37, %v3070_v35  ;;  %v4546_v35 = vld [vmem:[%s7047_s5 + $0xa] ss:$0 sm:$0xff] }
0x149a   :  { %5260 = vmatprep.mubr.msk.f32.mxu0 %vm7196_vm11, %v3145_v28  ;;  %vm7208_vm11 = vmmov %vm7201_vm0 }
0x149b   :  { %5261 = vmatmul.mubr.msk.f32.vlgmr.msra.gmra.mxu0 %vm7197_vm3, %v3150_v51  ;;  %vm7209_vm3 = vmmov %vm7201_vm0 }
0x149c   :  { %5282 = vmatprep.mubr.msk.f32.mxu0 %vm7198_vm7, %v7195_v16 }
0x155b   :  { %v5262_v48 = vpop.f32.mrf.mxu0 }
0x155c   :  { %v3242_v56 = vadd.f32 %v5262_v48, %v4541_v58  ;;  %v4547_v48 = vld [vmem:[%s7047_s5 + $0xb] ss:$0 sm:$0xff] }
0x155d   :  { %v3236_v3 = vpop.f32.mrf.mxu0 }
0x155e   :  { %v6675_v52 = vadd.f32 %v3242_v56, %v6446_v15  ;;  %v3237_v33 = vadd.f32 %v4541_v58, %v3236_v3 }
0x1560   :  { %v6678_v2 = vadd.f32 %v3237_v33, %v6449_v10  ;;  %v3252_v63 = vsel %vm7199_vm10, %v6675_v52, 0.0  ;;  %vm7211_vm10 = vmmov %vm7201_vm0 }
0x1561   :  { %3253 = vadd.xlane.f32.xlu1 %v3252_v63 }
0x1562   :  { %v3249_v46 = vsel %vm7200_vm4, %v6678_v2, 0.0  ;;  %vm7212_vm4 = vmmov %vm7201_vm0 }
0x1563   :  { %3250 = vadd.xlane.f32.xlu0 %v3249_v46 }
0x1572   :  { %3391 = vrot.lane.b32.xlu1 %v6652_v34, %s5546_s20 }
0x1576   :  { %3387 = vrot.lane.b32.xlu1 %v4536_v14, %s5546_s20 }
0x1579   :  { %3393 = vrot.lane.b32.xlu0 %v6643_v55, %s5546_s20 }
0x157d   :  { %3389 = vrot.lane.b32.xlu0 %v6659_v38, %s5546_s20 }
0x15ea   :  { %v3254_v15 = vpop.xlane.xlu1 %3253 }
0x15eb   :  { %v3256_v10 = vmul.f32 0.03125, %v3254_v15 }
0x15ec   :  { %v3251_v18 = vpop.xlane.xlu0 %3250 }
0x15ed   :  { %v3258_v31 = vsub.f32 %v6675_v52, %v3256_v10  ;;  %v3255_v5 = vmul.f32 0.03125, %v3251_v18 }
0x15ee   :  { %v3392_v1 = vpop.permute.xlu1 %3391 }
0x15ef   :  { %v3257_v9 = vsub.f32 %v6678_v2, %v3255_v5  ;;  %v3260_v47 = vmul.f32 %v3258_v31, %v3258_v31 }
0x15f0   :  { %v3394_v44 = vpop.permute.xlu0 %3393 }
0x15f1   :  { %5275 = vmatpush3.msra.mxu0 %v3394_v44  ;;  %v3264_v45 = vsel %vm7201_vm0, %v3260_v47, 0.0  ;;  %v3259_v57 = vmul.f32 %v3257_v9, %v3257_v9 }
0x15f2   :  { %3265 = vadd.xlane.f32.xlu1 %v3264_v45  ;;  %5276 = vmatprep.subr.mxu0 %v7195_v16  ;;  %v3388_v62 = vpop.permute.xlu1 %3387 }
0x15f3   :  { %5277 = vmatpush3.msra.mxu0 %v3392_v1  ;;  %v3261_v50 = vsel %vm7202_vm15, %v3259_v57, 0.0  ;;  %vm7213_vm15 = vmmov %vm7201_vm0 }
0x15f4   :  { %3262 = vadd.xlane.f32.xlu0 %v3261_v50  ;;  %5278 = vmatprep.subr.mxu0 %v7195_v16  ;;  %v3390_v21 = vpop.permute.xlu0 %3389 }
0x15f5   :  { %5279 = vmatpush3.msra.mxu0 %v3390_v21 }
0x15f6   :  { %5280 = vmatprep.subr.mxu0 %v7195_v16 }
0x15f7   :  { %5281 = vmatpush3.msra.mxu0 %v3388_v62 }
0x15f8   :  { %5283 = vmatmul.mubr.msk.f32.vlgmr.msra.gmra.mxu0 %vm7203_vm2, %v5518_v60  ;;  %vm7214_vm2 = vmmov %vm7201_vm0 }
0x15f9   :  { %5285 = vmatprep.mubr.msk.f32.mxu0 %vm7198_vm7, %v7195_v16 }
0x15fc   :  { %5286 = vmatmul.mubr.msk.f32.gmra.mxu0 %vm7204_vm14, %v5519_v43  ;;  %vm7215_vm14 = vmmov %vm7201_vm0 }
0x15fd   :  { %5288 = vmatprep.mubr.msk.f32.mxu0 %vm7198_vm7, %v7195_v16  ;;  %vm7210_vm7 = vmmov %vm7201_vm0 }
0x1600   :  { %5289 = vmatmul.mubr.msk.f32.gmra.mxu0 %vm7205_vm1, %v5520_v11  ;;  %vm7216_vm1 = vmmov %vm7201_vm0 }
0x1603   :  { %3295 = vrot.lane.b32.xlu1 %v6652_v34, %s5545_s19 }
0x1607   :  { %3291 = vrot.lane.b32.xlu1 %v4536_v14, %s5545_s19 }
0x160a   :  { %3297 = vrot.lane.b32.xlu0 %v6643_v55, %s5545_s19 }
0x160b   :  { %3303 = vrot.lane.b32.xlu1 %v4541_v58, %s5545_s19 }
0x160e   :  { %3293 = vrot.lane.b32.xlu0 %v6659_v38, %s5545_s19 }
0x1612   :  { %3399 = vrot.lane.b32.xlu0 %v4541_v58, %s5546_s20 }
0x167b   :  { %v3266_v54 = vpop.xlane.xlu1 %3265 }
0x167c   :  { %v3268_v61 = vmul.f32 0.03125, %v3266_v54 }
0x167d   :  { %v3263_v29 = vpop.xlane.xlu0 %3262 }
0x167e   :  { %v3270_v59 = vadd.f32 1e-05, %v3268_v61  ;;  %v3267_v30 = vmul.f32 0.03125, %v3263_v29 }
0x167f   :  { %v3296_v16 = vpop.permute.xlu1 %3295 }
0x1680   :  { %5494 = vrsqrt.f32 %v3270_v59  ;;  %v3269_v34 = vadd.f32 1e-05, %v3267_v30 }
0x1681   :  { %v3298_v6 = vpop.permute.xlu0 %3297 }
0x1682   :  { %5496 = vrsqrt.f32 %v3269_v34  ;;  %5263 = vmatprep.subr.mxu1 %v3298_v6 }
0x1683   :  { %5264 = vmatpush3.msra.mxu1 %v3298_v6  ;;  %v3292_v14 = vpop.permute.xlu1 %3291 }
0x1684   :  { %5265 = vmatprep.subr.mxu1 %v3296_v16 }
0x1685   :  { %5266 = vmatpush3.msra.mxu1 %v3296_v16  ;;  %v3294_v55 = vpop.permute.xlu0 %3293 }
0x1686   :  { %5267 = vmatprep.subr.mxu1 %v3294_v55 }
0x1687   :  { %5268 = vmatpush3.msra.mxu1 %v3294_v55  ;;  %v3304_v54 = vpop.permute.xlu1 %3303 }
0x1688   :  { %5269 = vmatprep.subr.mxu1 %v3292_v14 }
0x1689   :  { %5270 = vmatpush3.msra.mxu1 %v3292_v14  ;;  %v3400_v15 = vpop.permute.xlu0 %3399 }
0x168d   :  { %v5495_v38 = vpop.eup %5494 }
0x168e   :  { %v3274_v37 = vmul.f32 %v5495_v38, %v3258_v31 }
0x168f   :  { %v5497_v28 = vpop.eup %5496 }
0x1690   :  { %v3273_v51 = vmul.f32 %v5497_v28, %v3257_v9  ;;  %v3280_v58 = vmul.f32 %v4546_v35, %v3274_v37 }
0x1692   :  { %v3279_v56 = vmul.f32 %v4546_v35, %v3273_v51  ;;  %v3286_v33 = vadd.f32 %v4547_v48, %v3280_v58 }
0x1694   :  { %v3285_v3 = vadd.f32 %v4547_v48, %v3279_v56 }
0x1696   :  { %5271 = vmatprep.mubr.msk.f32.mxu1 %vm7206_vm13, %v3285_v3  ;;  %vm7217_vm13 = vmmov %vm7201_vm0 }
0x1697   :  { %5272 = vmatmul.mubr.msk.f32.vlgmr.msra.gmra.mxu1 %vm7207_vm6, %v3286_v33  ;;  %vm7218_vm6 = vmmov %vm7201_vm0 }
0x16b8   :  { %v3468_v63 = vpop.f32.mrf.mxu0 }
0x16b9   :  { %v6736_v44 = vadd.f32 %v3468_v63, %v3400_v15 }
0x16ba   :  { %v5284_v46 = vpop.f32.mrf.mxu0 }
0x16bb   :  { %v3500_v62 = vmul.f32 %v6736_v44, %v6103_v13  ;;  %v3494_v63 = vmul.f32 %v6736_v44, %v6176_v49 }
0x16bc   :  { %v3473_v10 = vpop.f32.mrf.mxu0 }
0x16bd   :  { %v6731_v18 = vadd.f32 %v3473_v10, %v3400_v15 }
0x16be   :  { %v5287_v31 = vpop.f32.mrf.mxu0 }
0x16bf   :  { %v3504_v5 = vmul.f32 %v6731_v18, %v6082_v42  ;;  %v3492_v21 = vmul.f32 %v5657_v22, %v6731_v18  ;;  %v3503_v42 = vmul.f32 %v6736_v44, %v6084_v36  ;;  %v3498_v36 = vmul.f32 %v6731_v18, %v6121_v0 }
0x16c0   :  { %v3478_v1 = vpop.f32.mrf.mxu0  ;;  %v3497_v0 = vmul.f32 %v6736_v44, %v6127_v32  ;;  %v3486_v32 = vmul.f32 %v5681_v26, %v6731_v18  ;;  %v3483_v11 = vmul.f32 %v5691_v27, %v6731_v18  ;;  %v3495_v46 = vmul.f32 %v6731_v18, %v6174_v8 }
0x16c1   :  { %v3479_v9 = vadd.f32 %v3478_v1, %v3400_v15  ;;  %3667 = vrot.lane.b32.xlu1 %v3504_v5, %s5545_s19 }
0x16c2   :  { %v5290_v47 = vpop.f32.mrf.mxu0 }
0x16c3   :  { %v3505_v45 = vmul.f32 %v3479_v9, %v6080_v41  ;;  %v3502_v57 = vmul.f32 %v3479_v9, %v6088_v4  ;;  %v3493_v50 = vmul.f32 %v5657_v22, %v3479_v9  ;;  %v3491_v41 = vmul.f32 %v5657_v22, %v6736_v44 }
0x16c4   :  { %v3501_v4 = vmul.f32 %v6731_v18, %v6092_v39  ;;  %v3490_v13 = vmul.f32 %v5676_v25, %v3479_v9  ;;  %v3499_v22 = vmul.f32 %v3479_v9, %v6108_v17  ;;  %v3496_v60 = vmul.f32 %v3479_v9, %v6139_v53 }
0x16c5   :  { %3669 = vrot.lane.b32.xlu0 %v3505_v45, %s5545_s19  ;;  %3663 = vrot.lane.b32.xlu1 %v3502_v57, %s5545_s19  ;;  %v3489_v39 = vmul.f32 %v5676_v25, %v6731_v18  ;;  %v3488_v17 = vmul.f32 %v5676_v25, %v6736_v44  ;;  %v3487_v53 = vmul.f32 %v5681_v26, %v3479_v9 }
0x16c6   :  { %5291 = vmatprep.subr.msk.mxu1 %vm7208_vm11, %v3493_v50  ;;  %vm7219_vm11 = vmmov %vm7201_vm0  ;;  %v3485_v25 = vmul.f32 %v5681_v26, %v6736_v44  ;;  %v3484_v43 = vmul.f32 %v5691_v27, %v3479_v9  ;;  %v3482_v26 = vmul.f32 %v5691_v27, %v6736_v44 }
0x16c7   :  { %5292 = vmatpush3.xpose.msk.msra.mxu1 %vm7209_vm3, %v3493_v50  ;;  %vm7220_vm3 = vmmov %vm7201_vm0 }
0x16c8   :  { %5293 = vmatprep.subr.msk.mxu1 %vm7210_vm7, %v3492_v21  ;;  %vm7221_vm7 = vmmov %vm7201_vm0 }
0x16c9   :  { %3665 = vrot.lane.b32.xlu0 %v3503_v42, %s5545_s19  ;;  %3659 = vrot.lane.b32.xlu1 %v3500_v62, %s5545_s19 }
0x16cb   :  { %5294 = vmatpush3.xpose.msk.msra.mxu1 %vm7211_vm10, %v3492_v21  ;;  %vm7222_vm10 = vmmov %vm7201_vm0 }
0x16cc   :  { %5295 = vmatprep.subr.msk.mxu1 %vm7212_vm4, %v3491_v41  ;;  %vm7223_vm4 = vmmov %vm7201_vm0 }
0x16cd   :  { %3661 = vrot.lane.b32.xlu0 %v3501_v4, %s5545_s19  ;;  %3655 = vrot.lane.b32.xlu1 %v3498_v36, %s5545_s19 }
0x16cf   :  { %5296 = vmatpush3.xpose.msk.msra.mxu1 %vm7201_vm0, %v3491_v41  ;;  %v4588_v41 = vld [vmem:[%s7046_s4 + $0x6] ss:$0 sm:$0xff] }
0x16d0   :  { %5297 = vmatprep.subr.msk.mxu1 %vm7213_vm15, %v3490_v13  ;;  %vm7224_vm15 = vmmov %vm7201_vm0 }
0x16d1   :  { %3657 = vrot.lane.b32.xlu0 %v3499_v22, %s5545_s19  ;;  %3651 = vrot.lane.b32.xlu1 %v3496_v60, %s5545_s19 }
0x16d3   :  { %5298 = vmatpush3.xpose.msk.msra.mxu1 %vm7214_vm2, %v3490_v13  ;;  %vm7225_vm2 = vmmov %vm7201_vm0 }
0x16d4   :  { %5299 = vmatprep.subr.msk.mxu1 %vm7215_vm14, %v3489_v39  ;;  %vm7226_vm14 = vmmov %vm7201_vm0 }
0x16d5   :  { %3653 = vrot.lane.b32.xlu0 %v3497_v0, %s5545_s19 }
0x16d7   :  { %5300 = vmatpush3.xpose.msk.msra.mxu1 %vm7216_vm1, %v3489_v39  ;;  %vm7227_vm1 = vmmov %vm7201_vm0 }
0x16d8   :  { %5301 = vmatprep.subr.msk.mxu1 %vm7217_vm13, %v3488_v17  ;;  %vm7228_vm13 = vmmov %vm7201_vm0 }
0x16db   :  { %5302 = vmatpush3.xpose.msk.msra.mxu1 %vm7218_vm6, %v3488_v17  ;;  %vm7229_vm6 = vmmov %vm7201_vm0 }
0x16dc   :  { %5303 = vmatprep.subr.msk.mxu1 %vm7219_vm11, %v3487_v53  ;;  %vm7230_vm11 = vmmov %vm7201_vm0 }
0x16df   :  { %5304 = vmatpush3.xpose.msk.msra.mxu1 %vm7220_vm3, %v3487_v53  ;;  %vm7231_vm3 = vmmov %vm7201_vm0 }
0x16e0   :  { %5305 = vmatprep.subr.msk.mxu1 %vm7221_vm7, %v3486_v32 }
0x16e3   :  { %5306 = vmatpush3.xpose.msk.msra.mxu1 %vm7222_vm10, %v3486_v32 }
0x16e4   :  { %5307 = vmatprep.subr.msk.mxu1 %vm7223_vm4, %v3485_v25 }
0x16e7   :  { %5308 = vmatpush3.xpose.msk.msra.mxu1 %vm7201_vm0, %v3485_v25 }
0x16e8   :  { %5309 = vmatprep.subr.msk.mxu1 %vm7224_vm15, %v3484_v43  ;;  %vm7239_vm15 = vmmov %vm7201_vm0 }
0x16eb   :  { %5310 = vmatpush3.xpose.msk.msra.mxu1 %vm7225_vm2, %v3484_v43  ;;  %vm7240_vm2 = vmmov %vm7201_vm0 }
0x16ec   :  { %5311 = vmatprep.subr.msk.mxu1 %vm7226_vm14, %v3483_v11  ;;  %vm7241_vm14 = vmmov %vm7201_vm0 }
0x16ef   :  { %5312 = vmatpush3.xpose.msk.msra.mxu1 %vm7227_vm1, %v3483_v11  ;;  %vm7242_vm1 = vmmov %vm7201_vm0 }
0x16f0   :  { %5313 = vmatprep.subr.msk.mxu1 %vm7228_vm13, %v3482_v26  ;;  %vm7243_vm13 = vmmov %vm7201_vm0 }
0x16f3   :  { %5314 = vmatpush3.xpose.msk.msra.mxu1 %vm7229_vm6, %v3482_v26  ;;  %vm7244_vm6 = vcmask 523264  }
0x16f4   :  { %5372 = vmatprep.subr.mxu1 %v4586_v20 }
0x1733   :  { %v3668_v61 = vpop.permute.xlu1 %3667 }
0x1737   :  { %v3670_v29 = vpop.permute.xlu0 %3669  ;;  %v3664_v59 = vpop.permute.xlu1 %3663 }
0x1738   :  { %5318 = vmatprep.subr.mxu0 %v3670_v29 }
0x1739   :  { %5319 = vmatpush3.msra.mxu0 %v3670_v29 }
0x173a   :  { %5320 = vmatprep.subr.mxu0 %v3668_v61 }
0x173b   :  { %5321 = vmatpush3.msra.mxu0 %v3668_v61  ;;  %v3666_v30 = vpop.permute.xlu0 %3665  ;;  %v3660_v16 = vpop.permute.xlu1 %3659  ;;  %v4604_v61 = vld [vmem:[%s7044_s2 + $0xf8] sm:$0xff] }
0x173c   :  { %5322 = vmatprep.subr.mxu0 %v3666_v30 }
0x173d   :  { %5323 = vmatpush3.msra.mxu0 %v3666_v30 }
0x173e   :  { %5324 = vmatprep.subr.mxu0 %v3664_v59 }
0x173f   :  { %5325 = vmatpush3.msra.mxu0 %v3664_v59  ;;  %v3662_v27 = vpop.permute.xlu0 %3661  ;;  %v3656_v34 = vpop.permute.xlu1 %3655 }
0x1740   :  { %5326 = vmatprep.subr.mxu0 %v3662_v27 }
0x1741   :  { %5327 = vmatpush3.msra.mxu0 %v3662_v27 }
0x1742   :  { %5328 = vmatprep.subr.mxu0 %v3660_v16 }
0x1743   :  { %v3658_v6 = vpop.permute.xlu0 %3657  ;;  %5329 = vmatpush3.msra.mxu0 %v3660_v16  ;;  %v3652_v14 = vpop.permute.xlu1 %3651 }
0x1744   :  { %5330 = vmatprep.subr.mxu0 %v3658_v6 }
0x1745   :  { %5331 = vmatpush3.msra.mxu0 %v3658_v6 }
0x1746   :  { %5332 = vmatprep.subr.mxu0 %v3656_v34 }
0x1747   :  { %5333 = vmatpush3.msra.mxu0 %v3656_v34  ;;  %v3654_v55 = vpop.permute.xlu0 %3653 }
0x1748   :  { %5334 = vmatprep.subr.mxu0 %v3654_v55 }
0x1749   :  { %5335 = vmatpush3.msra.mxu0 %v3654_v55 }
0x174a   :  { %5336 = vmatprep.subr.mxu0 %v3652_v14 }
0x174b   :  { %5337 = vmatpush3.msra.mxu0 %v3652_v14 }
0x1757   :  { %v5273_v38 = vpop.f32.mrf.mxu1 }
0x1758   :  { %v3384_v28 = vadd.f32 %v5273_v38, %v3304_v54 }
0x1759   :  { %v3378_v35 = vpop.f32.mrf.mxu1 }
0x175a   :  { %v3379_v37 = vadd.f32 %v3378_v35, %v3304_v54 }
0x175c   :  { %5315 = vmatprep.mubr.msk.f32.mxu1 %vm7230_vm11, %v3379_v37  ;;  %vm7245_vm11 = vmmov %vm7201_vm0 }
0x175d   :  { %5316 = vmatmul.mubr.msk.f32.vlgmr.msra.gmra.mxu1 %vm7231_vm3, %v3384_v28  ;;  %vm7246_vm3 = vmmov %vm7244_vm6 }
0x175e   :  { %5373 = vmatpush3.msra.mxu1 %v4586_v20 }
0x175f   :  { %5374 = vmatprep.subr.mxu1 %v4585_v23 }
0x1760   :  { %5375 = vmatpush3.msra.mxu1 %v4585_v23 }
0x1761   :  { %5376 = vmatprep.subr.mxu1 %v4584_v24 }
0x1762   :  { %5377 = vmatpush3.msra.mxu1 %v4584_v24 }
0x181d   :  { %v5317_v51 = vpop.f32.mrf.mxu1 }
0x181e   :  { %v3620_v58 = vadd.f32 %v5317_v51, %v6208_v40 }
0x181f   :  { %v3614_v48 = vpop.f32.mrf.mxu1 }
0x1820   :  { %v3615_v56 = vadd.f32 %v3614_v48, %v6211_v12  ;;  %v3626_v3 = vsel %vm1865_vm12, %v3620_v58, -inf }
0x1821   :  { %3627 = vmax.xlane.f32.xlu1 %v3626_v3  ;;  %v4605_v3 = vld [vmem:[%s7046_s4 + $0x6] sm:$0x3] }
0x1822   :  { %v3623_v33 = vsel %vm1865_vm12, %v3615_v56, -inf }
0x1823   :  { %3624 = vmax.xlane.f32.xlu0 %v3623_v33  ;;  %v7247_v33 = vld [vmem:[#allocation5_spill] sm:$0xff] }
0x1832   :  { %3647 = vrot.lane.b32.xlu1 %v3494_v63, %s5545_s19  ;;  %v7248_v63 = vsub.s32 0, %v7247_v33 }
0x1836   :  { %3943 = vrot.lane.b32.xlu1 %v4585_v23, %s5545_s19 }
0x1839   :  { %3649 = vrot.lane.b32.xlu0 %v3495_v46, %s5545_s19  ;;  %v4090_v46 = vrot.slane %v4605_v3, %v7248_v63 }
0x183d   :  { %3945 = vrot.lane.b32.xlu0 %v4586_v20, %s5545_s19 }
0x1841   :  { %3941 = vrot.lane.b32.xlu0 %v4584_v24, %s5545_s19 }
0x1845   :  { %3951 = vrot.lane.b32.xlu0 %v4588_v41, %s5545_s19 }
0x18aa   :  { %v3628_v40 = vpop.xlane.xlu1 %3627 }
0x18ab   :  { %v3630_v15 = vsub.f32 %v3620_v58, %v3628_v40  ;;  %v4600_v58 = vld [vmem:[%s7044_s2 + $0xb8] sm:$0xff]  ;;  %v7249_v40 = vsub.s32 1, %v7247_v33 }
0x18ac   :  { %v3625_v10 = vpop.xlane.xlu0 %3624 }
0x18ad   :  { %v3629_v12 = vsub.f32 %v3615_v56, %v3625_v10  ;;  %v3633_v31 = vmul.f32 1.442695, %v3630_v15  ;;  %v4598_v56 = vld [vmem:[%s7044_s2 + $0x98] sm:$0xff]  ;;  %v4094_v15 = vrot.slane %v4605_v3, %v7249_v40 }
0x18ae   :  { %v3648_v9 = vpop.permute.xlu1 %3647 }
0x18af   :  { %v3631_v5 = vmul.f32 1.442695, %v3629_v12 }
0x18b0   :  { %v3650_v1 = vpop.permute.xlu0 %3649 }
0x18b1   :  { %5498 = vpow2.f32 %v3631_v5  ;;  %5338 = vmatprep.subr.mxu0 %v3650_v1 }
0x18b2   :  { %5500 = vpow2.f32 %v3633_v31  ;;  %5339 = vmatpush3.msra.mxu0 %v3650_v1  ;;  %v3944_v18 = vpop.permute.xlu1 %3943 }
0x18b3   :  { %5340 = vmatprep.subr.mxu0 %v3648_v9 }
0x18b4   :  { %5341 = vmatpush3.msra.mxu0 %v3648_v9 }
0x18b5   :  { %5345 = vmatprep.subr.msk.mxu0 %vm7137_vm9, %v7182_v7 }
0x18be   :  { %v5499_v8 = vpop.eup %5498 }
0x18bf   :  { %v5501_v49 = vpop.eup %5500  ;;  %5342 = vmatprep.mubr.msk.f32.mxu0 %vm1865_vm12, %v5499_v8 }
0x18c0   :  { %5343 = vmatmul.mubr.msk.f32.vlgmr.msra.gmra.mxu0 %vm1865_vm12, %v5501_v49 }
0x18c1   :  { %5346 = vmatpush3.msk.msra.mxu0 %vm7137_vm9, %v7182_v7  ;;  %5369 = vmatprep.mubr.msk.f32.mxu0 %vm1865_vm12, %v5499_v8 }
0x18c2   :  { %5347 = vmatprep.subr.msk.mxu0 %vm7137_vm9, %v7182_v7 }
0x18c3   :  { %5348 = vmatpush3.msk.msra.mxu0 %vm7137_vm9, %v7182_v7 }
0x18c4   :  { %5349 = vmatprep.subr.msk.mxu0 %vm7137_vm9, %v7182_v7 }
0x18c5   :  { %5350 = vmatpush3.msk.msra.mxu0 %vm7137_vm9, %v7182_v7  ;;  %vm7232_vm9 = vcmp.lt.s32.totalorder %v5640_v19, 8  ;;  %v4583_v19 = vld [vmem:[%s7044_s2 + $0x90] sm:$0xff] }
0x18c6   :  { %5351 = vmatprep.subr.msk.mxu0 %vm7138_vm5, %v7182_v7  ;;  %3939 = vrot.lane.b32.xlu1 %v4583_v19, %s5545_s19 }
0x18c7   :  { %5352 = vmatpush3.msk.msra.mxu0 %vm7138_vm5, %v7182_v7  ;;  %5378 = vmatprep.subr.mxu1 %v4583_v19 }
0x18c8   :  { %5353 = vmatprep.subr.msk.mxu0 %vm7138_vm5, %v7182_v7  ;;  %5379 = vmatpush3.msra.mxu1 %v4583_v19 }
0x18c9   :  { %5354 = vmatpush3.msk.msra.mxu0 %vm7138_vm5, %v7182_v7 }
0x18ca   :  { %5355 = vmatprep.subr.msk.mxu0 %vm7138_vm5, %v7182_v7 }
0x18cb   :  { %5356 = vmatpush3.msk.msra.mxu0 %vm7138_vm5, %v7182_v7  ;;  %vm7233_vm5 = vmmov %vm7232_vm9 }
0x18cc   :  { %5357 = vmatprep.subr.msk.mxu0 %vm7139_vm8, %v7182_v7  ;;  %vm7234_vm7 = vmmov %vm7233_vm5 }
0x18cd   :  { %5358 = vmatpush3.msk.msra.mxu0 %vm7139_vm8, %v7182_v7  ;;  %vm7235_vm10 = vmmov %vm7233_vm5 }
0x18ce   :  { %5359 = vmatprep.subr.msk.mxu0 %vm7139_vm8, %v7182_v7  ;;  %vm7236_vm4 = vmmov %vm7233_vm5 }
0x18cf   :  { %5360 = vmatpush3.msk.msra.mxu0 %vm7139_vm8, %v7182_v7 }
0x18d0   :  { %5361 = vmatprep.subr.msk.mxu0 %vm7139_vm8, %v7182_v7 }
0x18d1   :  { %5362 = vmatpush3.msk.msra.mxu0 %vm7139_vm8, %v7182_v7  ;;  %vm7237_vm8 = vmmov %vm7236_vm4 }
0x18d2   :  { %5363 = vmatprep.subr.msk.mxu0 %vm7232_vm9, %v7182_v7  ;;  %vm7250_vm9 = vmmov %vm7246_vm3 }
0x18d3   :  { %5364 = vmatpush3.msk.msra.mxu0 %vm7233_vm5, %v7182_v7  ;;  %vm7251_vm5 = vmmov %vm7246_vm3 }
0x18d4   :  { %5365 = vmatprep.subr.msk.mxu0 %vm7234_vm7, %v7182_v7  ;;  %vm7252_vm7 = vmmov %vm7201_vm0 }
0x18d5   :  { %5366 = vmatpush3.msk.msra.mxu0 %vm7235_vm10, %v7182_v7  ;;  %vm7253_vm10 = vmmov %vm7201_vm0 }
0x18d6   :  { %5367 = vmatprep.subr.msk.mxu0 %vm7236_vm4, %v7182_v7  ;;  %vm7254_vm4 = vmmov %vm7246_vm3 }
0x18d7   :  { %5368 = vmatpush3.msk.msra.mxu0 %vm7237_vm8, %v7182_v7  ;;  %v3946_v7 = vpop.permute.xlu0 %3945  ;;  %vm7255_vm8 = vmmov %vm7201_vm0 }
0x18d8   :  { %5370 = vmatmul.mubr.msk.f32.vlgmr.msra.gmra.mxu0 %vm1865_vm12, %v5501_v49  ;;  %5383 = vmatprep.subr.mxu0 %v3946_v7  ;;  %vm7238_vm12 = vmmov %vm7201_vm0 }
0x18d9   :  { %5384 = vmatpush3.msra.mxu0 %v3946_v7 }
0x18da   :  { %5385 = vmatprep.subr.mxu0 %v3944_v18 }
0x18db   :  { %5386 = vmatpush3.msra.mxu0 %v3944_v18  ;;  %v3942_v4 = vpop.permute.xlu0 %3941 }
0x18dc   :  { %5387 = vmatprep.subr.mxu0 %v3942_v4 }
0x18dd   :  { %5388 = vmatpush3.msra.mxu0 %v3942_v4  ;;  %v4622_v4 = vld [vmem:[%s7045_s3 + $0xf0] sm:$0xff] }
0x18df   :  { %v3952_v0 = vpop.permute.xlu0 %3951 }
0x1938   :  { %v3940_v36 = vpop.permute.xlu1 %3939 }
0x1939   :  { %5389 = vmatprep.subr.mxu0 %v3940_v36 }
0x193a   :  { %5390 = vmatpush3.msra.mxu0 %v3940_v36  ;;  %v4621_v36 = vld [vmem:[%s7045_s3 + $0xe8] sm:$0xff] }
0x1980   :  { %v5344_v47 = vpop.f32.mrf.mxu0 }
0x1982   :  { %v3755_v44 = vpop.f32.mrf.mxu0 }
0x1998   :  { %v5371_v45 = vpop.f32.mrf.mxu0 }
0x1999   :  { %5502 = vrcp.f32 %v5371_v45 }
0x199a   :  { %v3830_v57 = vpop.f32.mrf.mxu0 }
0x199b   :  { %5504 = vrcp.f32 %v3830_v57 }
0x19a6   :  { %v5503_v50 = vpop.eup %5502 }
0x19a7   :  { %v3842_v62 = vmul.f32 %v5503_v50, %v5344_v47  ;;  %v4595_v47 = vld [vmem:[%s7047_s5 + $0xc] ss:$0 sm:$0xff]  ;;  %v4596_v50 = vld [vmem:[%s7047_s5 + $0xd] ss:$0 sm:$0xff] }
0x19a8   :  { %v5505_v21 = vpop.eup %5504 }
0x19a9   :  { %v3840_v42 = vmul.f32 %v5505_v21, %v3755_v44 }
0x19ab   :  { %5380 = vmatprep.mubr.msk.f32.mxu1 %vm7238_vm12, %v3840_v42  ;;  %vm7256_vm12 = vmmov %vm7201_vm0 }
0x19ac   :  { %5381 = vmatmul.mubr.msk.f32.vlgmr.msra.gmra.mxu1 %vm7201_vm0, %v3842_v62 }
0x1a6c   :  { %v5382_v13 = vpop.f32.mrf.mxu1 }
0x1a6d   :  { %v3932_v39 = vadd.f32 %v5382_v13, %v4588_v41  ;;  %v4620_v13 = vld [vmem:[%s7045_s3 + $0xe0] sm:$0xff] }
0x1a6e   :  { %v3926_v22 = vpop.f32.mrf.mxu1 }
0x1a6f   :  { %v3927_v60 = vadd.f32 %v4588_v41, %v3926_v22  ;;  %v4623_v41 = vld [vmem:[%s7045_s3 + $0xf8] sm:$0xff] }
0x1a70   :  { %5405 = vmatprep.subr.mxu0 %v4623_v41  ;;  %v4619_v22 = vld [vmem:[%s7045_s3 + $0xd8] sm:$0xff] }
0x1a71   :  { %5391 = vmatprep.mubr.msk.f32.mxu0 %vm7239_vm15, %v3927_v60  ;;  %v4618_v60 = vld [vmem:[%s7045_s3 + $0xd0] sm:$0xff]  ;;  %vm7257_vm15 = vmmov %vm7201_vm0 }
0x1a72   :  { %5392 = vmatmul.mubr.msk.f32.vlgmr.msra.gmra.mxu0 %vm7240_vm2, %v3932_v39  ;;  %v4617_v39 = vld [vmem:[%s7045_s3 + $0xc8] sm:$0xff]  ;;  %vm7258_vm2 = vmmov %vm7201_vm0 }
0x1a73   :  { %5406 = vmatpush3.msra.mxu0 %v4623_v41 }
0x1a74   :  { %5407 = vmatprep.subr.mxu0 %v4622_v4 }
0x1a75   :  { %5408 = vmatpush3.msra.mxu0 %v4622_v4 }
0x1a76   :  { %5409 = vmatprep.subr.mxu0 %v4621_v36 }
0x1a77   :  { %5410 = vmatpush3.msra.mxu0 %v4621_v36 }
0x1a78   :  { %5411 = vmatprep.subr.mxu0 %v4620_v13 }
0x1a79   :  { %5412 = vmatpush3.msra.mxu0 %v4620_v13 }
0x1a7a   :  { %5413 = vmatprep.subr.mxu0 %v4619_v22 }
0x1a7b   :  { %5414 = vmatpush3.msra.mxu0 %v4619_v22  ;;  %v4626_v22 = vld [vmem:[%s7048_s6] ss:$0 sm:$0xff] }
0x1a7c   :  { %5415 = vmatprep.subr.mxu0 %v4618_v60 }
0x1a7d   :  { %5416 = vmatpush3.msra.mxu0 %v4618_v60 }
0x1a7e   :  { %5417 = vmatprep.subr.mxu0 %v4617_v39 }
0x1a7f   :  { %5418 = vmatpush3.msra.mxu0 %v4617_v39  ;;  %v4627_v39 = vld [vmem:[%s7048_s6 + $0x1] ss:$0 sm:$0xff] }
0x1b32   :  { %v5393_v17 = vpop.f32.mrf.mxu0 }
0x1b33   :  { %v4032_v53 = vadd.f32 %v5393_v17, %v3952_v0  ;;  %v4615_v17 = vld [vmem:[%s7045_s3 + $0xb8] sm:$0xff] }
0x1b34   :  { %v4026_v32 = vpop.f32.mrf.mxu0 }
0x1b35   :  { %v6918_v25 = vadd.f32 %v4032_v53, %v6675_v52  ;;  %v4027_v43 = vadd.f32 %v4026_v32, %v3952_v0  ;;  %v4602_v52 = vld [vmem:[%s7044_s2 + $0xd8] sm:$0xff]  ;;  %v4616_v0 = vld [vmem:[%s7045_s3 + $0xc0] sm:$0xff]  ;;  %v4614_v53 = vld [vmem:[%s7045_s3 + $0xb0] sm:$0xff] }
0x1b36   :  { %5419 = vmatprep.subr.mxu0 %v4616_v0  ;;  %v4613_v32 = vld [vmem:[%s7045_s3 + $0xa8] sm:$0xff] }
0x1b37   :  { %v6921_v11 = vadd.f32 %v4027_v43, %v6678_v2  ;;  %v4042_v26 = vsel %vm7241_vm14, %v6918_v25, 0.0  ;;  %5420 = vmatpush3.msra.mxu0 %v4616_v0  ;;  %v4612_v43 = vld [vmem:[%s7045_s3 + $0xa0] sm:$0xff]  ;;  %vm7259_vm14 = vmmov %vm7201_vm0 }
0x1b38   :  { %4043 = vadd.xlane.f32.xlu0 %v4042_v26  ;;  %5421 = vmatprep.subr.mxu0 %v4615_v17  ;;  %v4611_v26 = vld [vmem:[%s7045_s3 + $0x98] sm:$0xff] }
0x1b39   :  { %v4039_v54 = vsel %vm7242_vm1, %v6921_v11, 0.0  ;;  %5422 = vmatpush3.msra.mxu0 %v4615_v17 }
0x1b3a   :  { %4040 = vadd.xlane.f32.xlu1 %v4039_v54  ;;  %5423 = vmatprep.subr.mxu0 %v4614_v53  ;;  %v4610_v54 = vld [vmem:[%s7045_s3 + $0x90] sm:$0xff] }
0x1b3b   :  { %5424 = vmatpush3.msra.mxu0 %v4614_v53 }
0x1b3c   :  { %5425 = vmatprep.subr.mxu0 %v4613_v32 }
0x1b3d   :  { %5426 = vmatpush3.msra.mxu0 %v4613_v32 }
0x1b3e   :  { %5427 = vmatprep.subr.mxu0 %v4612_v43 }
0x1b3f   :  { %5428 = vmatpush3.msra.mxu0 %v4612_v43 }
0x1b40   :  { %5429 = vmatprep.subr.mxu0 %v4611_v26 }
0x1b41   :  { %5430 = vmatpush3.msra.mxu0 %v4611_v26 }
0x1b42   :  { %5431 = vmatprep.subr.mxu0 %v4610_v54 }
0x1b43   :  { %5432 = vmatpush3.msra.mxu0 %v4610_v54 }
0x1b4b   :  { %4115 = vrot.lane.b32.xlu1 %v4586_v20, %s5546_s20 }
0x1b4e   :  { %4117 = vrot.lane.b32.xlu0 %v4604_v61, %s5546_s20  ;;  %v4609_v61 = vld [vmem:[%s7045_s3 + $0x88] sm:$0xff] }
0x1b4f   :  { %4111 = vrot.lane.b32.xlu1 %v4585_v23, %s5546_s20  ;;  %5433 = vmatprep.subr.mxu0 %v4609_v61 }
0x1b50   :  { %5434 = vmatpush3.msra.mxu0 %v4609_v61 }
0x1b53   :  { %4113 = vrot.lane.b32.xlu1 %v4602_v52, %s5546_s20  ;;  %v4608_v52 = vld [vmem:[%s7045_s3 + $0x80] sm:$0xff] }
0x1b54   :  { %5435 = vmatprep.subr.mxu0 %v4608_v52 }
0x1b55   :  { %5436 = vmatpush3.msra.mxu0 %v4608_v52 }
0x1b57   :  { %4107 = vrot.lane.b32.xlu1 %v4584_v24, %s5546_s20 }
0x1b5b   :  { %4103 = vrot.lane.b32.xlu1 %v4583_v19, %s5546_s20 }
0x1b5f   :  { %4127 = vrot.lane.b32.xlu1 %v4090_v46, %s5546_s20 }
0x1bc1   :  { %v4044_v2 = vpop.xlane.xlu0 %4043 }
0x1bc2   :  { %v4046_v29 = vmul.f32 0.03125, %v4044_v2  ;;  %v4625_v2 = vld [vmem:[%s7046_s4 + $0x7] ss:$0 sm:$0xff] }
0x1bc3   :  { %v4041_v59 = vpop.xlane.xlu1 %4040  ;;  %4255 = vrot.lane.b32.xlu1 %v4625_v2, %s5546_s20 }
0x1bc4   :  { %v4048_v30 = vsub.f32 %v6918_v25, %v4046_v29  ;;  %v4045_v16 = vmul.f32 0.03125, %v4041_v59 }
0x1bc5   :  { %v4118_v27 = vpop.permute.xlu0 %4117 }
0x1bc6   :  { %v4047_v34 = vsub.f32 %v6921_v11, %v4045_v16  ;;  %v4050_v6 = vmul.f32 %v4048_v30, %v4048_v30 }
0x1bc7   :  { %v4116_v55 = vpop.permute.xlu1 %4115 }
0x1bc8   :  { %v4054_v14 = vsel %vm7243_vm13, %v4050_v6, 0.0  ;;  %v4049_v38 = vmul.f32 %v4047_v34, %v4047_v34  ;;  %v4122_v35 = vsel %vm7244_vm6, %v4116_v55, %v4118_v27 }
0x1bc9   :  { %4055 = vadd.xlane.f32.xlu0 %v4054_v14  ;;  %5394 = vmatprep.subr.mxu1 %v4122_v35 }
0x1bca   :  { %5395 = vmatpush3.msra.mxu1 %v4122_v35  ;;  %v4051_v37 = vsel %vm7245_vm11, %v4049_v38, 0.0 }
0x1bcb   :  { %v4112_v28 = vpop.permute.xlu1 %4111 }
0x1bcd   :  { %4052 = vadd.xlane.f32.xlu0 %v4051_v37 }
0x1bcf   :  { %v4114_v51 = vpop.permute.xlu1 %4113 }
0x1bd0   :  { %v4121_v48 = vsel %vm7246_vm3, %v4112_v28, %v4114_v51 }
0x1bd1   :  { %5396 = vmatprep.subr.mxu1 %v4121_v48 }
0x1bd2   :  { %5397 = vmatpush3.msra.mxu1 %v4121_v48 }
0x1bd3   :  { %v4108_v1 = vpop.permute.xlu1 %4107 }
0x1bd7   :  { %v4104_v23 = vpop.permute.xlu1 %4103 }
0x1bdb   :  { %v4128_v59 = vpop.permute.xlu1 %4127 }
0x1be3   :  { %4109 = vrot.lane.b32.xlu0 %v4600_v58, %s5546_s20 }
0x1be7   :  { %4105 = vrot.lane.b32.xlu0 %v4598_v56, %s5546_s20 }
0x1beb   :  { %4129 = vrot.lane.b32.xlu0 %v4094_v15, %s5546_s20 }
0x1c52   :  { %v4056_v10 = vpop.xlane.xlu0 %4055 }
0x1c53   :  { %v4058_v12 = vmul.f32 0.03125, %v4056_v10 }
0x1c55   :  { %v4060_v31 = vadd.f32 1e-05, %v4058_v12 }
0x1c56   :  { %v4053_v5 = vpop.xlane.xlu0 %4052 }
0x1c57   :  { %5506 = vrsqrt.f32 %v4060_v31  ;;  %v4057_v9 = vmul.f32 0.03125, %v4053_v5  ;;  %v4256_v31 = vpop.permute.xlu1 %4255 }
0x1c59   :  { %v4059_v8 = vadd.f32 1e-05, %v4057_v9 }
0x1c5a   :  { %v4110_v49 = vpop.permute.xlu0 %4109 }
0x1c5b   :  { %5508 = vrsqrt.f32 %v4059_v8  ;;  %v4120_v20 = vsel %vm7250_vm9, %v4108_v1, %v4110_v49 }
0x1c5c   :  { %5398 = vmatprep.subr.mxu1 %v4120_v20 }
0x1c5d   :  { %5399 = vmatpush3.msra.mxu1 %v4120_v20 }
0x1c5e   :  { %v4106_v24 = vpop.permute.xlu0 %4105 }
0x1c5f   :  { %v4119_v19 = vsel %vm7251_vm5, %v4104_v23, %v4106_v24 }
0x1c60   :  { %5400 = vmatprep.subr.mxu1 %v4119_v19 }
0x1c61   :  { %5401 = vmatpush3.msra.mxu1 %v4119_v19 }
0x1c62   :  { %v4130_v29 = vpop.permute.xlu0 %4129 }
0x1c64   :  { %v5507_v7 = vpop.eup %5506 }
0x1c65   :  { %v4064_v18 = vmul.f32 %v5507_v7, %v4048_v30  ;;  %v4131_v30 = vsel %vm7254_vm4, %v4128_v59, %v4130_v29 }
0x1c67   :  { %v4070_v57 = vmul.f32 %v4595_v47, %v4064_v18 }
0x1c68   :  { %v5509_v44 = vpop.eup %5508 }
0x1c69   :  { %v4063_v45 = vmul.f32 %v5509_v44, %v4047_v34  ;;  %v4076_v62 = vadd.f32 %v4596_v50, %v4070_v57 }
0x1c6b   :  { %v4069_v21 = vmul.f32 %v4595_v47, %v4063_v45 }
0x1c6d   :  { %v4075_v42 = vadd.f32 %v4596_v50, %v4069_v21 }
0x1c6f   :  { %5402 = vmatprep.mubr.msk.f32.mxu1 %vm7252_vm7, %v4075_v42 }
0x1c70   :  { %5403 = vmatmul.mubr.msk.f32.vlgmr.msra.gmra.mxu1 %vm7253_vm10, %v4076_v62 }
0x1d30   :  { %v5404_v16 = vpop.f32.mrf.mxu1 }
0x1d31   :  { %v4211_v27 = vadd.f32 %v5404_v16, %v4131_v30 }
0x1d32   :  { %v4205_v34 = vpop.f32.mrf.mxu1 }
0x1d33   :  { %v4217_v6 = vmul.f32 %v4211_v27, %v4211_v27  ;;  %v4206_v55 = vadd.f32 %v4205_v34, %v4131_v30  ;;  %v4215_v15 = vmul.f32 0.5, %v4211_v27 }
0x1d35   :  { %v4219_v14 = vmul.f32 %v4217_v6, %v4211_v27  ;;  %v4216_v38 = vmul.f32 %v4206_v55, %v4206_v55  ;;  %v4214_v46 = vmul.f32 0.5, %v4206_v55 }
0x1d37   :  { %v4221_v35 = vmul.f32 0.044715, %v4219_v14  ;;  %v4218_v37 = vmul.f32 %v4216_v38, %v4206_v55 }
0x1d39   :  { %v4223_v28 = vadd.f32 %v4221_v35, %v4211_v27  ;;  %v4220_v51 = vmul.f32 0.044715, %v4218_v37 }
0x1d3b   :  { %v4225_v58 = vmul.f32 0.7978846, %v4223_v28  ;;  %v4222_v48 = vadd.f32 %v4220_v51, %v4206_v55 }
0x1d3d   :  { %5510 = vtanh.f32 %v4225_v58  ;;  %v4224_v56 = vmul.f32 0.7978846, %v4222_v48 }
0x1d3f   :  { %5512 = vtanh.f32 %v4224_v56 }
0x1d4a   :  { %v5511_v3 = vpop.eup %5510 }
0x1d4b   :  { %v4229_v63 = vadd.f32 1.0, %v5511_v3 }
0x1d4c   :  { %v5513_v33 = vpop.eup %5512 }
0x1d4d   :  { %v4228_v40 = vadd.f32 1.0, %v5513_v33  ;;  %v4231_v12 = vmul.f32 %v4229_v63, %v4215_v15 }
0x1d4f   :  { %v4230_v10 = vmul.f32 %v4228_v40, %v4214_v46 }
0x1d51   :  { %5437 = vmatprep.mubr.f32.mxu0 %v4230_v10 }
0x1d52   :  { %5438 = vmatmul.mubr.f32.vlgmr.msra.gmra.mxu0 %v4231_v12 }
0x1e12   :  { %v5439_v5 = vpop.f32.mrf.mxu0 }
0x1e13   :  { %v4330_v1 = vadd.f32 %v5439_v5, %v4256_v31 }
0x1e14   :  { %v4324_v9 = vpop.f32.mrf.mxu0 }
0x1e15   :  { %v4325_v8 = vadd.f32 %v4324_v9, %v4256_v31  ;;  %v4334_v49 = vadd.f32 %v4330_v1, %v6918_v25 }
0x1e17   :  { %v4333_v20 = vadd.f32 %v4325_v8, %v6921_v11  ;;  %v4340_v23 = vsel %vm7255_vm8, %v4334_v49, 0.0 }
0x1e18   :  { %4341 = vadd.xlane.f32.xlu1 %v4340_v23 }
0x1e19   :  { %v4337_v24 = vsel %vm7256_vm12, %v4333_v20, 0.0 }
0x1e1a   :  { %4338 = vadd.xlane.f32.xlu0 %v4337_v24 }
0x1ea1   :  { %v4342_v19 = vpop.xlane.xlu1 %4341 }
0x1ea2   :  { %v4344_v7 = vmul.f32 0.03125, %v4342_v19 }
0x1ea3   :  { %v4339_v18 = vpop.xlane.xlu0 %4338 }
0x1ea4   :  { %v4343_v47 = vmul.f32 0.03125, %v4339_v18  ;;  %v4346_v44 = vsub.f32 %v4334_v49, %v4344_v7 }
0x1ea6   :  { %v4345_v45 = vsub.f32 %v4333_v20, %v4343_v47  ;;  %v4348_v21 = vmul.f32 %v4346_v44, %v4346_v44 }
0x1ea8   :  { %v4347_v57 = vmul.f32 %v4345_v45, %v4345_v45  ;;  %v4352_v25 = vsel %vm7257_vm15, %v4348_v21, 0.0 }
0x1eaa   :  { %v4349_v50 = vsel %vm7201_vm0, %v4347_v57, 0.0 }
0x1eab   :  { %4350 = vadd.xlane.f32.xlu0 %v4349_v50 }
0x1eaf   :  { %4353 = vadd.xlane.f32.xlu0 %v4352_v25 }
0x1f34   :  { %v4351_v11 = vpop.xlane.xlu0 %4350 }
0x1f35   :  { %v4355_v42 = vmul.f32 0.03125, %v4351_v11 }
0x1f37   :  { %v4357_v62 = vadd.f32 1e-05, %v4355_v42 }
0x1f38   :  { %v4354_v41 = vpop.xlane.xlu0 %4353 }
0x1f39   :  { %5514 = vrsqrt.f32 %v4357_v62  ;;  %v4356_v4 = vmul.f32 0.03125, %v4354_v41 }
0x1f3b   :  { %v4358_v36 = vadd.f32 1e-05, %v4356_v4 }
0x1f3d   :  { %5516 = vrsqrt.f32 %v4358_v36 }
0x1f46   :  { %v5515_v13 = vpop.eup %5514 }
0x1f47   :  { %v4361_v60 = vmul.f32 %v5515_v13, %v4345_v45 }
0x1f49   :  { %v4367_v0 = vmul.f32 %v4626_v22, %v4361_v60 }
0x1f4a   :  { %v5517_v17 = vpop.eup %5516 }
0x1f4b   :  { %v4362_v53 = vmul.f32 %v5517_v17, %v4346_v44  ;;  %v4373_v32 = vadd.f32 %v4627_v39, %v4367_v0 }
0x1f4d   :  { %v4368_v43 = vmul.f32 %v4626_v22, %v4362_v53  ;;  %4375 = vst.msk [vmem:[#allocation2] sm:$0xff] %vm7258_vm2, %v4373_v32 }
0x1f4f   :  { %v4374_v26 = vadd.f32 %v4627_v39, %v4368_v43 }
0x1f51   :  { %4376 = vst.msk [vmem:[#allocation2 + $0x8] sm:$0xff] %vm7259_vm14, %v4374_v26 }
0x1f52   :  { %5532 = shalt.err (!%p5529_p4)
}
0x1f53   :  { %s5551_s6 = smov 128   ;;  %s5552_s19 = smov 8  }
0x1f54   :  { %4388 = dma.vmem_to_hbm [thread:$0]  %s4383_s9, 256, %s7049_s7, [#allocation3], %s5551_s6, %s5551_s6, %s5552_s19  }
0x1f55   :  { %5541 = dma.done.wait [#allocation3], 256  }
0x1f56   :  { %5542 = vsyncadd [#allocation3], 4294967040 }
0x1f57   :  { %4392 = vsyncpa [#allocation3], 1 }

</bundles_post_ra>
